<compile_context>
chip_gen: v7x
topology: tpu7x:2x2x1
jax: 0.10.0
libtpu: 0.0.40
codegen_flags: <defaults>
</compile_context>

<pallas_src>
import jax
import jax.numpy as jnp
from jax import lax
from jax.experimental import pallas as pl
from jax.experimental.pallas import tpu as pltpu

_INV_SQRT2 = 0.7071067811865476


def _epilogue(acc, b_row, out_dtype):
    y = acc + b_row                                   # bias + add_value
    # Swish: x*sigmoid(x) == 0.5*x*(1 + tanh(0.5*x))  (one EUP op, no divide)
    y = 0.5 * y * (1.0 + jnp.tanh(0.5 * y))
    y = jnp.tanh(y)                                   # Tanh
    # Exact (erf-based) GELU, matching torch.nn.functional.gelu default.
    y = 0.5 * y * (1.0 + lax.erf(y * jnp.float32(_INV_SQRT2)))
    y = jnp.clip(y, -1.0, 1.0)                        # Hardtanh(-1, 1)
    return y.astype(out_dtype)


def _fused_kernel_single(x_ref, w_ref, b_ref, o_ref):
    """Single pass: whole K fits in VMEM, no accumulator, direct store."""
    acc = lax.dot_general(
        x_ref[...], w_ref[...],
        dimension_numbers=(((1,), (1,)), ((), ())),   # contract K with K
        preferred_element_type=jnp.float32,
    )
    o_ref[...] = _epilogue(acc, b_ref[...], o_ref.dtype)


def _fused_kernel_ksplit(x_ref, w_ref, b_ref, o_ref, acc_ref):
    """K-split path for very large K: resident f32 accumulator."""
    k = pl.program_id(2)

    @pl.when(k == 0)
    def _():
        acc_ref[...] = jnp.zeros_like(acc_ref)

    acc_ref[...] += lax.dot_general(
        x_ref[...], w_ref[...],
        dimension_numbers=(((1,), (1,)), ((), ())),
        preferred_element_type=jnp.float32,
    )

    @pl.when(k == pl.num_programs(2) - 1)
    def _():
        o_ref[...] = _epilogue(acc_ref[...], b_ref[...], o_ref.dtype)


def _round_up(v, m):
    return ((v + m - 1) // m) * m


def linear_add_swish_tanh_gelu_hardtanh(x, weight, bias, add_value):
    """x: (M, K); weight: (N, K) as in nn.Linear; bias, add_value: (N,)."""
    M, K = x.shape
    N, Kw = weight.shape
    assert K == Kw

    b_row = (bias + add_value).reshape(1, N).astype(jnp.float32)

    # ---- tile selection ----
    # M tile: feed the MXU full-width when possible; pad with zero rows if not.
    tm = 256 if M >= 256 else _round_up(M, 8)
    Mp = _round_up(M, tm)

    # N tile: lane-dense multiple of 128 (512 preferred); pad N if needed.
    Np = _round_up(N, 128)
    if Np % 512 == 0:
        tn = 512
    elif Np % 256 == 0:
        tn = 256
    else:
        tn = 128

    # K: single pass (no k grid axis, no accumulator) while tiles stay well
    # under the ~32 MiB scoped-VMEM default even on v7x.
    single_pass = K <= 2048
    if single_pass:
        tk, Kp = K, K
    else:
        tk = 512
        Kp = _round_up(K, tk)

    # ---- zero padding (does not change the matmul; padded rows/cols sliced) --
    if Mp != M or Kp != K:
        x = jnp.pad(x, ((0, Mp - M), (0, Kp - K)))
    if Np != N or Kp != K:
        weight = jnp.pad(weight, ((0, Np - N), (0, Kp - K)))
    if Np != N:
        b_row = jnp.pad(b_row, ((0, 0), (0, Np - N)))

    out_dtype = x.dtype

    if single_pass:
        grid = (Mp // tm, Np // tn)
        out = pl.pallas_call(
            _fused_kernel_single,
            out_shape=jax.ShapeDtypeStruct((Mp, Np), out_dtype),
            grid_spec=pltpu.PrefetchScalarGridSpec(
                num_scalar_prefetch=0,
                grid=grid,
                in_specs=[
                    pl.BlockSpec((tm, tk), lambda i, j: (i, 0)),
                    pl.BlockSpec((tn, tk), lambda i, j: (j, 0)),
                    pl.BlockSpec((1, tn), lambda i, j: (0, j)),
                ],
                out_specs=pl.BlockSpec((tm, tn), lambda i, j: (i, j)),
            ),
            compiler_params=pltpu.CompilerParams(
                dimension_semantics=("parallel", "parallel")
            ),
        )(x, weight, b_row)
    else:
        grid = (Mp // tm, Np // tn, Kp // tk)
        out = pl.pallas_call(
            _fused_kernel_ksplit,
            out_shape=jax.ShapeDtypeStruct((Mp, Np), out_dtype),
            grid_spec=pltpu.PrefetchScalarGridSpec(
                num_scalar_prefetch=0,
                grid=grid,
                in_specs=[
                    pl.BlockSpec((tm, tk), lambda i, j, k: (i, k)),
                    pl.BlockSpec((tn, tk), lambda i, j, k: (j, k)),
                    pl.BlockSpec((1, tn), lambda i, j, k: (0, j)),
                ],
                out_specs=pl.BlockSpec((tm, tn), lambda i, j, k: (i, j)),
                scratch_shapes=[pltpu.VMEM((tm, tn), jnp.float32)],
            ),
            compiler_params=pltpu.CompilerParams(
                dimension_semantics=("parallel", "parallel", "arbitrary")
            ),
        )(x, weight, b_row)

    if Mp != M or Np != N:
        out = out[:M, :N]
    return out


def _reference(x, weight, bias, add_value):
    y = x @ weight.T + bias
    y = y + add_value
    y = jax.nn.sigmoid(y) * y
    y = jnp.tanh(y)
    y = 0.5 * y * (1.0 + lax.erf(y / jnp.sqrt(jnp.float32(2.0))))
    return jnp.clip(y, -1.0, 1.0)


if __name__ == "__main__":
    # Shapes implied by the module: in_features=1024, out_features=512.
    batch, in_features, out_features = 128, 1024, 512

    key = jax.random.PRNGKey(0)
    kx, kw, kb, ka = jax.random.split(key, 4)

    x = jax.random.normal(kx, (batch, in_features), dtype=jnp.float32)
    # Deterministic parameter init (synthetic; mimics nn.Linear init scale).
    bound = 1.0 / jnp.sqrt(jnp.float32(in_features))
    weight = jax.random.uniform(kw, (out_features, in_features),
                                dtype=jnp.float32, minval=-bound, maxval=bound)
    bias = jax.random.uniform(kb, (out_features,),
                              dtype=jnp.float32, minval=-bound, maxval=bound)
    add_value = jax.random.normal(ka, (out_features,), dtype=jnp.float32)

    out = linear_add_swish_tanh_gelu_hardtanh(x, weight, bias, add_value)
    out = jax.block_until_ready(out)

    ref = _reference(x, weight, bias, add_value)
    assert out.shape == (batch, out_features)
    assert jnp.allclose(out, ref, atol=1e-5, rtol=1e-5)

    print("KERNEL_OK")
</pallas_src>

<mosaic_0001>
module attributes {stable_mosaic.version = 11 : i64} {
  func.func @_fused_kernel_single(%arg0: i32, %arg1: i32, %arg2: memref<128x1024xf32, #tpu.memory_space<vmem>>, %arg3: memref<512x1024xf32, #tpu.memory_space<vmem>>, %arg4: memref<1x512xf32, #tpu.memory_space<vmem>>, %arg5: memref<128x512xf32, #tpu.memory_space<vmem>>) attributes {dimension_semantics = [#tpu.dimension_semantics<parallel>, #tpu.dimension_semantics<parallel>], iteration_bounds = array<i64: 1, 1>, scalar_prefetch = 0 : i64, scratch_operands = 0 : i64, tpu.core_type = #tpu.core_type<tc>, window_params = [{transform_indices = @transform_0, window_bounds = array<i64: 128, 1024>}, {transform_indices = @transform_1, window_bounds = array<i64: 512, 1024>}, {transform_indices = @transform_2, window_bounds = array<i64: 1, 512>}, {transform_indices = @transform_3, window_bounds = array<i64: 128, 512>}]} {
    %c0 = arith.constant 0 : index
    %c0_0 = arith.constant 0 : index
    %0 = vector.load %arg2[%c0, %c0_0] : memref<128x1024xf32, #tpu.memory_space<vmem>>, vector<128x1024xf32>
    %c0_1 = arith.constant 0 : index
    %c0_2 = arith.constant 0 : index
    %1 = vector.load %arg3[%c0_1, %c0_2] : memref<512x1024xf32, #tpu.memory_space<vmem>>, vector<512x1024xf32>
    %cst = arith.constant dense<0.000000e+00> : vector<128x512xf32>
    %2 = tpu.matmul %0, %1, %cst {dimension_numbers = #tpu.dot_dimension_numbers<[1], [1], [0], [0], [0, 0, 1, 0], [], []>} : vector<128x1024xf32>, vector<512x1024xf32>, vector<128x512xf32> -> vector<128x512xf32>
    %c0_3 = arith.constant 0 : index
    %c0_4 = arith.constant 0 : index
    %3 = vector.load %arg4[%c0_3, %c0_4] : memref<1x512xf32, #tpu.memory_space<vmem>>, vector<1x512xf32>
    %4 = vector.broadcast %3 : vector<1x512xf32> to vector<128x512xf32>
    %5 = arith.addf %2, %4 : vector<128x512xf32>
    %cst_5 = arith.constant 5.000000e-01 : f32
    %6 = vector.broadcast %cst_5 : f32 to vector<128x512xf32>
    %7 = arith.mulf %6, %5 : vector<128x512xf32>
    %cst_6 = arith.constant 5.000000e-01 : f32
    %8 = vector.broadcast %cst_6 : f32 to vector<128x512xf32>
    %9 = arith.mulf %8, %5 : vector<128x512xf32>
    %10 = math.tanh %9 : vector<128x512xf32>
    %cst_7 = arith.constant 1.000000e+00 : f32
    %11 = vector.broadcast %cst_7 : f32 to vector<128x512xf32>
    %12 = arith.addf %11, %10 : vector<128x512xf32>
    %13 = arith.mulf %7, %12 : vector<128x512xf32>
    %14 = math.tanh %13 : vector<128x512xf32>
    %cst_8 = arith.constant 5.000000e-01 : f32
    %15 = vector.broadcast %cst_8 : f32 to vector<128x512xf32>
    %16 = arith.mulf %15, %14 : vector<128x512xf32>
    %cst_9 = arith.constant 0.707106769 : f32
    %17 = vector.broadcast %cst_9 : f32 to vector<128x512xf32>
    %18 = arith.mulf %14, %17 : vector<128x512xf32>
    %19 = math.erf %18 : vector<128x512xf32>
    %cst_10 = arith.constant 1.000000e+00 : f32
    %20 = vector.broadcast %cst_10 : f32 to vector<128x512xf32>
    %21 = arith.addf %20, %19 : vector<128x512xf32>
    %22 = arith.mulf %16, %21 : vector<128x512xf32>
    %cst_11 = arith.constant -1.000000e+00 : f32
    %cst_12 = arith.constant 1.000000e+00 : f32
    %23 = vector.broadcast %cst_11 : f32 to vector<128x512xf32>
    %24 = arith.maximumf %23, %22 : vector<128x512xf32>
    %25 = vector.broadcast %cst_12 : f32 to vector<128x512xf32>
    %26 = arith.minimumf %25, %24 : vector<128x512xf32>
    %c0_13 = arith.constant 0 : index
    %c0_14 = arith.constant 0 : index
    %27 = vector.load %arg5[%c0_13, %c0_14] : memref<128x512xf32, #tpu.memory_space<vmem>>, vector<128x512xf32>
    tpu.vector_store %arg5[%c0_13, %c0_14], %26 {strides = array<i32>} : memref<128x512xf32, #tpu.memory_space<vmem>>, vector<128x512xf32>,
    return
  }
  func.func @transform_0(%arg0: i32, %arg1: i32) -> (i32, i32) {
    %c0_i32 = arith.constant 0 : i32
    %c0_i32_0 = arith.constant 0 : i32
    return %arg0, %c0_i32 : i32, i32
  }
  func.func @transform_1(%arg0: i32, %arg1: i32) -> (i32, i32) {
    %c0_i32 = arith.constant 0 : i32
    %c0_i32_0 = arith.constant 0 : i32
    return %arg1, %c0_i32 : i32, i32
  }
  func.func @transform_2(%arg0: i32, %arg1: i32) -> (i32, i32) {
    %c0_i32 = arith.constant 0 : i32
    %c0_i32_0 = arith.constant 0 : i32
    return %c0_i32, %arg1 : i32, i32
  }
  func.func @transform_3(%arg0: i32, %arg1: i32) -> (i32, i32) {
    %c0_i32 = arith.constant 0 : i32
    return %arg0, %arg1 : i32, i32
  }
}

</mosaic_0001>

<bundles_post_ra>
// kernel: tpu_custom_call.1
= control target key start
LH: loop header
LB: loop body
LE: loop exit
PB: predicated region body
PF: predicated region fallthrough
CT: control target
= control target key end

     0   :  { %8 = vsyncpa [#allocation3], 0  ;;  %s4779_s0 = inlined_call_operand.hbm [shape: f32[128,1024], index: 0, kind: input, shape index: {}]   ;;  %s4780_s1 = inlined_call_operand.hbm [shape: f32[512,1024], index: 1, kind: input, shape index: {}]   ;;  %s4781_s2 = inlined_call_operand.hbm [shape: f32[1,512], index: 2, kind: input, shape index: {}]   ;;  %s4782_s3 = inlined_call_operand.hbm [shape: f32[128,512], index: 3, kind: output, shape index: {}]  }
   0x1   :  { %9 = vsyncpa [#allocation6], 0 }
   0x2   :  { %10 = vsyncpa [#allocation4], 0  ;;  %s4172_s12 = smov [#allocation5]   ;;  %s4173_s14 = smov [#allocation2]  }
   0x3   :  { %s28_s13 = sshll.u32 %s4172_s12, 4  ;;  %s16_s15 = sshll.u32 %s4173_s14, 4  ;;  %s29_s13 = int_to_ptr.vmem [resolvable:$true] %s28_s13  ;;  %s4200_s15 = int_to_ptr.vmem [resolvable:$true] %s16_s15 }
   0x4   :  { %s4078_s18 = scalar_lea.hbm %s4780_s1, 65536 }
   0x5   :  { %p4079_p0 = scmp.ne.s32.totalorder %s4780_s1, %s4078_s18  ;;  %p4082_p1 = scmp.lt.u32.totalorder %s4078_s18, %s4780_s1 }
   0x7   :  { %p4084_p2 = pnand %p4082_p1, %p4079_p0 }
   0x9   :  { %4087 = shalt.err (!%p4084_p2)
}
   0xa   :  { %s4088_s23 = scalar_lea.vmem %s29_s13, 65536  ;;  %p4093_p4 = scmp.lt.s32.totalorder %s29_s13, %s29_s13 }
   0xb   :  { %p4089_p3 = scmp.ne.s32.totalorder %s29_s13, %s4088_s23  ;;  %p4094_p5 = scmp.lt.s32.totalorder %s4088_s23, %s4088_s23 }
   0xd   :  { %p4095_p6 = por %p4094_p5, %p4093_p4 }
   0xf   :  { %p4096_p7 = pnand %p4095_p6, %p4089_p3 }
  0x11   :  { %4099 = shalt.err (!%p4096_p7)
}
  0x12   :  { %s4174_s24 = smov 1024   ;;  %s4175_s25 = smov 64  }
  0x13   :  { %34 = dma.hbm_to_vmem [thread:$0]  %s4780_s1, 65536, %s29_s13, [#allocation6], %s4174_s24, %s4174_s24, %s4175_s25  }
  0x14   :  { %s4100_s30 = scalar_lea.hbm %s4779_s0, 16384 }
  0x15   :  { %p4101_p8 = scmp.ne.s32.totalorder %s4779_s0, %s4100_s30  ;;  %p4104_p9 = scmp.lt.u32.totalorder %s4100_s30, %s4779_s0 }
  0x17   :  { %p4106_p10 = pnand %p4104_p9, %p4101_p8 }
  0x19   :  { %4109 = shalt.err (!%p4106_p10)
}
  0x1a   :  { %s4110_s8 = scalar_lea.vmem %s4200_s15, 16384  ;;  %p4115_p12 = scmp.lt.s32.totalorder %s4200_s15, %s4200_s15 }
  0x1b   :  { %p4111_p11 = scmp.ne.s32.totalorder %s4200_s15, %s4110_s8  ;;  %p4116_p13 = scmp.lt.s32.totalorder %s4110_s8, %s4110_s8 }
  0x1d   :  { %p4117_p0 = por %p4116_p13, %p4115_p12 }
  0x1f   :  { %p4118_p1 = pnand %p4117_p0, %p4111_p11 }
  0x21   :  { %4121 = shalt.err (!%p4118_p1)
}
  0x22   :  { %22 = dma.hbm_to_vmem [thread:$0]  %s4779_s0, 16384, %s4200_s15, [#allocation3], %s4174_s24, %s4174_s24, %s4175_s25  }
  0x23   :  { %s4176_s10 = smov [#allocation7]   ;;  %s4122_s14 = scalar_lea.hbm %s4781_s2, 64 }
  0x24   :  { %s41_s11 = sshll.u32 %s4176_s10, 4  ;;  %p4123_p2 = scmp.ne.s32.totalorder %s4781_s2, %s4122_s14  ;;  %s42_s11 = int_to_ptr.vmem [resolvable:$true] %s41_s11 }
  0x25   :  { %p4126_p3 = scmp.lt.u32.totalorder %s4122_s14, %s4781_s2 }
  0x27   :  { %p4128_p4 = pnand %p4126_p3, %p4123_p2 }
  0x29   :  { %4131 = shalt.err (!%p4128_p4)
}
  0x2a   :  { %s4132_s20 = scalar_lea.vmem %s42_s11, 64  ;;  %p4137_p6 = scmp.lt.s32.totalorder %s42_s11, %s42_s11 }
  0x2b   :  { %p4133_p5 = scmp.ne.s32.totalorder %s42_s11, %s4132_s20  ;;  %p4138_p7 = scmp.lt.s32.totalorder %s4132_s20, %s4132_s20 }
  0x2d   :  { %p4139_p8 = por %p4138_p7, %p4137_p6 }
  0x2f   :  { %p4140_p9 = pnand %p4139_p8, %p4133_p5 }
  0x31   :  { %4143 = shalt.err (!%p4140_p9)
}
  0x32   :  { %44 = dma.hbm_to_vmem [thread:$0]  %s4781_s2, 64, %s42_s11, [#allocation6]  }
  0x33   :  { %4166 = dma.done.wait [#allocation3], 16384  }
  0x34   :  { %4167 = vsyncadd [#allocation3], 4294950912 }
  0x35   :  { %4168 = dma.done.wait [#allocation6], 65600  }
  0x36   :  { %4169 = vsyncadd [#allocation6], 4294901696  ;;  %v183_v0 = vld [vmem:[#allocation5 + $0x8] sm:$0xff]  ;;  %v182_v5 = vld [vmem:[#allocation5] sm:$0xff]  ;;  %s4177_s2 = smov [#allocation8]  }
  0x37   :  { %v191_v1 = vld [vmem:[#allocation5 + $0x48] sm:$0xff]  ;;  %v190_v6 = vld [vmem:[#allocation5 + $0x40] sm:$0xff]  ;;  %s2841_s21 = sshll.u32 %s4177_s2, 4  ;;  %s2842_s21 = int_to_ptr.vmem [resolvable:$true] %s2841_s21 }
  0x38   :  { %v439_v2 = vld [vmem:[#allocation5 + $0x808] sm:$0xff]  ;;  %v2918_v3 = vpack.c.bf16 %v191_v1, %v183_v0  ;;  %v2920_v8 = vpack.c.bf16 %v190_v6, %v182_v5  ;;  %v438_v9 = vld [vmem:[#allocation5 + $0x800] sm:$0xff]  ;;  %s4144_s22 = scalar_lea.vmem %s2842_s21, 8192  ;;  %p4149_p11 = scmp.lt.s32.totalorder %s2842_s21, %s2842_s21 }
  0x39   :  { %v447_v4 = vld [vmem:[#allocation5 + $0x848] sm:$0xff]  ;;  %v446_v10 = vld [vmem:[#allocation5 + $0x840] sm:$0xff]  ;;  %p4145_p10 = scmp.ne.s32.totalorder %s2842_s21, %s4144_s22  ;;  %p4150_p12 = scmp.lt.s32.totalorder %s4144_s22, %s4144_s22 }
  0x3a   :  { %v3174_v7 = vpack.c.bf16 %v447_v4, %v439_v2  ;;  %v199_v11 = vld [vmem:[#allocation5 + $0x88] sm:$0xff]  ;;  %2919 = vmatprep.subr.bf16.mxu0 %v2918_v3  ;;  %v3176_v12 = vpack.c.bf16 %v446_v10, %v438_v9  ;;  %v198_v18 = vld [vmem:[#allocation5 + $0x80] sm:$0xff] }
  0x3b   :  { %v207_v13 = vld [vmem:[#allocation5 + $0xc8] sm:$0xff]  ;;  %2921 = vmatpush1.bf16.xpose.msra.mxu0 %v2920_v8  ;;  %v206_v19 = vld [vmem:[#allocation5 + $0xc0] sm:$0xff]  ;;  %p4151_p13 = por %p4150_p12, %p4149_p11 }
  0x3c   :  { %v455_v14 = vld [vmem:[#allocation5 + $0x888] sm:$0xff]  ;;  %3175 = vmatprep.subr.bf16.mxu1 %v3174_v7  ;;  %v2922_v16 = vpack.c.bf16 %v207_v13, %v199_v11  ;;  %v454_v20 = vld [vmem:[#allocation5 + $0x880] sm:$0xff]  ;;  %v2924_v26 = vpack.c.bf16 %v206_v19, %v198_v18 }
  0x3d   :  { %v463_v15 = vld [vmem:[#allocation5 + $0x8c8] sm:$0xff]  ;;  %3177 = vmatpush1.bf16.xpose.msra.mxu1 %v3176_v12  ;;  %v462_v21 = vld [vmem:[#allocation5 + $0x8c0] sm:$0xff]  ;;  %p4152_p0 = pnand %p4151_p13, %p4145_p10 }
  0x3e   :  { %v3178_v17 = vpack.c.bf16 %v463_v15, %v455_v14  ;;  %2923 = vmatprep.subr.bf16.mxu0 %v2922_v16  ;;  %v215_v22 = vld [vmem:[#allocation5 + $0x108] sm:$0xff]  ;;  %v3180_v27 = vpack.c.bf16 %v462_v21, %v454_v20  ;;  %v214_v30 = vld [vmem:[#allocation5 + $0x100] sm:$0xff] }
  0x3f   :  { %v223_v23 = vld [vmem:[#allocation5 + $0x148] sm:$0xff]  ;;  %v222_v31 = vld [vmem:[#allocation5 + $0x140] sm:$0xff] }
  0x40   :  { %3179 = vmatprep.subr.bf16.mxu1 %v3178_v17  ;;  %v471_v24 = vld [vmem:[#allocation5 + $0x908] sm:$0xff]  ;;  %v2926_v28 = vpack.c.bf16 %v223_v23, %v215_v22  ;;  %v470_v32 = vld [vmem:[#allocation5 + $0x900] sm:$0xff]  ;;  %v2928_v38 = vpack.c.bf16 %v222_v31, %v214_v30 }
  0x41   :  { %v479_v25 = vld [vmem:[#allocation5 + $0x948] sm:$0xff]  ;;  %v478_v33 = vld [vmem:[#allocation5 + $0x940] sm:$0xff] }
  0x42   :  { %v3182_v29 = vpack.c.bf16 %v479_v25, %v471_v24  ;;  %v231_v34 = vld [vmem:[#allocation5 + $0x188] sm:$0xff]  ;;  %v3184_v39 = vpack.c.bf16 %v478_v33, %v470_v32  ;;  %v230_v42 = vld [vmem:[#allocation5 + $0x180] sm:$0xff] }
  0x43   :  { %2925 = vmatpush1.bf16.xpose.msra.mxu0 %v2924_v26  ;;  %v239_v35 = vld [vmem:[#allocation5 + $0x1c8] sm:$0xff]  ;;  %v238_v43 = vld [vmem:[#allocation5 + $0x1c0] sm:$0xff] }
  0x44   :  { %2927 = vmatprep.subr.bf16.mxu0 %v2926_v28  ;;  %v487_v36 = vld [vmem:[#allocation5 + $0x988] sm:$0xff]  ;;  %v2930_v40 = vpack.c.bf16 %v239_v35, %v231_v34  ;;  %v486_v44 = vld [vmem:[#allocation5 + $0x980] sm:$0xff]  ;;  %v2932_v50 = vpack.c.bf16 %v238_v43, %v230_v42 }
  0x45   :  { %3181 = vmatpush1.bf16.xpose.msra.mxu1 %v3180_v27  ;;  %v495_v37 = vld [vmem:[#allocation5 + $0x9c8] sm:$0xff]  ;;  %v494_v45 = vld [vmem:[#allocation5 + $0x9c0] sm:$0xff] }
  0x46   :  { %3183 = vmatprep.subr.bf16.mxu1 %v3182_v29  ;;  %v3186_v41 = vpack.c.bf16 %v495_v37, %v487_v36  ;;  %v247_v46 = vld [vmem:[#allocation5 + $0x208] sm:$0xff]  ;;  %v3188_v51 = vpack.c.bf16 %v494_v45, %v486_v44  ;;  %v246_v54 = vld [vmem:[#allocation5 + $0x200] sm:$0xff] }
  0x47   :  { %v255_v47 = vld [vmem:[#allocation5 + $0x248] sm:$0xff]  ;;  %v254_v55 = vld [vmem:[#allocation5 + $0x240] sm:$0xff] }
  0x48   :  { %v503_v48 = vld [vmem:[#allocation5 + $0xa08] sm:$0xff]  ;;  %v2934_v52 = vpack.c.bf16 %v255_v47, %v247_v46  ;;  %v502_v56 = vld [vmem:[#allocation5 + $0xa00] sm:$0xff]  ;;  %v2936_v62 = vpack.c.bf16 %v254_v55, %v246_v54 }
  0x49   :  { %v511_v49 = vld [vmem:[#allocation5 + $0xa48] sm:$0xff]  ;;  %v510_v57 = vld [vmem:[#allocation5 + $0xa40] sm:$0xff] }
  0x4a   :  { %v3190_v53 = vpack.c.bf16 %v511_v49, %v503_v48  ;;  %v263_v58 = vld [vmem:[#allocation5 + $0x288] sm:$0xff]  ;;  %v3192_v63 = vpack.c.bf16 %v510_v57, %v502_v56  ;;  %v262_v2 = vld [vmem:[#allocation5 + $0x280] sm:$0xff] }
  0x4b   :  { %2929 = vmatpush1.bf16.xpose.msra.mxu0 %v2928_v38  ;;  %v271_v59 = vld [vmem:[#allocation5 + $0x2c8] sm:$0xff]  ;;  %v270_v3 = vld [vmem:[#allocation5 + $0x2c0] sm:$0xff] }
  0x4c   :  { %2931 = vmatprep.subr.bf16.mxu0 %v2930_v40  ;;  %v519_v60 = vld [vmem:[#allocation5 + $0xa88] sm:$0xff]  ;;  %v2938_v0 = vpack.c.bf16 %v271_v59, %v263_v58  ;;  %v518_v4 = vld [vmem:[#allocation5 + $0xa80] sm:$0xff]  ;;  %v2940_v10 = vpack.c.bf16 %v270_v3, %v262_v2 }
  0x4d   :  { %3185 = vmatpush1.bf16.xpose.msra.mxu1 %v3184_v39  ;;  %v527_v61 = vld [vmem:[#allocation5 + $0xac8] sm:$0xff]  ;;  %v526_v5 = vld [vmem:[#allocation5 + $0xac0] sm:$0xff] }
  0x4e   :  { %3187 = vmatprep.subr.bf16.mxu1 %v3186_v41  ;;  %v3194_v1 = vpack.c.bf16 %v527_v61, %v519_v60  ;;  %v279_v6 = vld [vmem:[#allocation5 + $0x308] sm:$0xff]  ;;  %v3196_v11 = vpack.c.bf16 %v526_v5, %v518_v4  ;;  %v278_v15 = vld [vmem:[#allocation5 + $0x300] sm:$0xff] }
  0x4f   :  { %v287_v7 = vld [vmem:[#allocation5 + $0x348] sm:$0xff]  ;;  %v286_v16 = vld [vmem:[#allocation5 + $0x340] sm:$0xff] }
  0x50   :  { %v535_v8 = vld [vmem:[#allocation5 + $0xb08] sm:$0xff]  ;;  %v2942_v12 = vpack.c.bf16 %v287_v7, %v279_v6  ;;  %v534_v17 = vld [vmem:[#allocation5 + $0xb00] sm:$0xff]  ;;  %v2944_v23 = vpack.c.bf16 %v286_v16, %v278_v15 }
  0x51   :  { %v543_v9 = vld [vmem:[#allocation5 + $0xb48] sm:$0xff]  ;;  %v542_v18 = vld [vmem:[#allocation5 + $0xb40] sm:$0xff] }
  0x52   :  { %v3198_v13 = vpack.c.bf16 %v543_v9, %v535_v8  ;;  %v55_v14 = vld [vmem:[#allocation2 + $0x8] sm:$0xff]  ;;  %v3200_v24 = vpack.c.bf16 %v542_v18, %v534_v17  ;;  %v294_v27 = vld [vmem:[#allocation5 + $0x380] sm:$0xff] }
  0x53   :  { %2933 = vmatpush1.bf16.xpose.msra.mxu0 %v2932_v50  ;;  %780 = vmatprep.mubr.f32.mxu0 %v55_v14  ;;  %v295_v19 = vld [vmem:[#allocation5 + $0x388] sm:$0xff]  ;;  %v302_v28 = vld [vmem:[#allocation5 + $0x3c0] sm:$0xff] }
  0x54   :  { %2935 = vmatprep.subr.bf16.mxu0 %v2934_v52  ;;  %1424 = vmatprep.mubr.f32.mxu1 %v55_v14  ;;  %v303_v20 = vld [vmem:[#allocation5 + $0x3c8] sm:$0xff]  ;;  %v550_v29 = vld [vmem:[#allocation5 + $0xb80] sm:$0xff]  ;;  %v2948_v35 = vpack.c.bf16 %v302_v28, %v294_v27 }
  0x55   :  { %3189 = vmatpush1.bf16.xpose.msra.mxu1 %v3188_v51  ;;  %v551_v21 = vld [vmem:[#allocation5 + $0xb88] sm:$0xff]  ;;  %v2946_v25 = vpack.c.bf16 %v303_v20, %v295_v19  ;;  %v558_v30 = vld [vmem:[#allocation5 + $0xbc0] sm:$0xff] }
  0x56   :  { %3191 = vmatprep.subr.bf16.mxu1 %v3190_v53  ;;  %v559_v22 = vld [vmem:[#allocation5 + $0xbc8] sm:$0xff]  ;;  %v3204_v36 = vpack.c.bf16 %v558_v30, %v550_v29  ;;  %v310_v39 = vld [vmem:[#allocation5 + $0x400] sm:$0xff] }
  0x57   :  { %v3202_v26 = vpack.c.bf16 %v559_v22, %v551_v21  ;;  %v311_v31 = vld [vmem:[#allocation5 + $0x408] sm:$0xff]  ;;  %v318_v40 = vld [vmem:[#allocation5 + $0x440] sm:$0xff] }
  0x58   :  { %v319_v32 = vld [vmem:[#allocation5 + $0x448] sm:$0xff]  ;;  %v566_v41 = vld [vmem:[#allocation5 + $0xc00] sm:$0xff]  ;;  %v2952_v47 = vpack.c.bf16 %v318_v40, %v310_v39 }
  0x59   :  { %v567_v33 = vld [vmem:[#allocation5 + $0xc08] sm:$0xff]  ;;  %v2950_v37 = vpack.c.bf16 %v319_v32, %v311_v31  ;;  %v574_v42 = vld [vmem:[#allocation5 + $0xc40] sm:$0xff] }
  0x5a   :  { %v575_v34 = vld [vmem:[#allocation5 + $0xc48] sm:$0xff]  ;;  %v3208_v48 = vpack.c.bf16 %v574_v42, %v566_v41  ;;  %v326_v51 = vld [vmem:[#allocation5 + $0x480] sm:$0xff] }
  0x5b   :  { %2937 = vmatpush1.bf16.xpose.msra.mxu0 %v2936_v62  ;;  %v3206_v38 = vpack.c.bf16 %v575_v34, %v567_v33  ;;  %v327_v43 = vld [vmem:[#allocation5 + $0x488] sm:$0xff]  ;;  %v334_v52 = vld [vmem:[#allocation5 + $0x4c0] sm:$0xff] }
  0x5c   :  { %2939 = vmatprep.subr.bf16.mxu0 %v2938_v0  ;;  %v335_v44 = vld [vmem:[#allocation5 + $0x4c8] sm:$0xff]  ;;  %v582_v53 = vld [vmem:[#allocation5 + $0xc80] sm:$0xff]  ;;  %v2956_v59 = vpack.c.bf16 %v334_v52, %v326_v51 }
  0x5d   :  { %3193 = vmatpush1.bf16.xpose.msra.mxu1 %v3192_v63  ;;  %v583_v45 = vld [vmem:[#allocation5 + $0xc88] sm:$0xff]  ;;  %v2954_v49 = vpack.c.bf16 %v335_v44, %v327_v43  ;;  %v590_v54 = vld [vmem:[#allocation5 + $0xcc0] sm:$0xff] }
  0x5e   :  { %3195 = vmatprep.subr.bf16.mxu1 %v3194_v1  ;;  %v591_v46 = vld [vmem:[#allocation5 + $0xcc8] sm:$0xff]  ;;  %v3212_v60 = vpack.c.bf16 %v590_v54, %v582_v53  ;;  %v342_v63 = vld [vmem:[#allocation5 + $0x500] sm:$0xff] }
  0x5f   :  { %v3210_v50 = vpack.c.bf16 %v591_v46, %v583_v45  ;;  %v343_v55 = vld [vmem:[#allocation5 + $0x508] sm:$0xff]  ;;  %v350_v0 = vld [vmem:[#allocation5 + $0x540] sm:$0xff] }
  0x60   :  { %v351_v56 = vld [vmem:[#allocation5 + $0x548] sm:$0xff]  ;;  %v598_v1 = vld [vmem:[#allocation5 + $0xd00] sm:$0xff]  ;;  %v2960_v7 = vpack.c.bf16 %v350_v0, %v342_v63  ;;  %v185_v63 = vld [vmem:[#allocation5 + $0x18] sm:$0xff] }
  0x61   :  { %v599_v57 = vld [vmem:[#allocation5 + $0xd08] sm:$0xff]  ;;  %v2958_v61 = vpack.c.bf16 %v351_v56, %v343_v55  ;;  %v606_v2 = vld [vmem:[#allocation5 + $0xd40] sm:$0xff]  ;;  %v193_v0 = vld [vmem:[#allocation5 + $0x58] sm:$0xff] }
  0x62   :  { %v607_v58 = vld [vmem:[#allocation5 + $0xd48] sm:$0xff]  ;;  %v3216_v8 = vpack.c.bf16 %v606_v2, %v598_v1  ;;  %v622_v14 = vld [vmem:[#allocation5 + $0xdc0] sm:$0xff]  ;;  %v441_v1 = vld [vmem:[#allocation5 + $0x818] sm:$0xff] }
  0x63   :  { %2941 = vmatpush1.bf16.xpose.msra.mxu0 %v2940_v10  ;;  %v3214_v62 = vpack.c.bf16 %v607_v58, %v599_v57  ;;  %v359_v3 = vld [vmem:[#allocation5 + $0x588] sm:$0xff]  ;;  %v449_v2 = vld [vmem:[#allocation5 + $0x858] sm:$0xff] }
  0x64   :  { %2943 = vmatprep.subr.bf16.mxu0 %v2942_v12  ;;  %v367_v4 = vld [vmem:[#allocation5 + $0x5c8] sm:$0xff]  ;;  %v366_v12 = vld [vmem:[#allocation5 + $0x5c0] sm:$0xff] }
  0x65   :  { %3197 = vmatpush1.bf16.xpose.msra.mxu1 %v3196_v11  ;;  %v615_v5 = vld [vmem:[#allocation5 + $0xd88] sm:$0xff]  ;;  %v2962_v9 = vpack.c.bf16 %v367_v4, %v359_v3  ;;  %v358_v11 = vld [vmem:[#allocation5 + $0x580] sm:$0xff] }
  0x66   :  { %3199 = vmatprep.subr.bf16.mxu1 %v3198_v13  ;;  %v623_v6 = vld [vmem:[#allocation5 + $0xdc8] sm:$0xff]  ;;  %v614_v13 = vld [vmem:[#allocation5 + $0xd80] sm:$0xff]  ;;  %v2964_v19 = vpack.c.bf16 %v366_v12, %v358_v11  ;;  %v201_v11 = vld [vmem:[#allocation5 + $0x98] sm:$0xff] }
  0x67   :  { %v3218_v10 = vpack.c.bf16 %v623_v6, %v615_v5  ;;  %v375_v15 = vld [vmem:[#allocation5 + $0x608] sm:$0xff]  ;;  %v3220_v20 = vpack.c.bf16 %v622_v14, %v614_v13  ;;  %v2982_v5 = vpack.c.bf16 %v193_v0, %v185_v63  ;;  %v3238_v6 = vpack.c.bf16 %v449_v2, %v441_v1  ;;  %v209_v12 = vld [vmem:[#allocation5 + $0xd8] sm:$0xff]  ;;  %v102_v0 = vld [vmem:[#allocation2 + $0x180] sm:$0xff] }
  0x68   :  { %v383_v16 = vld [vmem:[#allocation5 + $0x648] sm:$0xff]  ;;  %v457_v13 = vld [vmem:[#allocation5 + $0x898] sm:$0xff] }
  0x69   :  { %v631_v17 = vld [vmem:[#allocation5 + $0xe08] sm:$0xff]  ;;  %v2966_v21 = vpack.c.bf16 %v383_v16, %v375_v15  ;;  %v465_v14 = vld [vmem:[#allocation5 + $0x8d8] sm:$0xff]  ;;  %v54_v15 = vld [vmem:[#allocation2] sm:$0xff] }
  0x6a   :  { %v639_v18 = vld [vmem:[#allocation5 + $0xe48] sm:$0xff] }
  0x6b   :  { %2945 = vmatpush1.bf16.xpose.msra.mxu0 %v2944_v23  ;;  %v3222_v22 = vpack.c.bf16 %v639_v18, %v631_v17  ;;  %v374_v23 = vld [vmem:[#allocation5 + $0x600] sm:$0xff]  ;;  %v391_v27 = vld [vmem:[#allocation5 + $0x688] sm:$0xff]  ;;  %v2986_v18 = vpack.c.bf16 %v209_v12, %v201_v11  ;;  %v265_v11 = vld [vmem:[#allocation5 + $0x298] sm:$0xff] }
  0x6c   :  { %2947 = vmatprep.subr.bf16.mxu0 %v2946_v25  ;;  %v630_v25 = vld [vmem:[#allocation5 + $0xe00] sm:$0xff]  ;;  %v399_v28 = vld [vmem:[#allocation5 + $0x6c8] sm:$0xff]  ;;  %v273_v12 = vld [vmem:[#allocation5 + $0x2d8] sm:$0xff] }
  0x6d   :  { %3201 = vmatpush1.bf16.xpose.msra.mxu1 %v3200_v24  ;;  %v382_v24 = vld [vmem:[#allocation5 + $0x640] sm:$0xff]  ;;  %v647_v29 = vld [vmem:[#allocation5 + $0xe88] sm:$0xff]  ;;  %v2970_v33 = vpack.c.bf16 %v399_v28, %v391_v27  ;;  %v217_v27 = vld [vmem:[#allocation5 + $0x118] sm:$0xff] }
  0x6e   :  { %3203 = vmatprep.subr.bf16.mxu1 %v3202_v26  ;;  %v638_v26 = vld [vmem:[#allocation5 + $0xe40] sm:$0xff]  ;;  %v655_v30 = vld [vmem:[#allocation5 + $0xec8] sm:$0xff]  ;;  %v2968_v31 = vpack.c.bf16 %v382_v24, %v374_v23  ;;  %v208_v23 = vld [vmem:[#allocation5 + $0xd0] sm:$0xff] }
  0x6f   :  { %v3224_v32 = vpack.c.bf16 %v638_v26, %v630_v25  ;;  %v3226_v34 = vpack.c.bf16 %v655_v30, %v647_v29  ;;  %v407_v39 = vld [vmem:[#allocation5 + $0x708] sm:$0xff]  ;;  %v456_v24 = vld [vmem:[#allocation5 + $0x890] sm:$0xff]  ;;  %v225_v28 = vld [vmem:[#allocation5 + $0x158] sm:$0xff] }
  0x70   :  { %v415_v40 = vld [vmem:[#allocation5 + $0x748] sm:$0xff]  ;;  %v464_v26 = vld [vmem:[#allocation5 + $0x8d0] sm:$0xff]  ;;  %v473_v29 = vld [vmem:[#allocation5 + $0x918] sm:$0xff] }
  0x71   :  { %v663_v41 = vld [vmem:[#allocation5 + $0xf08] sm:$0xff]  ;;  %v2974_v45 = vpack.c.bf16 %v415_v40, %v407_v39  ;;  %v481_v30 = vld [vmem:[#allocation5 + $0x958] sm:$0xff]  ;;  %v224_v39 = vld [vmem:[#allocation5 + $0x150] sm:$0xff] }
  0x72   :  { %v671_v42 = vld [vmem:[#allocation5 + $0xf48] sm:$0xff]  ;;  %v472_v40 = vld [vmem:[#allocation5 + $0x910] sm:$0xff] }
  0x73   :  { %2949 = vmatpush1.bf16.xpose.msra.mxu0 %v2948_v35  ;;  %v390_v35 = vld [vmem:[#allocation5 + $0x680] sm:$0xff]  ;;  %v3230_v46 = vpack.c.bf16 %v671_v42, %v663_v41  ;;  %v423_v51 = vld [vmem:[#allocation5 + $0x788] sm:$0xff]  ;;  %v480_v42 = vld [vmem:[#allocation5 + $0x950] sm:$0xff] }
  0x74   :  { %2951 = vmatprep.subr.bf16.mxu0 %v2950_v37  ;;  %v646_v37 = vld [vmem:[#allocation5 + $0xe80] sm:$0xff]  ;;  %v431_v52 = vld [vmem:[#allocation5 + $0x7c8] sm:$0xff] }
  0x75   :  { %3205 = vmatpush1.bf16.xpose.msra.mxu1 %v3204_v36  ;;  %v398_v36 = vld [vmem:[#allocation5 + $0x6c0] sm:$0xff]  ;;  %v679_v53 = vld [vmem:[#allocation5 + $0xf88] sm:$0xff]  ;;  %v2978_v57 = vpack.c.bf16 %v431_v52, %v423_v51 }
  0x76   :  { %3207 = vmatprep.subr.bf16.mxu1 %v3206_v38  ;;  %v654_v38 = vld [vmem:[#allocation5 + $0xec0] sm:$0xff]  ;;  %v2972_v43 = vpack.c.bf16 %v398_v36, %v390_v35  ;;  %v687_v54 = vld [vmem:[#allocation5 + $0xfc8] sm:$0xff]  ;;  %v3246_v35 = vpack.c.bf16 %v481_v30, %v473_v29  ;;  %v537_v29 = vld [vmem:[#allocation5 + $0xb18] sm:$0xff] }
  0x77   :  { %v3228_v44 = vpack.c.bf16 %v654_v38, %v646_v37  ;;  %v3234_v58 = vpack.c.bf16 %v687_v54, %v679_v53  ;;  %v71_v25 = vld [vmem:[#allocation2 + $0x88] sm:$0xff]  ;;  %v216_v37 = vld [vmem:[#allocation5 + $0x110] sm:$0xff]  ;;  %v78_v38 = vld [vmem:[#allocation2 + $0xc0] sm:$0xff] }
  0x78   :  { %v79_v36 = vld [vmem:[#allocation2 + $0xc8] sm:$0xff]  ;;  %v232_v53 = vld [vmem:[#allocation5 + $0x190] sm:$0xff]  ;;  %v94_v54 = vld [vmem:[#allocation2 + $0x140] sm:$0xff] }
  0x79   :  { %v87_v41 = vld [vmem:[#allocation2 + $0x108] sm:$0xff]  ;;  %v545_v30 = vld [vmem:[#allocation5 + $0xb58] sm:$0xff] }
  0x7a   :  { %v95_v52 = vld [vmem:[#allocation2 + $0x148] sm:$0xff] }
  0x7b   :  { %2953 = vmatpush1.bf16.xpose.msra.mxu0 %v2952_v47  ;;  %v406_v47 = vld [vmem:[#allocation5 + $0x700] sm:$0xff] }
  0x7c   :  { %2955 = vmatprep.subr.bf16.mxu0 %v2954_v49  ;;  %v662_v49 = vld [vmem:[#allocation5 + $0xf00] sm:$0xff] }
  0x7d   :  { %3209 = vmatpush1.bf16.xpose.msra.mxu1 %v3208_v48  ;;  %v414_v48 = vld [vmem:[#allocation5 + $0x740] sm:$0xff] }
  0x7e   :  { %3211 = vmatprep.subr.bf16.mxu1 %v3210_v50  ;;  %v670_v50 = vld [vmem:[#allocation5 + $0xf40] sm:$0xff]  ;;  %v2976_v55 = vpack.c.bf16 %v414_v48, %v406_v47  ;;  %v2992_v47 = vpack.c.bf16 %v224_v39, %v216_v37  ;;  %v280_v37 = vld [vmem:[#allocation5 + $0x310] sm:$0xff] }
  0x7f   :  { %v3232_v56 = vpack.c.bf16 %v670_v50, %v662_v49  ;;  %v86_v48 = vld [vmem:[#allocation2 + $0x100] sm:$0xff]  ;;  %v3248_v49 = vpack.c.bf16 %v480_v42, %v472_v40  ;;  %v288_v39 = vld [vmem:[#allocation5 + $0x350] sm:$0xff] }
  0x80   :  { %v536_v40 = vld [vmem:[#allocation5 + $0xb10] sm:$0xff] }
  0x81   :  { %v544_v42 = vld [vmem:[#allocation5 + $0xb50] sm:$0xff] }
  0x83   :  { %2957 = vmatpush1.bf16.xpose.msra.mxu0 %v2956_v59  ;;  %v422_v59 = vld [vmem:[#allocation5 + $0x780] sm:$0xff] }
  0x84   :  { %2959 = vmatprep.subr.bf16.mxu0 %v2958_v61  ;;  %v678_v61 = vld [vmem:[#allocation5 + $0xf80] sm:$0xff] }
  0x85   :  { %3213 = vmatpush1.bf16.xpose.msra.mxu1 %v3212_v60  ;;  %v430_v60 = vld [vmem:[#allocation5 + $0x7c0] sm:$0xff] }
  0x86   :  { %3215 = vmatprep.subr.bf16.mxu1 %v3214_v62  ;;  %v686_v62 = vld [vmem:[#allocation5 + $0xfc0] sm:$0xff]  ;;  %v2980_v3 = vpack.c.bf16 %v430_v60, %v422_v59  ;;  %v249_v59 = vld [vmem:[#allocation5 + $0x218] sm:$0xff] }
  0x87   :  { %v3236_v4 = vpack.c.bf16 %v686_v62, %v678_v61  ;;  %v257_v60 = vld [vmem:[#allocation5 + $0x258] sm:$0xff] }
  0x88   :  { %v505_v61 = vld [vmem:[#allocation5 + $0xa18] sm:$0xff]  ;;  %v2998_v2 = vpack.c.bf16 %v257_v60, %v249_v59 }
  0x89   :  { %v513_v62 = vld [vmem:[#allocation5 + $0xa58] sm:$0xff] }
  0x8a   :  { %v313_v59 = vld [vmem:[#allocation5 + $0x418] sm:$0xff] }
  0x8b   :  { %2961 = vmatpush1.bf16.xpose.msra.mxu0 %v2960_v7  ;;  %v184_v7 = vld [vmem:[#allocation5 + $0x10] sm:$0xff]  ;;  %v321_v60 = vld [vmem:[#allocation5 + $0x458] sm:$0xff] }
  0x8c   :  { %2963 = vmatprep.subr.bf16.mxu0 %v2962_v9  ;;  %v440_v9 = vld [vmem:[#allocation5 + $0x810] sm:$0xff] }
  0x8d   :  { %3217 = vmatpush1.bf16.xpose.msra.mxu1 %v3216_v8  ;;  %v192_v8 = vld [vmem:[#allocation5 + $0x50] sm:$0xff] }
  0x8e   :  { %3219 = vmatprep.subr.bf16.mxu1 %v3218_v10  ;;  %v448_v10 = vld [vmem:[#allocation5 + $0x850] sm:$0xff]  ;;  %v2984_v16 = vpack.c.bf16 %v192_v8, %v184_v7 }
  0x8f   :  { %v3240_v17 = vpack.c.bf16 %v448_v10, %v440_v9  ;;  %v256_v7 = vld [vmem:[#allocation5 + $0x250] sm:$0xff]  ;;  %v119_v9 = vld [vmem:[#allocation2 + $0x208] sm:$0xff] }
  0x90   :  { %v504_v8 = vld [vmem:[#allocation5 + $0xa10] sm:$0xff] }
  0x91   :  { %v512_v10 = vld [vmem:[#allocation5 + $0xa50] sm:$0xff] }
  0x93   :  { %2965 = vmatpush1.bf16.xpose.msra.mxu0 %v2964_v19  ;;  %v3242_v19 = vpack.c.bf16 %v465_v14, %v457_v13  ;;  %v521_v13 = vld [vmem:[#allocation5 + $0xa98] sm:$0xff] }
  0x94   :  { %2967 = vmatprep.subr.bf16.mxu0 %v2966_v21  ;;  %v200_v21 = vld [vmem:[#allocation5 + $0x90] sm:$0xff]  ;;  %v529_v14 = vld [vmem:[#allocation5 + $0xad8] sm:$0xff] }
  0x95   :  { %3221 = vmatpush1.bf16.xpose.msra.mxu1 %v3220_v20  ;;  %v63_v20 = vld [vmem:[#allocation2 + $0x48] sm:$0xff] }
  0x96   :  { %3223 = vmatprep.subr.bf16.mxu1 %v3222_v22  ;;  %v62_v22 = vld [vmem:[#allocation2 + $0x40] sm:$0xff] }
  0x9b   :  { %2969 = vmatpush1.bf16.xpose.msra.mxu0 %v2968_v31  ;;  %v2988_v31 = vpack.c.bf16 %v208_v23, %v200_v21  ;;  %v264_v21 = vld [vmem:[#allocation5 + $0x290] sm:$0xff] }
  0x9c   :  { %2971 = vmatprep.subr.bf16.mxu0 %v2970_v33  ;;  %v3244_v33 = vpack.c.bf16 %v464_v26, %v456_v24  ;;  %v272_v23 = vld [vmem:[#allocation5 + $0x2d0] sm:$0xff] }
  0x9d   :  { %3225 = vmatpush1.bf16.xpose.msra.mxu1 %v3224_v32  ;;  %v70_v32 = vld [vmem:[#allocation2 + $0x80] sm:$0xff]  ;;  %v520_v24 = vld [vmem:[#allocation5 + $0xa90] sm:$0xff] }
  0x9e   :  { %3227 = vmatprep.subr.bf16.mxu1 %v3226_v34  ;;  %v2990_v34 = vpack.c.bf16 %v225_v28, %v217_v27  ;;  %v528_v26 = vld [vmem:[#allocation5 + $0xad0] sm:$0xff]  ;;  %v281_v27 = vld [vmem:[#allocation5 + $0x318] sm:$0xff] }
  0x9f   :  { %v289_v28 = vld [vmem:[#allocation5 + $0x358] sm:$0xff] }
  0xa3   :  { %2973 = vmatpush1.bf16.xpose.msra.mxu0 %v2972_v43  ;;  %v233_v43 = vld [vmem:[#allocation5 + $0x198] sm:$0xff] }
  0xa4   :  { %2975 = vmatprep.subr.bf16.mxu0 %v2974_v45  ;;  %v489_v45 = vld [vmem:[#allocation5 + $0x998] sm:$0xff] }
  0xa5   :  { %3229 = vmatpush1.bf16.xpose.msra.mxu1 %v3228_v44  ;;  %v241_v44 = vld [vmem:[#allocation5 + $0x1d8] sm:$0xff] }
  0xa6   :  { %3231 = vmatprep.subr.bf16.mxu1 %v3230_v46  ;;  %v497_v46 = vld [vmem:[#allocation5 + $0x9d8] sm:$0xff]  ;;  %v2994_v50 = vpack.c.bf16 %v241_v44, %v233_v43 }
  0xa7   :  { %v3250_v51 = vpack.c.bf16 %v497_v46, %v489_v45  ;;  %v297_v43 = vld [vmem:[#allocation5 + $0x398] sm:$0xff] }
  0xa8   :  { %v305_v44 = vld [vmem:[#allocation5 + $0x3d8] sm:$0xff] }
  0xa9   :  { %v553_v45 = vld [vmem:[#allocation5 + $0xb98] sm:$0xff] }
  0xaa   :  { %v561_v46 = vld [vmem:[#allocation5 + $0xbd8] sm:$0xff] }
  0xab   :  { %2977 = vmatpush1.bf16.xpose.msra.mxu0 %v2976_v55  ;;  %v240_v55 = vld [vmem:[#allocation5 + $0x1d0] sm:$0xff] }
  0xac   :  { %2979 = vmatprep.subr.bf16.mxu0 %v2978_v57  ;;  %v103_v57 = vld [vmem:[#allocation2 + $0x188] sm:$0xff]  ;;  %v2996_v63 = vpack.c.bf16 %v240_v55, %v232_v53  ;;  %v296_v53 = vld [vmem:[#allocation5 + $0x390] sm:$0xff] }
  0xad   :  { %3233 = vmatpush1.bf16.xpose.msra.mxu1 %v3232_v56  ;;  %v488_v56 = vld [vmem:[#allocation5 + $0x990] sm:$0xff] }
  0xae   :  { %3235 = vmatprep.subr.bf16.mxu1 %v3234_v58  ;;  %v496_v58 = vld [vmem:[#allocation5 + $0x9d0] sm:$0xff] }
  0xaf   :  { %v3252_v1 = vpack.c.bf16 %v496_v58, %v488_v56  ;;  %v304_v55 = vld [vmem:[#allocation5 + $0x3d0] sm:$0xff] }
  0xb0   :  { %v552_v56 = vld [vmem:[#allocation5 + $0xb90] sm:$0xff] }
  0xb1   :  { %v560_v58 = vld [vmem:[#allocation5 + $0xbd0] sm:$0xff] }
  0xb3   :  { %2981 = vmatpush1.bf16.xpose.msra.mxu0 %v2980_v3  ;;  %v3254_v3 = vpack.c.bf16 %v513_v62, %v505_v61  ;;  %v569_v61 = vld [vmem:[#allocation5 + $0xc18] sm:$0xff] }
  0xb4   :  { %2983 = vmatprep.subr.bf16.mxu0 %v2982_v5  ;;  %v248_v5 = vld [vmem:[#allocation5 + $0x210] sm:$0xff]  ;;  %v577_v62 = vld [vmem:[#allocation5 + $0xc58] sm:$0xff] }
  0xb5   :  { %3237 = vmatpush1.bf16.xpose.msra.mxu1 %v3236_v4  ;;  %v111_v4 = vld [vmem:[#allocation2 + $0x1c8] sm:$0xff] }
  0xb6   :  { %3239 = vmatprep.subr.bf16.mxu1 %v3238_v6  ;;  %v110_v6 = vld [vmem:[#allocation2 + $0x1c0] sm:$0xff] }
  0xba   :  { %781 = vmatmul.mubr.f32.vlgmr.msra.gmra.mrb[0].mxu0 %v54_v15 }
  0xbb   :  { %2985 = vmatpush1.bf16.xpose.msra.mxu0 %v2984_v16  ;;  %786 = vmatprep.mubr.f32.mxu0 %v63_v20  ;;  %v118_v16 = vld [vmem:[#allocation2 + $0x200] sm:$0xff] }
  0xbc   :  { %1425 = vmatmul.mubr.f32.vlgmr.msra.gmra.mrb[0].mxu1 %v54_v15  ;;  %2987 = vmatprep.subr.bf16.mxu0 %v2986_v18  ;;  %v3000_v15 = vpack.c.bf16 %v256_v7, %v248_v5  ;;  %v3002_v18 = vpack.c.bf16 %v273_v12, %v265_v11  ;;  %v312_v5 = vld [vmem:[#allocation5 + $0x410] sm:$0xff]  ;;  %v329_v11 = vld [vmem:[#allocation5 + $0x498] sm:$0xff] }
  0xbd   :  { %3241 = vmatpush1.bf16.xpose.msra.mxu1 %v3240_v17  ;;  %1430 = vmatprep.mubr.f32.mxu1 %v63_v20  ;;  %v3256_v17 = vpack.c.bf16 %v512_v10, %v504_v8  ;;  %v127_v20 = vld [vmem:[#allocation2 + $0x248] sm:$0xff]  ;;  %v320_v7 = vld [vmem:[#allocation5 + $0x450] sm:$0xff]  ;;  %v337_v12 = vld [vmem:[#allocation5 + $0x4d8] sm:$0xff] }
  0xbe   :  { %3243 = vmatprep.subr.bf16.mxu1 %v3242_v19  ;;  %787 = vmatmul.mubr.f32.gmra.mrb[2].mxu0 %v62_v22  ;;  %v3258_v19 = vpack.c.bf16 %v529_v14, %v521_v13  ;;  %v568_v8 = vld [vmem:[#allocation5 + $0xc10] sm:$0xff]  ;;  %v585_v13 = vld [vmem:[#allocation5 + $0xc98] sm:$0xff] }
  0xbf   :  { %792 = vmatprep.mubr.f32.mxu0 %v71_v25  ;;  %v576_v10 = vld [vmem:[#allocation5 + $0xc50] sm:$0xff]  ;;  %v593_v14 = vld [vmem:[#allocation5 + $0xcd8] sm:$0xff] }
  0xc0   :  { %1431 = vmatmul.mubr.f32.gmra.mrb[2].mxu1 %v62_v22  ;;  %v126_v22 = vld [vmem:[#allocation2 + $0x240] sm:$0xff] }
  0xc1   :  { %1436 = vmatprep.mubr.f32.mxu1 %v71_v25  ;;  %v135_v25 = vld [vmem:[#allocation2 + $0x288] sm:$0xff] }
  0xc2   :  { %793 = vmatmul.mubr.f32.gmra.mrb[4].mxu0 %v70_v32 }
  0xc3   :  { %2989 = vmatpush1.bf16.xpose.msra.mxu0 %v2988_v31  ;;  %798 = vmatprep.mubr.f32.mxu0 %v79_v36  ;;  %v3004_v31 = vpack.c.bf16 %v272_v23, %v264_v21  ;;  %v584_v21 = vld [vmem:[#allocation5 + $0xc90] sm:$0xff]  ;;  %v345_v23 = vld [vmem:[#allocation5 + $0x518] sm:$0xff] }
  0xc4   :  { %1437 = vmatmul.mubr.f32.gmra.mrb[4].mxu1 %v70_v32  ;;  %2991 = vmatprep.subr.bf16.mxu0 %v2990_v34  ;;  %v134_v32 = vld [vmem:[#allocation2 + $0x280] sm:$0xff]  ;;  %v3006_v34 = vpack.c.bf16 %v289_v28, %v281_v27 }
  0xc5   :  { %3245 = vmatpush1.bf16.xpose.msra.mxu1 %v3244_v33  ;;  %1442 = vmatprep.mubr.f32.mxu1 %v79_v36  ;;  %v3260_v33 = vpack.c.bf16 %v528_v26, %v520_v24  ;;  %v143_v36 = vld [vmem:[#allocation2 + $0x2c8] sm:$0xff]  ;;  %v353_v24 = vld [vmem:[#allocation5 + $0x558] sm:$0xff] }
  0xc6   :  { %3247 = vmatprep.subr.bf16.mxu1 %v3246_v35  ;;  %799 = vmatmul.mubr.f32.gmra.mrb[6].mxu0 %v78_v38  ;;  %v3262_v35 = vpack.c.bf16 %v545_v30, %v537_v29  ;;  %v609_v26 = vld [vmem:[#allocation5 + $0xd58] sm:$0xff]  ;;  %v3022_v29 = vpack.c.bf16 %v353_v24, %v345_v23 }
  0xc7   :  { %804 = vmatprep.mubr.f32.mxu0 %v87_v41 }
  0xc8   :  { %1443 = vmatmul.mubr.f32.gmra.mrb[6].mxu1 %v78_v38  ;;  %v142_v38 = vld [vmem:[#allocation2 + $0x2c0] sm:$0xff] }
  0xc9   :  { %1448 = vmatprep.mubr.f32.mxu1 %v87_v41  ;;  %v151_v41 = vld [vmem:[#allocation2 + $0x308] sm:$0xff] }
  0xca   :  { %805 = vmatmul.mubr.f32.gmra.mrb[8].mxu0 %v86_v48 }
  0xcb   :  { %2993 = vmatpush1.bf16.xpose.msra.mxu0 %v2992_v47  ;;  %810 = vmatprep.mubr.f32.mxu0 %v95_v52  ;;  %v3008_v47 = vpack.c.bf16 %v288_v39, %v280_v37  ;;  %v617_v37 = vld [vmem:[#allocation5 + $0xd98] sm:$0xff] }
  0xcc   :  { %1449 = vmatmul.mubr.f32.gmra.mrb[8].mxu1 %v86_v48  ;;  %2995 = vmatprep.subr.bf16.mxu0 %v2994_v50  ;;  %v150_v48 = vld [vmem:[#allocation2 + $0x300] sm:$0xff]  ;;  %v3010_v50 = vpack.c.bf16 %v305_v44, %v297_v43  ;;  %v360_v43 = vld [vmem:[#allocation5 + $0x590] sm:$0xff] }
  0xcd   :  { %3249 = vmatpush1.bf16.xpose.msra.mxu1 %v3248_v49  ;;  %1454 = vmatprep.mubr.f32.mxu1 %v95_v52  ;;  %v3264_v49 = vpack.c.bf16 %v544_v42, %v536_v40  ;;  %v159_v52 = vld [vmem:[#allocation2 + $0x348] sm:$0xff]  ;;  %v368_v44 = vld [vmem:[#allocation5 + $0x5d0] sm:$0xff] }
  0xce   :  { %3251 = vmatprep.subr.bf16.mxu1 %v3250_v51  ;;  %811 = vmatmul.mubr.f32.gmra.mrb[10].mxu0 %v94_v54  ;;  %v3266_v51 = vpack.c.bf16 %v561_v46, %v553_v45  ;;  %v616_v45 = vld [vmem:[#allocation5 + $0xd90] sm:$0xff] }
  0xcf   :  { %816 = vmatprep.mubr.f32.mxu0 %v103_v57  ;;  %v624_v46 = vld [vmem:[#allocation5 + $0xdd0] sm:$0xff] }
  0xd0   :  { %1455 = vmatmul.mubr.f32.gmra.mrb[10].mxu1 %v94_v54  ;;  %v158_v54 = vld [vmem:[#allocation2 + $0x340] sm:$0xff] }
  0xd1   :  { %1460 = vmatprep.mubr.f32.mxu1 %v103_v57  ;;  %v167_v57 = vld [vmem:[#allocation2 + $0x388] sm:$0xff] }
  0xd2   :  { %817 = vmatmul.mubr.f32.gmra.mrb[12].mxu0 %v102_v0 }
  0xd3   :  { %2997 = vmatpush1.bf16.xpose.msra.mxu0 %v2996_v63  ;;  %822 = vmatprep.mubr.f32.mxu0 %v111_v4  ;;  %v3012_v63 = vpack.c.bf16 %v304_v55, %v296_v53  ;;  %v376_v55 = vld [vmem:[#allocation5 + $0x610] sm:$0xff] }
  0xd4   :  { %1461 = vmatmul.mubr.f32.gmra.mrb[12].mxu1 %v102_v0  ;;  %2999 = vmatprep.subr.bf16.mxu0 %v2998_v2  ;;  %v166_v0 = vld [vmem:[#allocation2 + $0x380] sm:$0xff]  ;;  %v3014_v2 = vpack.c.bf16 %v321_v60, %v313_v59  ;;  %v393_v59 = vld [vmem:[#allocation5 + $0x698] sm:$0xff] }
  0xd5   :  { %3253 = vmatpush1.bf16.xpose.msra.mxu1 %v3252_v1  ;;  %1466 = vmatprep.mubr.f32.mxu1 %v111_v4  ;;  %v3268_v1 = vpack.c.bf16 %v560_v58, %v552_v56  ;;  %v175_v4 = vld [vmem:[#allocation2 + $0x3c8] sm:$0xff]  ;;  %v384_v56 = vld [vmem:[#allocation5 + $0x650] sm:$0xff]  ;;  %v401_v60 = vld [vmem:[#allocation5 + $0x6d8] sm:$0xff] }
  0xd6   :  { %3255 = vmatprep.subr.bf16.mxu1 %v3254_v3  ;;  %823 = vmatmul.mubr.f32.gmra.mrb[14].mxu0 %v110_v6  ;;  %v3270_v3 = vpack.c.bf16 %v577_v62, %v569_v61  ;;  %v640_v58 = vld [vmem:[#allocation5 + $0xe50] sm:$0xff]  ;;  %v649_v61 = vld [vmem:[#allocation5 + $0xe98] sm:$0xff] }
  0xd7   :  { %828 = vmatprep.mubr.f32.mxu0 %v119_v9  ;;  %v657_v62 = vld [vmem:[#allocation5 + $0xed8] sm:$0xff] }
  0xd8   :  { %1467 = vmatmul.mubr.f32.gmra.mrb[14].mxu1 %v110_v6  ;;  %v174_v6 = vld [vmem:[#allocation2 + $0x3c0] sm:$0xff] }
  0xd9   :  { %1472 = vmatprep.mubr.f32.mxu1 %v119_v9  ;;  %v57_v9 = vld [vmem:[#allocation2 + $0x18] sm:$0xff] }
  0xda   :  { %829 = vmatmul.mubr.f32.gmra.mrb[16].mxu0 %v118_v16 }
  0xdb   :  { %3001 = vmatpush1.bf16.xpose.msra.mxu0 %v3000_v15  ;;  %834 = vmatprep.mubr.f32.mxu0 %v127_v20  ;;  %v3016_v15 = vpack.c.bf16 %v320_v7, %v312_v5  ;;  %v648_v5 = vld [vmem:[#allocation5 + $0xe90] sm:$0xff]  ;;  %v409_v7 = vld [vmem:[#allocation5 + $0x718] sm:$0xff] }
  0xdc   :  { %1473 = vmatmul.mubr.f32.gmra.mrb[16].mxu1 %v118_v16  ;;  %3003 = vmatprep.subr.bf16.mxu0 %v3002_v18  ;;  %v3272_v16 = vpack.c.bf16 %v576_v10, %v568_v8  ;;  %v3274_v18 = vpack.c.bf16 %v593_v14, %v585_v13  ;;  %v417_v8 = vld [vmem:[#allocation5 + $0x758] sm:$0xff] }
  0xdd   :  { %3257 = vmatpush1.bf16.xpose.msra.mxu1 %v3256_v17  ;;  %1478 = vmatprep.mubr.f32.mxu1 %v127_v20  ;;  %v3018_v17 = vpack.c.bf16 %v337_v12, %v329_v11  ;;  %v336_v20 = vld [vmem:[#allocation5 + $0x4d0] sm:$0xff]  ;;  %v673_v10 = vld [vmem:[#allocation5 + $0xf58] sm:$0xff]  ;;  %v3038_v13 = vpack.c.bf16 %v417_v8, %v409_v7  ;;  %v226_v7 = vld [vmem:[#allocation5 + $0x160] sm:$0xff] }
  0xde   :  { %3259 = vmatprep.subr.bf16.mxu1 %v3258_v19  ;;  %835 = vmatmul.mubr.f32.gmra.mrb[18].mxu0 %v126_v22  ;;  %v328_v19 = vld [vmem:[#allocation5 + $0x490] sm:$0xff]  ;;  %v474_v8 = vld [vmem:[#allocation5 + $0x920] sm:$0xff] }
  0xdf   :  { %840 = vmatprep.mubr.f32.mxu0 %v135_v25  ;;  %v3020_v27 = vpack.c.bf16 %v336_v20, %v328_v19  ;;  %v425_v19 = vld [vmem:[#allocation5 + $0x798] sm:$0xff] }
  0xe0   :  { %1479 = vmatmul.mubr.f32.gmra.mrb[18].mxu1 %v126_v22  ;;  %v592_v22 = vld [vmem:[#allocation5 + $0xcd0] sm:$0xff]  ;;  %v433_v20 = vld [vmem:[#allocation5 + $0x7d8] sm:$0xff] }
  0xe1   :  { %1484 = vmatprep.mubr.f32.mxu1 %v135_v25  ;;  %v601_v25 = vld [vmem:[#allocation5 + $0xd18] sm:$0xff]  ;;  %v3276_v28 = vpack.c.bf16 %v592_v22, %v584_v21 }
  0xe2   :  { %841 = vmatmul.mubr.f32.gmra.mrb[20].mxu0 %v134_v32  ;;  %v3278_v30 = vpack.c.bf16 %v609_v26, %v601_v25  ;;  %v681_v21 = vld [vmem:[#allocation5 + $0xf98] sm:$0xff]  ;;  %v3042_v25 = vpack.c.bf16 %v433_v20, %v425_v19 }
  0xe3   :  { %3005 = vmatpush1.bf16.xpose.msra.mxu0 %v3004_v31  ;;  %846 = vmatprep.mubr.f32.mxu0 %v143_v36  ;;  %v344_v31 = vld [vmem:[#allocation5 + $0x510] sm:$0xff]  ;;  %v689_v22 = vld [vmem:[#allocation5 + $0xfd8] sm:$0xff] }
  0xe4   :  { %1485 = vmatmul.mubr.f32.gmra.mrb[20].mxu1 %v134_v32  ;;  %3007 = vmatprep.subr.bf16.mxu0 %v3006_v34  ;;  %v352_v32 = vld [vmem:[#allocation5 + $0x550] sm:$0xff]  ;;  %v3298_v26 = vpack.c.bf16 %v689_v22, %v681_v21  ;;  %v97_v20 = vld [vmem:[#allocation2 + $0x158] sm:$0xff]  ;;  %v234_v21 = vld [vmem:[#allocation5 + $0x1a0] sm:$0xff] }
  0xe5   :  { %3261 = vmatpush1.bf16.xpose.msra.mxu1 %v3260_v33  ;;  %1490 = vmatprep.mubr.f32.mxu1 %v143_v36  ;;  %v600_v33 = vld [vmem:[#allocation5 + $0xd10] sm:$0xff]  ;;  %v369_v36 = vld [vmem:[#allocation5 + $0x5d8] sm:$0xff]  ;;  %v3024_v39 = vpack.c.bf16 %v352_v32, %v344_v31  ;;  %v187_v31 = vld [vmem:[#allocation5 + $0x28] sm:$0xff] }
  0xe6   :  { %3263 = vmatprep.subr.bf16.mxu1 %v3262_v35  ;;  %847 = vmatmul.mubr.f32.gmra.mrb[22].mxu0 %v142_v38  ;;  %v608_v34 = vld [vmem:[#allocation5 + $0xd50] sm:$0xff]  ;;  %v361_v35 = vld [vmem:[#allocation5 + $0x598] sm:$0xff]  ;;  %v195_v32 = vld [vmem:[#allocation5 + $0x68] sm:$0xff] }
  0xe7   :  { %852 = vmatprep.mubr.f32.mxu0 %v151_v41  ;;  %v3280_v40 = vpack.c.bf16 %v608_v34, %v600_v33  ;;  %v443_v33 = vld [vmem:[#allocation5 + $0x828] sm:$0xff]  ;;  %v96_v22 = vld [vmem:[#allocation2 + $0x150] sm:$0xff] }
  0xe8   :  { %1491 = vmatmul.mubr.f32.gmra.mrb[22].mxu1 %v142_v38  ;;  %v625_v38 = vld [vmem:[#allocation5 + $0xdd8] sm:$0xff]  ;;  %v451_v34 = vld [vmem:[#allocation5 + $0x868] sm:$0xff] }
  0xe9   :  { %1496 = vmatprep.mubr.f32.mxu1 %v151_v41  ;;  %v3026_v41 = vpack.c.bf16 %v369_v36, %v361_v35  ;;  %v3282_v42 = vpack.c.bf16 %v625_v38, %v617_v37  ;;  %v3046_v37 = vpack.c.bf16 %v195_v32, %v187_v31  ;;  %v3302_v38 = vpack.c.bf16 %v451_v34, %v443_v33  ;;  %v104_v32 = vld [vmem:[#allocation2 + $0x190] sm:$0xff] }
  0xea   :  { %853 = vmatmul.mubr.f32.gmra.mrb[24].mxu0 %v150_v48 }
  0xeb   :  { %3009 = vmatpush1.bf16.xpose.msra.mxu0 %v3008_v47  ;;  %858 = vmatprep.mubr.f32.mxu0 %v159_v52  ;;  %v377_v47 = vld [vmem:[#allocation5 + $0x618] sm:$0xff] }
  0xec   :  { %1497 = vmatmul.mubr.f32.gmra.mrb[24].mxu1 %v150_v48  ;;  %3011 = vmatprep.subr.bf16.mxu0 %v3010_v50  ;;  %v385_v48 = vld [vmem:[#allocation5 + $0x658] sm:$0xff] }
  0xed   :  { %3265 = vmatpush1.bf16.xpose.msra.mxu1 %v3264_v49  ;;  %1502 = vmatprep.mubr.f32.mxu1 %v159_v52  ;;  %v633_v49 = vld [vmem:[#allocation5 + $0xe18] sm:$0xff]  ;;  %v3284_v52 = vpack.c.bf16 %v624_v46, %v616_v45  ;;  %v3030_v53 = vpack.c.bf16 %v385_v48, %v377_v47  ;;  %v459_v45 = vld [vmem:[#allocation5 + $0x8a8] sm:$0xff]  ;;  %v56_v47 = vld [vmem:[#allocation2 + $0x10] sm:$0xff] }
  0xee   :  { %3267 = vmatprep.subr.bf16.mxu1 %v3266_v51  ;;  %859 = vmatmul.mubr.f32.gmra.mrb[26].mxu0 %v158_v54  ;;  %v641_v50 = vld [vmem:[#allocation5 + $0xe58] sm:$0xff]  ;;  %v3028_v51 = vpack.c.bf16 %v368_v44, %v360_v43  ;;  %v203_v43 = vld [vmem:[#allocation5 + $0xa8] sm:$0xff] }
  0xef   :  { %864 = vmatprep.mubr.f32.mxu0 %v167_v57  ;;  %v211_v44 = vld [vmem:[#allocation5 + $0xe8] sm:$0xff] }
  0xf0   :  { %1503 = vmatmul.mubr.f32.gmra.mrb[26].mxu1 %v158_v54  ;;  %v3286_v54 = vpack.c.bf16 %v641_v50, %v633_v49  ;;  %v467_v46 = vld [vmem:[#allocation5 + $0x8e8] sm:$0xff]  ;;  %v3050_v50 = vpack.c.bf16 %v211_v44, %v203_v43 }
  0xf1   :  { %1508 = vmatprep.mubr.f32.mxu1 %v167_v57  ;;  %v632_v57 = vld [vmem:[#allocation5 + $0xe10] sm:$0xff]  ;;  %v267_v43 = vld [vmem:[#allocation5 + $0x2a8] sm:$0xff] }
  0xf2   :  { %865 = vmatmul.mubr.f32.gmra.mrb[28].mxu0 %v166_v0  ;;  %v275_v44 = vld [vmem:[#allocation5 + $0x2e8] sm:$0xff] }
  0xf3   :  { %3013 = vmatpush1.bf16.xpose.msra.mxu0 %v3012_v63  ;;  %870 = vmatprep.mubr.f32.mxu0 %v175_v4  ;;  %v3032_v63 = vpack.c.bf16 %v384_v56, %v376_v55  ;;  %v210_v55 = vld [vmem:[#allocation5 + $0xe0] sm:$0xff] }
  0xf4   :  { %1509 = vmatmul.mubr.f32.gmra.mrb[28].mxu1 %v166_v0  ;;  %3015 = vmatprep.subr.bf16.mxu0 %v3014_v2  ;;  %v3288_v0 = vpack.c.bf16 %v640_v58, %v632_v57  ;;  %v3290_v2 = vpack.c.bf16 %v657_v62, %v649_v61  ;;  %v458_v56 = vld [vmem:[#allocation5 + $0x8a0] sm:$0xff]  ;;  %v73_v57 = vld [vmem:[#allocation2 + $0x98] sm:$0xff]  ;;  %v475_v61 = vld [vmem:[#allocation5 + $0x928] sm:$0xff] }
  0xf5   :  { %3269 = vmatpush1.bf16.xpose.msra.mxu1 %v3268_v1  ;;  %1514 = vmatprep.mubr.f32.mxu1 %v175_v4  ;;  %v3034_v1 = vpack.c.bf16 %v401_v60, %v393_v59  ;;  %v400_v4 = vld [vmem:[#allocation5 + $0x6d0] sm:$0xff]  ;;  %v466_v58 = vld [vmem:[#allocation5 + $0x8e0] sm:$0xff]  ;;  %v219_v59 = vld [vmem:[#allocation5 + $0x128] sm:$0xff] }
  0xf6   :  { %3271 = vmatprep.subr.bf16.mxu1 %v3270_v3  ;;  %871 = vmatmul.mubr.f32.gmra.mrb[30].mxu0 %v174_v6  ;;  %v392_v3 = vld [vmem:[#allocation5 + $0x690] sm:$0xff]  ;;  %v227_v60 = vld [vmem:[#allocation5 + $0x168] sm:$0xff] }
  0xf7   :  { %941 = vmatprep.mubr.f32.mxu0 %v57_v9  ;;  %v3036_v11 = vpack.c.bf16 %v400_v4, %v392_v3  ;;  %v483_v62 = vld [vmem:[#allocation5 + $0x968] sm:$0xff]  ;;  %v81_v4 = vld [vmem:[#allocation2 + $0xd8] sm:$0xff] }
  0xf8   :  { %1515 = vmatmul.mubr.f32.gmra.mrb[30].mxu1 %v174_v6  ;;  %v656_v6 = vld [vmem:[#allocation5 + $0xed0] sm:$0xff]  ;;  %v3310_v3 = vpack.c.bf16 %v483_v62, %v475_v61  ;;  %v539_v61 = vld [vmem:[#allocation5 + $0xb28] sm:$0xff] }
  0xf9   :  { %1585 = vmatprep.mubr.f32.mxu1 %v57_v9  ;;  %v665_v9 = vld [vmem:[#allocation5 + $0xf18] sm:$0xff]  ;;  %v3292_v12 = vpack.c.bf16 %v656_v6, %v648_v5  ;;  %v218_v5 = vld [vmem:[#allocation5 + $0x120] sm:$0xff]  ;;  %v80_v6 = vld [vmem:[#allocation2 + $0xd0] sm:$0xff] }
  0xfa   :  { %v3294_v14 = vpack.c.bf16 %v673_v10, %v665_v9  ;;  %v89_v9 = vld [vmem:[#allocation2 + $0x118] sm:$0xff]  ;;  %v482_v10 = vld [vmem:[#allocation5 + $0x960] sm:$0xff]  ;;  %v547_v62 = vld [vmem:[#allocation5 + $0xb68] sm:$0xff] }
  0xfb   :  { %3017 = vmatpush1.bf16.xpose.msra.mxu0 %v3016_v15  ;;  %v408_v15 = vld [vmem:[#allocation5 + $0x710] sm:$0xff] }
  0xfc   :  { %3019 = vmatprep.subr.bf16.mxu0 %v3018_v17  ;;  %v664_v17 = vld [vmem:[#allocation5 + $0xf10] sm:$0xff] }
  0xfd   :  { %3273 = vmatpush1.bf16.xpose.msra.mxu1 %v3272_v16  ;;  %v416_v16 = vld [vmem:[#allocation5 + $0x750] sm:$0xff] }
  0xfe   :  { %3275 = vmatprep.subr.bf16.mxu1 %v3274_v18  ;;  %v672_v18 = vld [vmem:[#allocation5 + $0xf50] sm:$0xff]  ;;  %v3040_v23 = vpack.c.bf16 %v416_v16, %v408_v15  ;;  %v3056_v15 = vpack.c.bf16 %v226_v7, %v218_v5  ;;  %v282_v5 = vld [vmem:[#allocation5 + $0x320] sm:$0xff] }
  0xff   :  { %v3296_v24 = vpack.c.bf16 %v672_v18, %v664_v17  ;;  %v88_v16 = vld [vmem:[#allocation2 + $0x110] sm:$0xff]  ;;  %v3312_v17 = vpack.c.bf16 %v482_v10, %v474_v8  ;;  %v290_v7 = vld [vmem:[#allocation5 + $0x360] sm:$0xff] }
 0x100   :  { %v538_v8 = vld [vmem:[#allocation5 + $0xb20] sm:$0xff] }
 0x101   :  { %v546_v10 = vld [vmem:[#allocation5 + $0xb60] sm:$0xff] }
 0x103   :  { %3021 = vmatpush1.bf16.xpose.msra.mxu0 %v3020_v27  ;;  %v424_v27 = vld [vmem:[#allocation5 + $0x790] sm:$0xff] }
 0x104   :  { %3023 = vmatprep.subr.bf16.mxu0 %v3022_v29  ;;  %v680_v29 = vld [vmem:[#allocation5 + $0xf90] sm:$0xff] }
 0x105   :  { %3277 = vmatpush1.bf16.xpose.msra.mxu1 %v3276_v28  ;;  %v432_v28 = vld [vmem:[#allocation5 + $0x7d0] sm:$0xff] }
 0x106   :  { %3279 = vmatprep.subr.bf16.mxu1 %v3278_v30  ;;  %v688_v30 = vld [vmem:[#allocation5 + $0xfd0] sm:$0xff]  ;;  %v3044_v35 = vpack.c.bf16 %v432_v28, %v424_v27  ;;  %v251_v27 = vld [vmem:[#allocation5 + $0x228] sm:$0xff] }
 0x107   :  { %v3300_v36 = vpack.c.bf16 %v688_v30, %v680_v29  ;;  %v259_v28 = vld [vmem:[#allocation5 + $0x268] sm:$0xff] }
 0x108   :  { %v507_v29 = vld [vmem:[#allocation5 + $0xa28] sm:$0xff]  ;;  %v3062_v34 = vpack.c.bf16 %v259_v28, %v251_v27 }
 0x109   :  { %v515_v30 = vld [vmem:[#allocation5 + $0xa68] sm:$0xff] }
 0x10a   :  { %v315_v27 = vld [vmem:[#allocation5 + $0x428] sm:$0xff] }
 0x10b   :  { %3025 = vmatpush1.bf16.xpose.msra.mxu0 %v3024_v39  ;;  %v186_v39 = vld [vmem:[#allocation5 + $0x20] sm:$0xff]  ;;  %v323_v28 = vld [vmem:[#allocation5 + $0x468] sm:$0xff] }
 0x10c   :  { %3027 = vmatprep.subr.bf16.mxu0 %v3026_v41  ;;  %v442_v41 = vld [vmem:[#allocation5 + $0x820] sm:$0xff] }
 0x10d   :  { %3281 = vmatpush1.bf16.xpose.msra.mxu1 %v3280_v40  ;;  %v194_v40 = vld [vmem:[#allocation5 + $0x60] sm:$0xff] }
 0x10e   :  { %3283 = vmatprep.subr.bf16.mxu1 %v3282_v42  ;;  %v450_v42 = vld [vmem:[#allocation5 + $0x860] sm:$0xff]  ;;  %v3048_v48 = vpack.c.bf16 %v194_v40, %v186_v39 }
 0x10f   :  { %v3304_v49 = vpack.c.bf16 %v450_v42, %v442_v41  ;;  %v258_v39 = vld [vmem:[#allocation5 + $0x260] sm:$0xff]  ;;  %v121_v41 = vld [vmem:[#allocation2 + $0x218] sm:$0xff] }
 0x110   :  { %v506_v40 = vld [vmem:[#allocation5 + $0xa20] sm:$0xff] }
 0x111   :  { %v514_v42 = vld [vmem:[#allocation5 + $0xa60] sm:$0xff] }
 0x113   :  { %3029 = vmatpush1.bf16.xpose.msra.mxu0 %v3028_v51  ;;  %v3306_v51 = vpack.c.bf16 %v467_v46, %v459_v45  ;;  %v523_v45 = vld [vmem:[#allocation5 + $0xaa8] sm:$0xff] }
 0x114   :  { %3031 = vmatprep.subr.bf16.mxu0 %v3030_v53  ;;  %v202_v53 = vld [vmem:[#allocation5 + $0xa0] sm:$0xff]  ;;  %v531_v46 = vld [vmem:[#allocation5 + $0xae8] sm:$0xff] }
 0x115   :  { %3285 = vmatpush1.bf16.xpose.msra.mxu1 %v3284_v52  ;;  %v65_v52 = vld [vmem:[#allocation2 + $0x58] sm:$0xff] }
 0x116   :  { %3287 = vmatprep.subr.bf16.mxu1 %v3286_v54  ;;  %v64_v54 = vld [vmem:[#allocation2 + $0x50] sm:$0xff] }
 0x11b   :  { %3033 = vmatpush1.bf16.xpose.msra.mxu0 %v3032_v63  ;;  %v3052_v63 = vpack.c.bf16 %v210_v55, %v202_v53  ;;  %v266_v53 = vld [vmem:[#allocation5 + $0x2a0] sm:$0xff] }
 0x11c   :  { %3035 = vmatprep.subr.bf16.mxu0 %v3034_v1  ;;  %v3308_v1 = vpack.c.bf16 %v466_v58, %v458_v56  ;;  %v274_v55 = vld [vmem:[#allocation5 + $0x2e0] sm:$0xff] }
 0x11d   :  { %3289 = vmatpush1.bf16.xpose.msra.mxu1 %v3288_v0  ;;  %v72_v0 = vld [vmem:[#allocation2 + $0x90] sm:$0xff]  ;;  %v522_v56 = vld [vmem:[#allocation5 + $0xaa0] sm:$0xff] }
 0x11e   :  { %3291 = vmatprep.subr.bf16.mxu1 %v3290_v2  ;;  %v3054_v2 = vpack.c.bf16 %v227_v60, %v219_v59  ;;  %v530_v58 = vld [vmem:[#allocation5 + $0xae0] sm:$0xff]  ;;  %v283_v59 = vld [vmem:[#allocation5 + $0x328] sm:$0xff] }
 0x11f   :  { %v291_v60 = vld [vmem:[#allocation5 + $0x368] sm:$0xff] }
 0x123   :  { %3037 = vmatpush1.bf16.xpose.msra.mxu0 %v3036_v11  ;;  %v235_v11 = vld [vmem:[#allocation5 + $0x1a8] sm:$0xff] }
 0x124   :  { %3039 = vmatprep.subr.bf16.mxu0 %v3038_v13  ;;  %v491_v13 = vld [vmem:[#allocation5 + $0x9a8] sm:$0xff] }
 0x125   :  { %3293 = vmatpush1.bf16.xpose.msra.mxu1 %v3292_v12  ;;  %v243_v12 = vld [vmem:[#allocation5 + $0x1e8] sm:$0xff] }
 0x126   :  { %3295 = vmatprep.subr.bf16.mxu1 %v3294_v14  ;;  %v499_v14 = vld [vmem:[#allocation5 + $0x9e8] sm:$0xff]  ;;  %v3058_v18 = vpack.c.bf16 %v243_v12, %v235_v11 }
 0x127   :  { %v3314_v19 = vpack.c.bf16 %v499_v14, %v491_v13  ;;  %v299_v11 = vld [vmem:[#allocation5 + $0x3a8] sm:$0xff] }
 0x128   :  { %v307_v12 = vld [vmem:[#allocation5 + $0x3e8] sm:$0xff] }
 0x129   :  { %v555_v13 = vld [vmem:[#allocation5 + $0xba8] sm:$0xff] }
 0x12a   :  { %v563_v14 = vld [vmem:[#allocation5 + $0xbe8] sm:$0xff] }
 0x12b   :  { %3041 = vmatpush1.bf16.xpose.msra.mxu0 %v3040_v23  ;;  %v242_v23 = vld [vmem:[#allocation5 + $0x1e0] sm:$0xff] }
 0x12c   :  { %3043 = vmatprep.subr.bf16.mxu0 %v3042_v25  ;;  %v105_v25 = vld [vmem:[#allocation2 + $0x198] sm:$0xff]  ;;  %v3060_v31 = vpack.c.bf16 %v242_v23, %v234_v21  ;;  %v298_v21 = vld [vmem:[#allocation5 + $0x3a0] sm:$0xff] }
 0x12d   :  { %3297 = vmatpush1.bf16.xpose.msra.mxu1 %v3296_v24  ;;  %v490_v24 = vld [vmem:[#allocation5 + $0x9a0] sm:$0xff] }
 0x12e   :  { %3299 = vmatprep.subr.bf16.mxu1 %v3298_v26  ;;  %v498_v26 = vld [vmem:[#allocation5 + $0x9e0] sm:$0xff] }
 0x12f   :  { %v3316_v33 = vpack.c.bf16 %v498_v26, %v490_v24  ;;  %v306_v23 = vld [vmem:[#allocation5 + $0x3e0] sm:$0xff] }
 0x130   :  { %v554_v24 = vld [vmem:[#allocation5 + $0xba0] sm:$0xff] }
 0x131   :  { %v562_v26 = vld [vmem:[#allocation5 + $0xbe0] sm:$0xff] }
 0x133   :  { %3045 = vmatpush1.bf16.xpose.msra.mxu0 %v3044_v35  ;;  %v3318_v35 = vpack.c.bf16 %v515_v30, %v507_v29  ;;  %v571_v29 = vld [vmem:[#allocation5 + $0xc28] sm:$0xff] }
 0x134   :  { %3047 = vmatprep.subr.bf16.mxu0 %v3046_v37  ;;  %v250_v37 = vld [vmem:[#allocation5 + $0x220] sm:$0xff]  ;;  %v579_v30 = vld [vmem:[#allocation5 + $0xc68] sm:$0xff] }
 0x135   :  { %3301 = vmatpush1.bf16.xpose.msra.mxu1 %v3300_v36  ;;  %v113_v36 = vld [vmem:[#allocation2 + $0x1d8] sm:$0xff] }
 0x136   :  { %3303 = vmatprep.subr.bf16.mxu1 %v3302_v38  ;;  %v112_v38 = vld [vmem:[#allocation2 + $0x1d0] sm:$0xff] }
 0x13a   :  { %942 = vmatmul.mubr.f32.vlgmr.msra.gmra.mrb[0].mxu0 %v56_v47 }
 0x13b   :  { %3049 = vmatpush1.bf16.xpose.msra.mxu0 %v3048_v48  ;;  %947 = vmatprep.mubr.f32.mxu0 %v65_v52  ;;  %v120_v48 = vld [vmem:[#allocation2 + $0x210] sm:$0xff] }
 0x13c   :  { %1586 = vmatmul.mubr.f32.vlgmr.msra.gmra.mrb[0].mxu1 %v56_v47  ;;  %3051 = vmatprep.subr.bf16.mxu0 %v3050_v50  ;;  %v3064_v47 = vpack.c.bf16 %v258_v39, %v250_v37  ;;  %v3066_v50 = vpack.c.bf16 %v275_v44, %v267_v43  ;;  %v314_v37 = vld [vmem:[#allocation5 + $0x420] sm:$0xff]  ;;  %v331_v43 = vld [vmem:[#allocation5 + $0x4a8] sm:$0xff] }
 0x13d   :  { %3305 = vmatpush1.bf16.xpose.msra.mxu1 %v3304_v49  ;;  %1591 = vmatprep.mubr.f32.mxu1 %v65_v52  ;;  %v3320_v49 = vpack.c.bf16 %v514_v42, %v506_v40  ;;  %v129_v52 = vld [vmem:[#allocation2 + $0x258] sm:$0xff]  ;;  %v322_v39 = vld [vmem:[#allocation5 + $0x460] sm:$0xff]  ;;  %v339_v44 = vld [vmem:[#allocation5 + $0x4e8] sm:$0xff] }
 0x13e   :  { %3307 = vmatprep.subr.bf16.mxu1 %v3306_v51  ;;  %948 = vmatmul.mubr.f32.gmra.mrb[2].mxu0 %v64_v54  ;;  %v3322_v51 = vpack.c.bf16 %v531_v46, %v523_v45  ;;  %v570_v40 = vld [vmem:[#allocation5 + $0xc20] sm:$0xff]  ;;  %v587_v45 = vld [vmem:[#allocation5 + $0xca8] sm:$0xff] }
 0x13f   :  { %953 = vmatprep.mubr.f32.mxu0 %v73_v57  ;;  %v578_v42 = vld [vmem:[#allocation5 + $0xc60] sm:$0xff]  ;;  %v595_v46 = vld [vmem:[#allocation5 + $0xce8] sm:$0xff] }
 0x140   :  { %1592 = vmatmul.mubr.f32.gmra.mrb[2].mxu1 %v64_v54  ;;  %v128_v54 = vld [vmem:[#allocation2 + $0x250] sm:$0xff] }
 0x141   :  { %1597 = vmatprep.mubr.f32.mxu1 %v73_v57  ;;  %v137_v57 = vld [vmem:[#allocation2 + $0x298] sm:$0xff] }
 0x142   :  { %954 = vmatmul.mubr.f32.gmra.mrb[4].mxu0 %v72_v0 }
 0x143   :  { %3053 = vmatpush1.bf16.xpose.msra.mxu0 %v3052_v63  ;;  %959 = vmatprep.mubr.f32.mxu0 %v81_v4  ;;  %v3068_v63 = vpack.c.bf16 %v274_v55, %v266_v53  ;;  %v586_v53 = vld [vmem:[#allocation5 + $0xca0] sm:$0xff]  ;;  %v347_v55 = vld [vmem:[#allocation5 + $0x528] sm:$0xff] }
 0x144   :  { %1598 = vmatmul.mubr.f32.gmra.mrb[4].mxu1 %v72_v0  ;;  %3055 = vmatprep.subr.bf16.mxu0 %v3054_v2  ;;  %v136_v0 = vld [vmem:[#allocation2 + $0x290] sm:$0xff]  ;;  %v3070_v2 = vpack.c.bf16 %v291_v60, %v283_v59 }
 0x145   :  { %3309 = vmatpush1.bf16.xpose.msra.mxu1 %v3308_v1  ;;  %1603 = vmatprep.mubr.f32.mxu1 %v81_v4  ;;  %v3324_v1 = vpack.c.bf16 %v530_v58, %v522_v56  ;;  %v145_v4 = vld [vmem:[#allocation2 + $0x2d8] sm:$0xff]  ;;  %v355_v56 = vld [vmem:[#allocation5 + $0x568] sm:$0xff] }
 0x146   :  { %3311 = vmatprep.subr.bf16.mxu1 %v3310_v3  ;;  %960 = vmatmul.mubr.f32.gmra.mrb[6].mxu0 %v80_v6  ;;  %v3326_v3 = vpack.c.bf16 %v547_v62, %v539_v61  ;;  %v611_v58 = vld [vmem:[#allocation5 + $0xd68] sm:$0xff]  ;;  %v3086_v61 = vpack.c.bf16 %v355_v56, %v347_v55 }
 0x147   :  { %965 = vmatprep.mubr.f32.mxu0 %v89_v9 }
 0x148   :  { %1604 = vmatmul.mubr.f32.gmra.mrb[6].mxu1 %v80_v6  ;;  %v144_v6 = vld [vmem:[#allocation2 + $0x2d0] sm:$0xff] }
 0x149   :  { %1609 = vmatprep.mubr.f32.mxu1 %v89_v9  ;;  %v153_v9 = vld [vmem:[#allocation2 + $0x318] sm:$0xff] }
 0x14a   :  { %966 = vmatmul.mubr.f32.gmra.mrb[8].mxu0 %v88_v16 }
 0x14b   :  { %3057 = vmatpush1.bf16.xpose.msra.mxu0 %v3056_v15  ;;  %971 = vmatprep.mubr.f32.mxu0 %v97_v20  ;;  %v3072_v15 = vpack.c.bf16 %v290_v7, %v282_v5  ;;  %v619_v5 = vld [vmem:[#allocation5 + $0xda8] sm:$0xff] }
 0x14c   :  { %1610 = vmatmul.mubr.f32.gmra.mrb[8].mxu1 %v88_v16  ;;  %3059 = vmatprep.subr.bf16.mxu0 %v3058_v18  ;;  %v152_v16 = vld [vmem:[#allocation2 + $0x310] sm:$0xff]  ;;  %v3074_v18 = vpack.c.bf16 %v307_v12, %v299_v11  ;;  %v362_v11 = vld [vmem:[#allocation5 + $0x5a0] sm:$0xff] }
 0x14d   :  { %3313 = vmatpush1.bf16.xpose.msra.mxu1 %v3312_v17  ;;  %1615 = vmatprep.mubr.f32.mxu1 %v97_v20  ;;  %v3328_v17 = vpack.c.bf16 %v546_v10, %v538_v8  ;;  %v161_v20 = vld [vmem:[#allocation2 + $0x358] sm:$0xff]  ;;  %v370_v12 = vld [vmem:[#allocation5 + $0x5e0] sm:$0xff] }
 0x14e   :  { %3315 = vmatprep.subr.bf16.mxu1 %v3314_v19  ;;  %972 = vmatmul.mubr.f32.gmra.mrb[10].mxu0 %v96_v22  ;;  %v3330_v19 = vpack.c.bf16 %v563_v14, %v555_v13  ;;  %v618_v13 = vld [vmem:[#allocation5 + $0xda0] sm:$0xff] }
 0x14f   :  { %977 = vmatprep.mubr.f32.mxu0 %v105_v25  ;;  %v626_v14 = vld [vmem:[#allocation5 + $0xde0] sm:$0xff] }
 0x150   :  { %1616 = vmatmul.mubr.f32.gmra.mrb[10].mxu1 %v96_v22  ;;  %v160_v22 = vld [vmem:[#allocation2 + $0x350] sm:$0xff] }
 0x151   :  { %1621 = vmatprep.mubr.f32.mxu1 %v105_v25  ;;  %v169_v25 = vld [vmem:[#allocation2 + $0x398] sm:$0xff] }
 0x152   :  { %978 = vmatmul.mubr.f32.gmra.mrb[12].mxu0 %v104_v32 }
 0x153   :  { %3061 = vmatpush1.bf16.xpose.msra.mxu0 %v3060_v31  ;;  %983 = vmatprep.mubr.f32.mxu0 %v113_v36  ;;  %v3076_v31 = vpack.c.bf16 %v306_v23, %v298_v21  ;;  %v378_v23 = vld [vmem:[#allocation5 + $0x620] sm:$0xff] }
 0x154   :  { %1622 = vmatmul.mubr.f32.gmra.mrb[12].mxu1 %v104_v32  ;;  %3063 = vmatprep.subr.bf16.mxu0 %v3062_v34  ;;  %v168_v32 = vld [vmem:[#allocation2 + $0x390] sm:$0xff]  ;;  %v3078_v34 = vpack.c.bf16 %v323_v28, %v315_v27  ;;  %v395_v27 = vld [vmem:[#allocation5 + $0x6a8] sm:$0xff] }
 0x155   :  { %3317 = vmatpush1.bf16.xpose.msra.mxu1 %v3316_v33  ;;  %1627 = vmatprep.mubr.f32.mxu1 %v113_v36  ;;  %v3332_v33 = vpack.c.bf16 %v562_v26, %v554_v24  ;;  %v177_v36 = vld [vmem:[#allocation2 + $0x3d8] sm:$0xff]  ;;  %v386_v24 = vld [vmem:[#allocation5 + $0x660] sm:$0xff]  ;;  %v403_v28 = vld [vmem:[#allocation5 + $0x6e8] sm:$0xff] }
 0x156   :  { %3319 = vmatprep.subr.bf16.mxu1 %v3318_v35  ;;  %984 = vmatmul.mubr.f32.gmra.mrb[14].mxu0 %v112_v38  ;;  %v3334_v35 = vpack.c.bf16 %v579_v30, %v571_v29  ;;  %v642_v26 = vld [vmem:[#allocation5 + $0xe60] sm:$0xff]  ;;  %v651_v29 = vld [vmem:[#allocation5 + $0xea8] sm:$0xff] }
 0x157   :  { %989 = vmatprep.mubr.f32.mxu0 %v121_v41  ;;  %v659_v30 = vld [vmem:[#allocation5 + $0xee8] sm:$0xff] }
 0x158   :  { %1628 = vmatmul.mubr.f32.gmra.mrb[14].mxu1 %v112_v38  ;;  %v176_v38 = vld [vmem:[#allocation2 + $0x3d0] sm:$0xff] }
 0x159   :  { %1633 = vmatprep.mubr.f32.mxu1 %v121_v41  ;;  %v59_v41 = vld [vmem:[#allocation2 + $0x28] sm:$0xff] }
 0x15a   :  { %990 = vmatmul.mubr.f32.gmra.mrb[16].mxu0 %v120_v48 }
 0x15b   :  { %3065 = vmatpush1.bf16.xpose.msra.mxu0 %v3064_v47  ;;  %995 = vmatprep.mubr.f32.mxu0 %v129_v52  ;;  %v3080_v47 = vpack.c.bf16 %v322_v39, %v314_v37  ;;  %v650_v37 = vld [vmem:[#allocation5 + $0xea0] sm:$0xff]  ;;  %v411_v39 = vld [vmem:[#allocation5 + $0x728] sm:$0xff] }
 0x15c   :  { %1634 = vmatmul.mubr.f32.gmra.mrb[16].mxu1 %v120_v48  ;;  %3067 = vmatprep.subr.bf16.mxu0 %v3066_v50  ;;  %v3336_v48 = vpack.c.bf16 %v578_v42, %v570_v40  ;;  %v3338_v50 = vpack.c.bf16 %v595_v46, %v587_v45  ;;  %v419_v40 = vld [vmem:[#allocation5 + $0x768] sm:$0xff] }
 0x15d   :  { %3321 = vmatpush1.bf16.xpose.msra.mxu1 %v3320_v49  ;;  %1639 = vmatprep.mubr.f32.mxu1 %v129_v52  ;;  %v3082_v49 = vpack.c.bf16 %v339_v44, %v331_v43  ;;  %v338_v52 = vld [vmem:[#allocation5 + $0x4e0] sm:$0xff]  ;;  %v675_v42 = vld [vmem:[#allocation5 + $0xf68] sm:$0xff]  ;;  %v3102_v45 = vpack.c.bf16 %v419_v40, %v411_v39  ;;  %v228_v39 = vld [vmem:[#allocation5 + $0x170] sm:$0xff] }
 0x15e   :  { %3323 = vmatprep.subr.bf16.mxu1 %v3322_v51  ;;  %996 = vmatmul.mubr.f32.gmra.mrb[18].mxu0 %v128_v54  ;;  %v330_v51 = vld [vmem:[#allocation5 + $0x4a0] sm:$0xff]  ;;  %v476_v40 = vld [vmem:[#allocation5 + $0x930] sm:$0xff] }
 0x15f   :  { %1001 = vmatprep.mubr.f32.mxu0 %v137_v57  ;;  %v3084_v59 = vpack.c.bf16 %v338_v52, %v330_v51  ;;  %v427_v51 = vld [vmem:[#allocation5 + $0x7a8] sm:$0xff] }
 0x160   :  { %1640 = vmatmul.mubr.f32.gmra.mrb[18].mxu1 %v128_v54  ;;  %v594_v54 = vld [vmem:[#allocation5 + $0xce0] sm:$0xff]  ;;  %v435_v52 = vld [vmem:[#allocation5 + $0x7e8] sm:$0xff] }
 0x161   :  { %1645 = vmatprep.mubr.f32.mxu1 %v137_v57  ;;  %v603_v57 = vld [vmem:[#allocation5 + $0xd28] sm:$0xff]  ;;  %v3340_v60 = vpack.c.bf16 %v594_v54, %v586_v53 }
 0x162   :  { %1002 = vmatmul.mubr.f32.gmra.mrb[20].mxu0 %v136_v0  ;;  %v3342_v62 = vpack.c.bf16 %v611_v58, %v603_v57  ;;  %v683_v53 = vld [vmem:[#allocation5 + $0xfa8] sm:$0xff]  ;;  %v3106_v57 = vpack.c.bf16 %v435_v52, %v427_v51 }
 0x163   :  { %3069 = vmatpush1.bf16.xpose.msra.mxu0 %v3068_v63  ;;  %1007 = vmatprep.mubr.f32.mxu0 %v145_v4  ;;  %v346_v63 = vld [vmem:[#allocation5 + $0x520] sm:$0xff]  ;;  %v691_v54 = vld [vmem:[#allocation5 + $0xfe8] sm:$0xff] }
 0x164   :  { %1646 = vmatmul.mubr.f32.gmra.mrb[20].mxu1 %v136_v0  ;;  %3071 = vmatprep.subr.bf16.mxu0 %v3070_v2  ;;  %v354_v0 = vld [vmem:[#allocation5 + $0x560] sm:$0xff]  ;;  %v3362_v58 = vpack.c.bf16 %v691_v54, %v683_v53  ;;  %v99_v52 = vld [vmem:[#allocation2 + $0x168] sm:$0xff]  ;;  %v236_v53 = vld [vmem:[#allocation5 + $0x1b0] sm:$0xff] }
 0x165   :  { %3325 = vmatpush1.bf16.xpose.msra.mxu1 %v3324_v1  ;;  %1651 = vmatprep.mubr.f32.mxu1 %v145_v4  ;;  %v602_v1 = vld [vmem:[#allocation5 + $0xd20] sm:$0xff]  ;;  %v371_v4 = vld [vmem:[#allocation5 + $0x5e8] sm:$0xff]  ;;  %v3088_v7 = vpack.c.bf16 %v354_v0, %v346_v63  ;;  %v189_v63 = vld [vmem:[#allocation5 + $0x38] sm:$0xff] }
 0x166   :  { %3327 = vmatprep.subr.bf16.mxu1 %v3326_v3  ;;  %1008 = vmatmul.mubr.f32.gmra.mrb[22].mxu0 %v144_v6  ;;  %v610_v2 = vld [vmem:[#allocation5 + $0xd60] sm:$0xff]  ;;  %v363_v3 = vld [vmem:[#allocation5 + $0x5a8] sm:$0xff]  ;;  %v197_v0 = vld [vmem:[#allocation5 + $0x78] sm:$0xff] }
 0x167   :  { %1013 = vmatprep.mubr.f32.mxu0 %v153_v9  ;;  %v3344_v8 = vpack.c.bf16 %v610_v2, %v602_v1  ;;  %v445_v1 = vld [vmem:[#allocation5 + $0x838] sm:$0xff]  ;;  %v98_v54 = vld [vmem:[#allocation2 + $0x160] sm:$0xff] }
 0x168   :  { %1652 = vmatmul.mubr.f32.gmra.mrb[22].mxu1 %v144_v6  ;;  %v627_v6 = vld [vmem:[#allocation5 + $0xde8] sm:$0xff]  ;;  %v453_v2 = vld [vmem:[#allocation5 + $0x878] sm:$0xff] }
 0x169   :  { %1657 = vmatprep.mubr.f32.mxu1 %v153_v9  ;;  %v3090_v9 = vpack.c.bf16 %v371_v4, %v363_v3  ;;  %v3346_v10 = vpack.c.bf16 %v627_v6, %v619_v5  ;;  %v3110_v5 = vpack.c.bf16 %v197_v0, %v189_v63  ;;  %v3366_v6 = vpack.c.bf16 %v453_v2, %v445_v1  ;;  %v106_v0 = vld [vmem:[#allocation2 + $0x1a0] sm:$0xff] }
 0x16a   :  { %1014 = vmatmul.mubr.f32.gmra.mrb[24].mxu0 %v152_v16 }
 0x16b   :  { %3073 = vmatpush1.bf16.xpose.msra.mxu0 %v3072_v15  ;;  %1019 = vmatprep.mubr.f32.mxu0 %v161_v20  ;;  %v379_v15 = vld [vmem:[#allocation5 + $0x628] sm:$0xff] }
 0x16c   :  { %1658 = vmatmul.mubr.f32.gmra.mrb[24].mxu1 %v152_v16  ;;  %3075 = vmatprep.subr.bf16.mxu0 %v3074_v18  ;;  %v387_v16 = vld [vmem:[#allocation5 + $0x668] sm:$0xff] }
 0x16d   :  { %3329 = vmatpush1.bf16.xpose.msra.mxu1 %v3328_v17  ;;  %1663 = vmatprep.mubr.f32.mxu1 %v161_v20  ;;  %v635_v17 = vld [vmem:[#allocation5 + $0xe28] sm:$0xff]  ;;  %v3348_v20 = vpack.c.bf16 %v626_v14, %v618_v13  ;;  %v3094_v21 = vpack.c.bf16 %v387_v16, %v379_v15  ;;  %v461_v13 = vld [vmem:[#allocation5 + $0x8b8] sm:$0xff]  ;;  %v58_v15 = vld [vmem:[#allocation2 + $0x20] sm:$0xff] }
 0x16e   :  { %3331 = vmatprep.subr.bf16.mxu1 %v3330_v19  ;;  %1020 = vmatmul.mubr.f32.gmra.mrb[26].mxu0 %v160_v22  ;;  %v643_v18 = vld [vmem:[#allocation5 + $0xe68] sm:$0xff]  ;;  %v3092_v19 = vpack.c.bf16 %v370_v12, %v362_v11  ;;  %v205_v11 = vld [vmem:[#allocation5 + $0xb8] sm:$0xff] }
 0x16f   :  { %1025 = vmatprep.mubr.f32.mxu0 %v169_v25  ;;  %v213_v12 = vld [vmem:[#allocation5 + $0xf8] sm:$0xff] }
 0x170   :  { %1664 = vmatmul.mubr.f32.gmra.mrb[26].mxu1 %v160_v22  ;;  %v3350_v22 = vpack.c.bf16 %v643_v18, %v635_v17  ;;  %v469_v14 = vld [vmem:[#allocation5 + $0x8f8] sm:$0xff]  ;;  %v3114_v18 = vpack.c.bf16 %v213_v12, %v205_v11 }
 0x171   :  { %1669 = vmatprep.mubr.f32.mxu1 %v169_v25  ;;  %v634_v25 = vld [vmem:[#allocation5 + $0xe20] sm:$0xff]  ;;  %v269_v11 = vld [vmem:[#allocation5 + $0x2b8] sm:$0xff] }
 0x172   :  { %1026 = vmatmul.mubr.f32.gmra.mrb[28].mxu0 %v168_v32  ;;  %v277_v12 = vld [vmem:[#allocation5 + $0x2f8] sm:$0xff] }
 0x173   :  { %3077 = vmatpush1.bf16.xpose.msra.mxu0 %v3076_v31  ;;  %1031 = vmatprep.mubr.f32.mxu0 %v177_v36  ;;  %v3096_v31 = vpack.c.bf16 %v386_v24, %v378_v23  ;;  %v212_v23 = vld [vmem:[#allocation5 + $0xf0] sm:$0xff] }
 0x174   :  { %1670 = vmatmul.mubr.f32.gmra.mrb[28].mxu1 %v168_v32  ;;  %3079 = vmatprep.subr.bf16.mxu0 %v3078_v34  ;;  %v3352_v32 = vpack.c.bf16 %v642_v26, %v634_v25  ;;  %v3354_v34 = vpack.c.bf16 %v659_v30, %v651_v29  ;;  %v460_v24 = vld [vmem:[#allocation5 + $0x8b0] sm:$0xff]  ;;  %v75_v25 = vld [vmem:[#allocation2 + $0xa8] sm:$0xff]  ;;  %v477_v29 = vld [vmem:[#allocation5 + $0x938] sm:$0xff] }
 0x175   :  { %3333 = vmatpush1.bf16.xpose.msra.mxu1 %v3332_v33  ;;  %1675 = vmatprep.mubr.f32.mxu1 %v177_v36  ;;  %v3098_v33 = vpack.c.bf16 %v403_v28, %v395_v27  ;;  %v402_v36 = vld [vmem:[#allocation5 + $0x6e0] sm:$0xff]  ;;  %v468_v26 = vld [vmem:[#allocation5 + $0x8f0] sm:$0xff]  ;;  %v221_v27 = vld [vmem:[#allocation5 + $0x138] sm:$0xff] }
 0x176   :  { %3335 = vmatprep.subr.bf16.mxu1 %v3334_v35  ;;  %1032 = vmatmul.mubr.f32.gmra.mrb[30].mxu0 %v176_v38  ;;  %v394_v35 = vld [vmem:[#allocation5 + $0x6a0] sm:$0xff]  ;;  %v229_v28 = vld [vmem:[#allocation5 + $0x178] sm:$0xff] }
 0x177   :  { %1102 = vmatprep.mubr.f32.mxu0 %v59_v41  ;;  %v3100_v43 = vpack.c.bf16 %v402_v36, %v394_v35  ;;  %v485_v30 = vld [vmem:[#allocation5 + $0x978] sm:$0xff]  ;;  %v83_v36 = vld [vmem:[#allocation2 + $0xe8] sm:$0xff] }
 0x178   :  { %1676 = vmatmul.mubr.f32.gmra.mrb[30].mxu1 %v176_v38  ;;  %v658_v38 = vld [vmem:[#allocation5 + $0xee0] sm:$0xff]  ;;  %v3374_v35 = vpack.c.bf16 %v485_v30, %v477_v29  ;;  %v541_v29 = vld [vmem:[#allocation5 + $0xb38] sm:$0xff] }
 0x179   :  { %1746 = vmatprep.mubr.f32.mxu1 %v59_v41  ;;  %v667_v41 = vld [vmem:[#allocation5 + $0xf28] sm:$0xff]  ;;  %v3356_v44 = vpack.c.bf16 %v658_v38, %v650_v37  ;;  %v220_v37 = vld [vmem:[#allocation5 + $0x130] sm:$0xff]  ;;  %v82_v38 = vld [vmem:[#allocation2 + $0xe0] sm:$0xff] }
 0x17a   :  { %v3358_v46 = vpack.c.bf16 %v675_v42, %v667_v41  ;;  %v91_v41 = vld [vmem:[#allocation2 + $0x128] sm:$0xff]  ;;  %v484_v42 = vld [vmem:[#allocation5 + $0x970] sm:$0xff]  ;;  %v549_v30 = vld [vmem:[#allocation5 + $0xb78] sm:$0xff] }
 0x17b   :  { %3081 = vmatpush1.bf16.xpose.msra.mxu0 %v3080_v47  ;;  %v410_v47 = vld [vmem:[#allocation5 + $0x720] sm:$0xff] }
 0x17c   :  { %3083 = vmatprep.subr.bf16.mxu0 %v3082_v49  ;;  %v666_v49 = vld [vmem:[#allocation5 + $0xf20] sm:$0xff] }
 0x17d   :  { %3337 = vmatpush1.bf16.xpose.msra.mxu1 %v3336_v48  ;;  %v418_v48 = vld [vmem:[#allocation5 + $0x760] sm:$0xff] }
 0x17e   :  { %3339 = vmatprep.subr.bf16.mxu1 %v3338_v50  ;;  %v674_v50 = vld [vmem:[#allocation5 + $0xf60] sm:$0xff]  ;;  %v3104_v55 = vpack.c.bf16 %v418_v48, %v410_v47  ;;  %v3120_v47 = vpack.c.bf16 %v228_v39, %v220_v37  ;;  %v284_v37 = vld [vmem:[#allocation5 + $0x330] sm:$0xff] }
 0x17f   :  { %v3360_v56 = vpack.c.bf16 %v674_v50, %v666_v49  ;;  %v90_v48 = vld [vmem:[#allocation2 + $0x120] sm:$0xff]  ;;  %v3376_v49 = vpack.c.bf16 %v484_v42, %v476_v40  ;;  %v292_v39 = vld [vmem:[#allocation5 + $0x370] sm:$0xff] }
 0x180   :  { %v540_v40 = vld [vmem:[#allocation5 + $0xb30] sm:$0xff] }
 0x181   :  { %v548_v42 = vld [vmem:[#allocation5 + $0xb70] sm:$0xff] }
 0x183   :  { %3085 = vmatpush1.bf16.xpose.msra.mxu0 %v3084_v59  ;;  %v426_v59 = vld [vmem:[#allocation5 + $0x7a0] sm:$0xff] }
 0x184   :  { %3087 = vmatprep.subr.bf16.mxu0 %v3086_v61  ;;  %v682_v61 = vld [vmem:[#allocation5 + $0xfa0] sm:$0xff] }
 0x185   :  { %3341 = vmatpush1.bf16.xpose.msra.mxu1 %v3340_v60  ;;  %v434_v60 = vld [vmem:[#allocation5 + $0x7e0] sm:$0xff] }
 0x186   :  { %3343 = vmatprep.subr.bf16.mxu1 %v3342_v62  ;;  %v690_v62 = vld [vmem:[#allocation5 + $0xfe0] sm:$0xff]  ;;  %v3108_v3 = vpack.c.bf16 %v434_v60, %v426_v59  ;;  %v253_v59 = vld [vmem:[#allocation5 + $0x238] sm:$0xff] }
 0x187   :  { %v3364_v4 = vpack.c.bf16 %v690_v62, %v682_v61  ;;  %v261_v60 = vld [vmem:[#allocation5 + $0x278] sm:$0xff] }
 0x188   :  { %v509_v61 = vld [vmem:[#allocation5 + $0xa38] sm:$0xff]  ;;  %v3126_v2 = vpack.c.bf16 %v261_v60, %v253_v59 }
 0x189   :  { %v517_v62 = vld [vmem:[#allocation5 + $0xa78] sm:$0xff] }
 0x18a   :  { %v317_v59 = vld [vmem:[#allocation5 + $0x438] sm:$0xff] }
 0x18b   :  { %3089 = vmatpush1.bf16.xpose.msra.mxu0 %v3088_v7  ;;  %v188_v7 = vld [vmem:[#allocation5 + $0x30] sm:$0xff]  ;;  %v325_v60 = vld [vmem:[#allocation5 + $0x478] sm:$0xff] }
 0x18c   :  { %3091 = vmatprep.subr.bf16.mxu0 %v3090_v9  ;;  %v444_v9 = vld [vmem:[#allocation5 + $0x830] sm:$0xff] }
 0x18d   :  { %3345 = vmatpush1.bf16.xpose.msra.mxu1 %v3344_v8  ;;  %v196_v8 = vld [vmem:[#allocation5 + $0x70] sm:$0xff] }
 0x18e   :  { %3347 = vmatprep.subr.bf16.mxu1 %v3346_v10  ;;  %v452_v10 = vld [vmem:[#allocation5 + $0x870] sm:$0xff]  ;;  %v3112_v16 = vpack.c.bf16 %v196_v8, %v188_v7 }
 0x18f   :  { %v3368_v17 = vpack.c.bf16 %v452_v10, %v444_v9  ;;  %v260_v7 = vld [vmem:[#allocation5 + $0x270] sm:$0xff]  ;;  %v123_v9 = vld [vmem:[#allocation2 + $0x228] sm:$0xff] }
 0x190   :  { %v508_v8 = vld [vmem:[#allocation5 + $0xa30] sm:$0xff] }
 0x191   :  { %v516_v10 = vld [vmem:[#allocation5 + $0xa70] sm:$0xff] }
 0x193   :  { %3093 = vmatpush1.bf16.xpose.msra.mxu0 %v3092_v19  ;;  %v3370_v19 = vpack.c.bf16 %v469_v14, %v461_v13  ;;  %v525_v13 = vld [vmem:[#allocation5 + $0xab8] sm:$0xff] }
 0x194   :  { %3095 = vmatprep.subr.bf16.mxu0 %v3094_v21  ;;  %v204_v21 = vld [vmem:[#allocation5 + $0xb0] sm:$0xff]  ;;  %v533_v14 = vld [vmem:[#allocation5 + $0xaf8] sm:$0xff] }
 0x195   :  { %3349 = vmatpush1.bf16.xpose.msra.mxu1 %v3348_v20  ;;  %v67_v20 = vld [vmem:[#allocation2 + $0x68] sm:$0xff] }
 0x196   :  { %3351 = vmatprep.subr.bf16.mxu1 %v3350_v22  ;;  %v66_v22 = vld [vmem:[#allocation2 + $0x60] sm:$0xff] }
 0x19b   :  { %3097 = vmatpush1.bf16.xpose.msra.mxu0 %v3096_v31  ;;  %v3116_v31 = vpack.c.bf16 %v212_v23, %v204_v21  ;;  %v268_v21 = vld [vmem:[#allocation5 + $0x2b0] sm:$0xff] }
 0x19c   :  { %3099 = vmatprep.subr.bf16.mxu0 %v3098_v33  ;;  %v3372_v33 = vpack.c.bf16 %v468_v26, %v460_v24  ;;  %v276_v23 = vld [vmem:[#allocation5 + $0x2f0] sm:$0xff] }
 0x19d   :  { %3353 = vmatpush1.bf16.xpose.msra.mxu1 %v3352_v32  ;;  %v74_v32 = vld [vmem:[#allocation2 + $0xa0] sm:$0xff]  ;;  %v524_v24 = vld [vmem:[#allocation5 + $0xab0] sm:$0xff] }
 0x19e   :  { %3355 = vmatprep.subr.bf16.mxu1 %v3354_v34  ;;  %v3118_v34 = vpack.c.bf16 %v229_v28, %v221_v27  ;;  %v532_v26 = vld [vmem:[#allocation5 + $0xaf0] sm:$0xff]  ;;  %v285_v27 = vld [vmem:[#allocation5 + $0x338] sm:$0xff] }
 0x19f   :  { %v293_v28 = vld [vmem:[#allocation5 + $0x378] sm:$0xff] }
 0x1a3   :  { %3101 = vmatpush1.bf16.xpose.msra.mxu0 %v3100_v43  ;;  %v237_v43 = vld [vmem:[#allocation5 + $0x1b8] sm:$0xff] }
 0x1a4   :  { %3103 = vmatprep.subr.bf16.mxu0 %v3102_v45  ;;  %v493_v45 = vld [vmem:[#allocation5 + $0x9b8] sm:$0xff] }
 0x1a5   :  { %3357 = vmatpush1.bf16.xpose.msra.mxu1 %v3356_v44  ;;  %v245_v44 = vld [vmem:[#allocation5 + $0x1f8] sm:$0xff] }
 0x1a6   :  { %3359 = vmatprep.subr.bf16.mxu1 %v3358_v46  ;;  %v501_v46 = vld [vmem:[#allocation5 + $0x9f8] sm:$0xff]  ;;  %v3122_v50 = vpack.c.bf16 %v245_v44, %v237_v43 }
 0x1a7   :  { %v3378_v51 = vpack.c.bf16 %v501_v46, %v493_v45  ;;  %v301_v43 = vld [vmem:[#allocation5 + $0x3b8] sm:$0xff] }
 0x1a8   :  { %v309_v44 = vld [vmem:[#allocation5 + $0x3f8] sm:$0xff] }
 0x1a9   :  { %v557_v45 = vld [vmem:[#allocation5 + $0xbb8] sm:$0xff] }
 0x1aa   :  { %v565_v46 = vld [vmem:[#allocation5 + $0xbf8] sm:$0xff] }
 0x1ab   :  { %3105 = vmatpush1.bf16.xpose.msra.mxu0 %v3104_v55  ;;  %v244_v55 = vld [vmem:[#allocation5 + $0x1f0] sm:$0xff] }
 0x1ac   :  { %3107 = vmatprep.subr.bf16.mxu0 %v3106_v57  ;;  %v107_v57 = vld [vmem:[#allocation2 + $0x1a8] sm:$0xff]  ;;  %v3124_v63 = vpack.c.bf16 %v244_v55, %v236_v53  ;;  %v300_v53 = vld [vmem:[#allocation5 + $0x3b0] sm:$0xff] }
 0x1ad   :  { %3361 = vmatpush1.bf16.xpose.msra.mxu1 %v3360_v56  ;;  %v492_v56 = vld [vmem:[#allocation5 + $0x9b0] sm:$0xff] }
 0x1ae   :  { %3363 = vmatprep.subr.bf16.mxu1 %v3362_v58  ;;  %v500_v58 = vld [vmem:[#allocation5 + $0x9f0] sm:$0xff] }
 0x1af   :  { %v3380_v1 = vpack.c.bf16 %v500_v58, %v492_v56  ;;  %v308_v55 = vld [vmem:[#allocation5 + $0x3f0] sm:$0xff] }
 0x1b0   :  { %v556_v56 = vld [vmem:[#allocation5 + $0xbb0] sm:$0xff] }
 0x1b1   :  { %v564_v58 = vld [vmem:[#allocation5 + $0xbf0] sm:$0xff] }
 0x1b3   :  { %3109 = vmatpush1.bf16.xpose.msra.mxu0 %v3108_v3  ;;  %v3382_v3 = vpack.c.bf16 %v517_v62, %v509_v61  ;;  %v573_v61 = vld [vmem:[#allocation5 + $0xc38] sm:$0xff] }
 0x1b4   :  { %3111 = vmatprep.subr.bf16.mxu0 %v3110_v5  ;;  %v252_v5 = vld [vmem:[#allocation5 + $0x230] sm:$0xff]  ;;  %v581_v62 = vld [vmem:[#allocation5 + $0xc78] sm:$0xff] }
 0x1b5   :  { %3365 = vmatpush1.bf16.xpose.msra.mxu1 %v3364_v4  ;;  %v115_v4 = vld [vmem:[#allocation2 + $0x1e8] sm:$0xff] }
 0x1b6   :  { %3367 = vmatprep.subr.bf16.mxu1 %v3366_v6  ;;  %v114_v6 = vld [vmem:[#allocation2 + $0x1e0] sm:$0xff] }
 0x1ba   :  { %1103 = vmatmul.mubr.f32.vlgmr.msra.gmra.mrb[0].mxu0 %v58_v15 }
 0x1bb   :  { %3113 = vmatpush1.bf16.xpose.msra.mxu0 %v3112_v16  ;;  %1108 = vmatprep.mubr.f32.mxu0 %v67_v20  ;;  %v122_v16 = vld [vmem:[#allocation2 + $0x220] sm:$0xff] }
 0x1bc   :  { %1747 = vmatmul.mubr.f32.vlgmr.msra.gmra.mrb[0].mxu1 %v58_v15  ;;  %3115 = vmatprep.subr.bf16.mxu0 %v3114_v18  ;;  %v3128_v15 = vpack.c.bf16 %v260_v7, %v252_v5  ;;  %v3130_v18 = vpack.c.bf16 %v277_v12, %v269_v11  ;;  %v316_v5 = vld [vmem:[#allocation5 + $0x430] sm:$0xff]  ;;  %v333_v11 = vld [vmem:[#allocation5 + $0x4b8] sm:$0xff] }
 0x1bd   :  { %3369 = vmatpush1.bf16.xpose.msra.mxu1 %v3368_v17  ;;  %1752 = vmatprep.mubr.f32.mxu1 %v67_v20  ;;  %v3384_v17 = vpack.c.bf16 %v516_v10, %v508_v8  ;;  %v131_v20 = vld [vmem:[#allocation2 + $0x268] sm:$0xff]  ;;  %v324_v7 = vld [vmem:[#allocation5 + $0x470] sm:$0xff]  ;;  %v341_v12 = vld [vmem:[#allocation5 + $0x4f8] sm:$0xff] }
 0x1be   :  { %3371 = vmatprep.subr.bf16.mxu1 %v3370_v19  ;;  %1109 = vmatmul.mubr.f32.gmra.mrb[2].mxu0 %v66_v22  ;;  %v3386_v19 = vpack.c.bf16 %v533_v14, %v525_v13  ;;  %v572_v8 = vld [vmem:[#allocation5 + $0xc30] sm:$0xff]  ;;  %v589_v13 = vld [vmem:[#allocation5 + $0xcb8] sm:$0xff] }
 0x1bf   :  { %1114 = vmatprep.mubr.f32.mxu0 %v75_v25  ;;  %v580_v10 = vld [vmem:[#allocation5 + $0xc70] sm:$0xff]  ;;  %v597_v14 = vld [vmem:[#allocation5 + $0xcf8] sm:$0xff] }
 0x1c0   :  { %1753 = vmatmul.mubr.f32.gmra.mrb[2].mxu1 %v66_v22  ;;  %v130_v22 = vld [vmem:[#allocation2 + $0x260] sm:$0xff] }
 0x1c1   :  { %1758 = vmatprep.mubr.f32.mxu1 %v75_v25  ;;  %v139_v25 = vld [vmem:[#allocation2 + $0x2a8] sm:$0xff] }
 0x1c2   :  { %1115 = vmatmul.mubr.f32.gmra.mrb[4].mxu0 %v74_v32 }
 0x1c3   :  { %3117 = vmatpush1.bf16.xpose.msra.mxu0 %v3116_v31  ;;  %1120 = vmatprep.mubr.f32.mxu0 %v83_v36  ;;  %v3132_v31 = vpack.c.bf16 %v276_v23, %v268_v21  ;;  %v588_v21 = vld [vmem:[#allocation5 + $0xcb0] sm:$0xff]  ;;  %v349_v23 = vld [vmem:[#allocation5 + $0x538] sm:$0xff] }
 0x1c4   :  { %1759 = vmatmul.mubr.f32.gmra.mrb[4].mxu1 %v74_v32  ;;  %3119 = vmatprep.subr.bf16.mxu0 %v3118_v34  ;;  %v138_v32 = vld [vmem:[#allocation2 + $0x2a0] sm:$0xff]  ;;  %v3134_v34 = vpack.c.bf16 %v293_v28, %v285_v27 }
 0x1c5   :  { %3373 = vmatpush1.bf16.xpose.msra.mxu1 %v3372_v33  ;;  %1764 = vmatprep.mubr.f32.mxu1 %v83_v36  ;;  %v3388_v33 = vpack.c.bf16 %v532_v26, %v524_v24  ;;  %v147_v36 = vld [vmem:[#allocation2 + $0x2e8] sm:$0xff]  ;;  %v357_v24 = vld [vmem:[#allocation5 + $0x578] sm:$0xff] }
 0x1c6   :  { %3375 = vmatprep.subr.bf16.mxu1 %v3374_v35  ;;  %1121 = vmatmul.mubr.f32.gmra.mrb[6].mxu0 %v82_v38  ;;  %v3390_v35 = vpack.c.bf16 %v549_v30, %v541_v29  ;;  %v613_v26 = vld [vmem:[#allocation5 + $0xd78] sm:$0xff]  ;;  %v3150_v29 = vpack.c.bf16 %v357_v24, %v349_v23 }
 0x1c7   :  { %1126 = vmatprep.mubr.f32.mxu0 %v91_v41 }
 0x1c8   :  { %1765 = vmatmul.mubr.f32.gmra.mrb[6].mxu1 %v82_v38  ;;  %v146_v38 = vld [vmem:[#allocation2 + $0x2e0] sm:$0xff] }
 0x1c9   :  { %1770 = vmatprep.mubr.f32.mxu1 %v91_v41  ;;  %v155_v41 = vld [vmem:[#allocation2 + $0x328] sm:$0xff] }
 0x1ca   :  { %1127 = vmatmul.mubr.f32.gmra.mrb[8].mxu0 %v90_v48 }
 0x1cb   :  { %3121 = vmatpush1.bf16.xpose.msra.mxu0 %v3120_v47  ;;  %1132 = vmatprep.mubr.f32.mxu0 %v99_v52  ;;  %v3136_v47 = vpack.c.bf16 %v292_v39, %v284_v37  ;;  %v621_v37 = vld [vmem:[#allocation5 + $0xdb8] sm:$0xff] }
 0x1cc   :  { %1771 = vmatmul.mubr.f32.gmra.mrb[8].mxu1 %v90_v48  ;;  %3123 = vmatprep.subr.bf16.mxu0 %v3122_v50  ;;  %v154_v48 = vld [vmem:[#allocation2 + $0x320] sm:$0xff]  ;;  %v3138_v50 = vpack.c.bf16 %v309_v44, %v301_v43  ;;  %v364_v43 = vld [vmem:[#allocation5 + $0x5b0] sm:$0xff] }
 0x1cd   :  { %3377 = vmatpush1.bf16.xpose.msra.mxu1 %v3376_v49  ;;  %1776 = vmatprep.mubr.f32.mxu1 %v99_v52  ;;  %v3392_v49 = vpack.c.bf16 %v548_v42, %v540_v40  ;;  %v163_v52 = vld [vmem:[#allocation2 + $0x368] sm:$0xff]  ;;  %v372_v44 = vld [vmem:[#allocation5 + $0x5f0] sm:$0xff] }
 0x1ce   :  { %3379 = vmatprep.subr.bf16.mxu1 %v3378_v51  ;;  %1133 = vmatmul.mubr.f32.gmra.mrb[10].mxu0 %v98_v54  ;;  %v3394_v51 = vpack.c.bf16 %v565_v46, %v557_v45  ;;  %v620_v45 = vld [vmem:[#allocation5 + $0xdb0] sm:$0xff] }
 0x1cf   :  { %1138 = vmatprep.mubr.f32.mxu0 %v107_v57  ;;  %v628_v46 = vld [vmem:[#allocation5 + $0xdf0] sm:$0xff] }
 0x1d0   :  { %1777 = vmatmul.mubr.f32.gmra.mrb[10].mxu1 %v98_v54  ;;  %v162_v54 = vld [vmem:[#allocation2 + $0x360] sm:$0xff] }
 0x1d1   :  { %1782 = vmatprep.mubr.f32.mxu1 %v107_v57  ;;  %v171_v57 = vld [vmem:[#allocation2 + $0x3a8] sm:$0xff] }
 0x1d2   :  { %1139 = vmatmul.mubr.f32.gmra.mrb[12].mxu0 %v106_v0 }
 0x1d3   :  { %3125 = vmatpush1.bf16.xpose.msra.mxu0 %v3124_v63  ;;  %1144 = vmatprep.mubr.f32.mxu0 %v115_v4  ;;  %v3140_v63 = vpack.c.bf16 %v308_v55, %v300_v53  ;;  %v380_v55 = vld [vmem:[#allocation5 + $0x630] sm:$0xff] }
 0x1d4   :  { %1783 = vmatmul.mubr.f32.gmra.mrb[12].mxu1 %v106_v0  ;;  %3127 = vmatprep.subr.bf16.mxu0 %v3126_v2  ;;  %v170_v0 = vld [vmem:[#allocation2 + $0x3a0] sm:$0xff]  ;;  %v3142_v2 = vpack.c.bf16 %v325_v60, %v317_v59  ;;  %v397_v59 = vld [vmem:[#allocation5 + $0x6b8] sm:$0xff] }
 0x1d5   :  { %3381 = vmatpush1.bf16.xpose.msra.mxu1 %v3380_v1  ;;  %1788 = vmatprep.mubr.f32.mxu1 %v115_v4  ;;  %v3396_v1 = vpack.c.bf16 %v564_v58, %v556_v56  ;;  %v179_v4 = vld [vmem:[#allocation2 + $0x3e8] sm:$0xff]  ;;  %v388_v56 = vld [vmem:[#allocation5 + $0x670] sm:$0xff]  ;;  %v405_v60 = vld [vmem:[#allocation5 + $0x6f8] sm:$0xff] }
 0x1d6   :  { %3383 = vmatprep.subr.bf16.mxu1 %v3382_v3  ;;  %1145 = vmatmul.mubr.f32.gmra.mrb[14].mxu0 %v114_v6  ;;  %v3398_v3 = vpack.c.bf16 %v581_v62, %v573_v61  ;;  %v644_v58 = vld [vmem:[#allocation5 + $0xe70] sm:$0xff]  ;;  %v653_v61 = vld [vmem:[#allocation5 + $0xeb8] sm:$0xff] }
 0x1d7   :  { %1150 = vmatprep.mubr.f32.mxu0 %v123_v9  ;;  %v661_v62 = vld [vmem:[#allocation5 + $0xef8] sm:$0xff] }
 0x1d8   :  { %1789 = vmatmul.mubr.f32.gmra.mrb[14].mxu1 %v114_v6  ;;  %v178_v6 = vld [vmem:[#allocation2 + $0x3e0] sm:$0xff] }
 0x1d9   :  { %1794 = vmatprep.mubr.f32.mxu1 %v123_v9  ;;  %v61_v9 = vld [vmem:[#allocation2 + $0x38] sm:$0xff] }
 0x1da   :  { %1151 = vmatmul.mubr.f32.gmra.mrb[16].mxu0 %v122_v16 }
 0x1db   :  { %3129 = vmatpush1.bf16.xpose.msra.mxu0 %v3128_v15  ;;  %1156 = vmatprep.mubr.f32.mxu0 %v131_v20  ;;  %v3144_v15 = vpack.c.bf16 %v324_v7, %v316_v5  ;;  %v652_v5 = vld [vmem:[#allocation5 + $0xeb0] sm:$0xff]  ;;  %v413_v7 = vld [vmem:[#allocation5 + $0x738] sm:$0xff] }
 0x1dc   :  { %1795 = vmatmul.mubr.f32.gmra.mrb[16].mxu1 %v122_v16  ;;  %3131 = vmatprep.subr.bf16.mxu0 %v3130_v18  ;;  %v3400_v16 = vpack.c.bf16 %v580_v10, %v572_v8  ;;  %v3402_v18 = vpack.c.bf16 %v597_v14, %v589_v13  ;;  %v421_v8 = vld [vmem:[#allocation5 + $0x778] sm:$0xff] }
 0x1dd   :  { %3385 = vmatpush1.bf16.xpose.msra.mxu1 %v3384_v17  ;;  %1800 = vmatprep.mubr.f32.mxu1 %v131_v20  ;;  %v3146_v17 = vpack.c.bf16 %v341_v12, %v333_v11  ;;  %v340_v20 = vld [vmem:[#allocation5 + $0x4f0] sm:$0xff]  ;;  %v677_v10 = vld [vmem:[#allocation5 + $0xf78] sm:$0xff]  ;;  %v3166_v13 = vpack.c.bf16 %v421_v8, %v413_v7 }
 0x1de   :  { %3387 = vmatprep.subr.bf16.mxu1 %v3386_v19  ;;  %1157 = vmatmul.mubr.f32.gmra.mrb[18].mxu0 %v130_v22  ;;  %v332_v19 = vld [vmem:[#allocation5 + $0x4b0] sm:$0xff] }
 0x1df   :  { %1162 = vmatprep.mubr.f32.mxu0 %v139_v25  ;;  %v3148_v27 = vpack.c.bf16 %v340_v20, %v332_v19  ;;  %v429_v19 = vld [vmem:[#allocation5 + $0x7b8] sm:$0xff] }
 0x1e0   :  { %1801 = vmatmul.mubr.f32.gmra.mrb[18].mxu1 %v130_v22  ;;  %v596_v22 = vld [vmem:[#allocation5 + $0xcf0] sm:$0xff]  ;;  %v437_v20 = vld [vmem:[#allocation5 + $0x7f8] sm:$0xff] }
 0x1e1   :  { %1806 = vmatprep.mubr.f32.mxu1 %v139_v25  ;;  %v605_v25 = vld [vmem:[#allocation5 + $0xd38] sm:$0xff]  ;;  %v3404_v28 = vpack.c.bf16 %v596_v22, %v588_v21 }
 0x1e2   :  { %1163 = vmatmul.mubr.f32.gmra.mrb[20].mxu0 %v138_v32  ;;  %v3406_v30 = vpack.c.bf16 %v613_v26, %v605_v25  ;;  %v685_v21 = vld [vmem:[#allocation5 + $0xfb8] sm:$0xff]  ;;  %v3170_v25 = vpack.c.bf16 %v437_v20, %v429_v19 }
 0x1e3   :  { %3133 = vmatpush1.bf16.xpose.msra.mxu0 %v3132_v31  ;;  %1168 = vmatprep.mubr.f32.mxu0 %v147_v36  ;;  %v348_v31 = vld [vmem:[#allocation5 + $0x530] sm:$0xff]  ;;  %v693_v22 = vld [vmem:[#allocation5 + $0xff8] sm:$0xff] }
 0x1e4   :  { %1807 = vmatmul.mubr.f32.gmra.mrb[20].mxu1 %v138_v32  ;;  %3135 = vmatprep.subr.bf16.mxu0 %v3134_v34  ;;  %v356_v32 = vld [vmem:[#allocation5 + $0x570] sm:$0xff]  ;;  %v3426_v26 = vpack.c.bf16 %v693_v22, %v685_v21 }
 0x1e5   :  { %3389 = vmatpush1.bf16.xpose.msra.mxu1 %v3388_v33  ;;  %1812 = vmatprep.mubr.f32.mxu1 %v147_v36  ;;  %v604_v33 = vld [vmem:[#allocation5 + $0xd30] sm:$0xff]  ;;  %v373_v36 = vld [vmem:[#allocation5 + $0x5f8] sm:$0xff]  ;;  %v3152_v39 = vpack.c.bf16 %v356_v32, %v348_v31 }
 0x1e6   :  { %3391 = vmatprep.subr.bf16.mxu1 %v3390_v35  ;;  %1169 = vmatmul.mubr.f32.gmra.mrb[22].mxu0 %v146_v38  ;;  %v612_v34 = vld [vmem:[#allocation5 + $0xd70] sm:$0xff]  ;;  %v365_v35 = vld [vmem:[#allocation5 + $0x5b8] sm:$0xff] }
 0x1e7   :  { %1174 = vmatprep.mubr.f32.mxu0 %v155_v41  ;;  %v3408_v40 = vpack.c.bf16 %v612_v34, %v604_v33  ;;  %v60_v33 = vld [vmem:[#allocation2 + $0x30] sm:$0xff]  ;;  %v69_v34 = vld [vmem:[#allocation2 + $0x78] sm:$0xff] }
 0x1e8   :  { %1813 = vmatmul.mubr.f32.gmra.mrb[22].mxu1 %v146_v38  ;;  %v629_v38 = vld [vmem:[#allocation5 + $0xdf8] sm:$0xff] }
 0x1e9   :  { %1818 = vmatprep.mubr.f32.mxu1 %v155_v41  ;;  %v3154_v41 = vpack.c.bf16 %v373_v36, %v365_v35  ;;  %v3410_v42 = vpack.c.bf16 %v629_v38, %v621_v37  ;;  %v68_v35 = vld [vmem:[#allocation2 + $0x70] sm:$0xff]  ;;  %v77_v36 = vld [vmem:[#allocation2 + $0xb8] sm:$0xff] }
 0x1ea   :  { %1175 = vmatmul.mubr.f32.gmra.mrb[24].mxu0 %v154_v48  ;;  %v76_v37 = vld [vmem:[#allocation2 + $0xb0] sm:$0xff]  ;;  %v85_v38 = vld [vmem:[#allocation2 + $0xf8] sm:$0xff] }
 0x1eb   :  { %3137 = vmatpush1.bf16.xpose.msra.mxu0 %v3136_v47  ;;  %1180 = vmatprep.mubr.f32.mxu0 %v163_v52  ;;  %v381_v47 = vld [vmem:[#allocation5 + $0x638] sm:$0xff] }
 0x1ec   :  { %1819 = vmatmul.mubr.f32.gmra.mrb[24].mxu1 %v154_v48  ;;  %3139 = vmatprep.subr.bf16.mxu0 %v3138_v50  ;;  %v389_v48 = vld [vmem:[#allocation5 + $0x678] sm:$0xff] }
 0x1ed   :  { %3393 = vmatpush1.bf16.xpose.msra.mxu1 %v3392_v49  ;;  %1824 = vmatprep.mubr.f32.mxu1 %v163_v52  ;;  %v637_v49 = vld [vmem:[#allocation5 + $0xe38] sm:$0xff]  ;;  %v3412_v52 = vpack.c.bf16 %v628_v46, %v620_v45  ;;  %v3158_v53 = vpack.c.bf16 %v389_v48, %v381_v47  ;;  %v108_v45 = vld [vmem:[#allocation2 + $0x1b0] sm:$0xff] }
 0x1ee   :  { %3395 = vmatprep.subr.bf16.mxu1 %v3394_v51  ;;  %1181 = vmatmul.mubr.f32.gmra.mrb[26].mxu0 %v162_v54  ;;  %v645_v50 = vld [vmem:[#allocation5 + $0xe78] sm:$0xff]  ;;  %v3156_v51 = vpack.c.bf16 %v372_v44, %v364_v43  ;;  %v100_v43 = vld [vmem:[#allocation2 + $0x170] sm:$0xff] }
 0x1ef   :  { %1186 = vmatprep.mubr.f32.mxu0 %v171_v57  ;;  %v109_v44 = vld [vmem:[#allocation2 + $0x1b8] sm:$0xff]  ;;  %v116_v47 = vld [vmem:[#allocation2 + $0x1f0] sm:$0xff] }
 0x1f0   :  { %1825 = vmatmul.mubr.f32.gmra.mrb[26].mxu1 %v162_v54  ;;  %v3414_v54 = vpack.c.bf16 %v645_v50, %v637_v49  ;;  %v117_v46 = vld [vmem:[#allocation2 + $0x1f8] sm:$0xff]  ;;  %v124_v49 = vld [vmem:[#allocation2 + $0x230] sm:$0xff] }
 0x1f1   :  { %1830 = vmatprep.mubr.f32.mxu1 %v171_v57  ;;  %v636_v57 = vld [vmem:[#allocation5 + $0xe30] sm:$0xff]  ;;  %v125_v48 = vld [vmem:[#allocation2 + $0x238] sm:$0xff] }
 0x1f2   :  { %1187 = vmatmul.mubr.f32.gmra.mrb[28].mxu0 %v170_v0  ;;  %v133_v50 = vld [vmem:[#allocation2 + $0x278] sm:$0xff] }
 0x1f3   :  { %3141 = vmatpush1.bf16.xpose.msra.mxu0 %v3140_v63  ;;  %1192 = vmatprep.mubr.f32.mxu0 %v179_v4  ;;  %v3160_v63 = vpack.c.bf16 %v388_v56, %v380_v55  ;;  %v148_v55 = vld [vmem:[#allocation2 + $0x2f0] sm:$0xff]  ;;  %v157_v56 = vld [vmem:[#allocation2 + $0x338] sm:$0xff] }
 0x1f4   :  { %1831 = vmatmul.mubr.f32.gmra.mrb[28].mxu1 %v170_v0  ;;  %3143 = vmatprep.subr.bf16.mxu0 %v3142_v2  ;;  %v3416_v0 = vpack.c.bf16 %v644_v58, %v636_v57  ;;  %v3418_v2 = vpack.c.bf16 %v661_v62, %v653_v61  ;;  %v156_v57 = vld [vmem:[#allocation2 + $0x330] sm:$0xff]  ;;  %v165_v58 = vld [vmem:[#allocation2 + $0x378] sm:$0xff] }
 0x1f5   :  { %3397 = vmatpush1.bf16.xpose.msra.mxu1 %v3396_v1  ;;  %1836 = vmatprep.mubr.f32.mxu1 %v179_v4  ;;  %v3162_v1 = vpack.c.bf16 %v405_v60, %v397_v59  ;;  %v404_v4 = vld [vmem:[#allocation5 + $0x6f0] sm:$0xff]  ;;  %v173_v60 = vld [vmem:[#allocation2 + $0x3b8] sm:$0xff] }
 0x1f6   :  { %3399 = vmatprep.subr.bf16.mxu1 %v3398_v3  ;;  %1193 = vmatmul.mubr.f32.gmra.mrb[30].mxu0 %v178_v6  ;;  %v396_v3 = vld [vmem:[#allocation5 + $0x6b0] sm:$0xff]  ;;  %v181_v62 = vld [vmem:[#allocation2 + $0x3f8] sm:$0xff] }
 0x1f7   :  { %1263 = vmatprep.mubr.f32.mxu0 %v61_v9  ;;  %v3164_v11 = vpack.c.bf16 %v404_v4, %v396_v3  ;;  %v164_v59 = vld [vmem:[#allocation2 + $0x370] sm:$0xff]  ;;  %v694_v3 = vld [vmem:[#allocation7] sm:$0xf] }
 0x1f8   :  { %1837 = vmatmul.mubr.f32.gmra.mrb[30].mxu1 %v178_v6  ;;  %v660_v6 = vld [vmem:[#allocation5 + $0xef0] sm:$0xff] }
 0x1f9   :  { %1907 = vmatprep.mubr.f32.mxu1 %v61_v9  ;;  %v669_v9 = vld [vmem:[#allocation5 + $0xf38] sm:$0xff]  ;;  %v3420_v12 = vpack.c.bf16 %v660_v6, %v652_v5  ;;  %v172_v61 = vld [vmem:[#allocation2 + $0x3b0] sm:$0xff] }
 0x1fa   :  { %v3422_v14 = vpack.c.bf16 %v677_v10, %v669_v9 }
 0x1fb   :  { %3145 = vmatpush1.bf16.xpose.msra.mxu0 %v3144_v15  ;;  %v412_v15 = vld [vmem:[#allocation5 + $0x730] sm:$0xff] }
 0x1fc   :  { %3147 = vmatprep.subr.bf16.mxu0 %v3146_v17  ;;  %v668_v17 = vld [vmem:[#allocation5 + $0xf30] sm:$0xff] }
 0x1fd   :  { %3401 = vmatpush1.bf16.xpose.msra.mxu1 %v3400_v16  ;;  %v420_v16 = vld [vmem:[#allocation5 + $0x770] sm:$0xff] }
 0x1fe   :  { %3403 = vmatprep.subr.bf16.mxu1 %v3402_v18  ;;  %v676_v18 = vld [vmem:[#allocation5 + $0xf70] sm:$0xff]  ;;  %v3168_v23 = vpack.c.bf16 %v420_v16, %v412_v15 }
 0x1ff   :  { %v3424_v24 = vpack.c.bf16 %v676_v18, %v668_v17 }
 0x203   :  { %3149 = vmatpush1.bf16.xpose.msra.mxu0 %v3148_v27  ;;  %v428_v27 = vld [vmem:[#allocation5 + $0x7b0] sm:$0xff] }
 0x204   :  { %3151 = vmatprep.subr.bf16.mxu0 %v3150_v29  ;;  %v684_v29 = vld [vmem:[#allocation5 + $0xfb0] sm:$0xff] }
 0x205   :  { %3405 = vmatpush1.bf16.xpose.msra.mxu1 %v3404_v28  ;;  %v436_v28 = vld [vmem:[#allocation5 + $0x7f0] sm:$0xff] }
 0x206   :  { %3407 = vmatprep.subr.bf16.mxu1 %v3406_v30  ;;  %v692_v30 = vld [vmem:[#allocation5 + $0xff0] sm:$0xff]  ;;  %v3172_v31 = vpack.c.bf16 %v436_v28, %v428_v27 }
 0x207   :  { %v3428_v32 = vpack.c.bf16 %v692_v30, %v684_v29 }
 0x20b   :  { %3153 = vmatpush1.bf16.xpose.msra.mxu0 %v3152_v39  ;;  %v84_v39 = vld [vmem:[#allocation2 + $0xf0] sm:$0xff] }
 0x20c   :  { %3155 = vmatprep.subr.bf16.mxu0 %v3154_v41  ;;  %v92_v41 = vld [vmem:[#allocation2 + $0x130] sm:$0xff] }
 0x20d   :  { %3409 = vmatpush1.bf16.xpose.msra.mxu1 %v3408_v40  ;;  %v93_v40 = vld [vmem:[#allocation2 + $0x138] sm:$0xff] }
 0x20e   :  { %3411 = vmatprep.subr.bf16.mxu1 %v3410_v42  ;;  %v101_v42 = vld [vmem:[#allocation2 + $0x178] sm:$0xff] }
 0x213   :  { %3157 = vmatpush1.bf16.xpose.msra.mxu0 %v3156_v51  ;;  %v132_v51 = vld [vmem:[#allocation2 + $0x270] sm:$0xff] }
 0x214   :  { %3159 = vmatprep.subr.bf16.mxu0 %v3158_v53  ;;  %v140_v53 = vld [vmem:[#allocation2 + $0x2b0] sm:$0xff] }
 0x215   :  { %3413 = vmatpush1.bf16.xpose.msra.mxu1 %v3412_v52  ;;  %v141_v52 = vld [vmem:[#allocation2 + $0x2b8] sm:$0xff] }
 0x216   :  { %3415 = vmatprep.subr.bf16.mxu1 %v3414_v54  ;;  %v149_v54 = vld [vmem:[#allocation2 + $0x2f8] sm:$0xff] }
 0x21b   :  { %3161 = vmatpush1.bf16.xpose.msra.mxu0 %v3160_v63  ;;  %v180_v63 = vld [vmem:[#allocation2 + $0x3f0] sm:$0xff] }
 0x21c   :  { %3163 = vmatprep.subr.bf16.mxu0 %v3162_v1 }
 0x21d   :  { %3417 = vmatpush1.bf16.xpose.msra.mxu1 %v3416_v0  ;;  %v696_v0 = vlaneseq }
 0x21e   :  { %3419 = vmatprep.subr.bf16.mxu1 %v3418_v2 }
 0x21f   :  { %v697_v1 = vshrl.u32 %v696_v0, 7 }
 0x221   :  { %v698_v2 = vsub.s32 0, %v697_v1  ;;  %v706_v4 = vsub.s32 2, %v697_v1  ;;  %v702_v5 = vsub.s32 1, %v697_v1  ;;  %v710_v6 = vsub.s32 3, %v697_v1 }
 0x223   :  { %3165 = vmatpush1.bf16.xpose.msra.mxu0 %v3164_v11  ;;  %v4243_v7 = vrot.slane %v694_v3, %v698_v2  ;;  %v4245_v8 = vrot.slane %v694_v3, %v706_v4  ;;  %v4247_v9 = vrot.slane %v694_v3, %v702_v5  ;;  %v4249_v10 = vrot.slane %v694_v3, %v710_v6 }
 0x224   :  { %3167 = vmatprep.subr.bf16.mxu0 %v3166_v13 }
 0x225   :  { %3421 = vmatpush1.bf16.xpose.msra.mxu1 %v3420_v12 }
 0x226   :  { %3423 = vmatprep.subr.bf16.mxu1 %v3422_v14 }
 0x22b   :  { %3169 = vmatpush1.bf16.xpose.msra.mxu0 %v3168_v23 }
 0x22c   :  { %3171 = vmatprep.subr.bf16.mxu0 %v3170_v25 }
 0x22d   :  { %3425 = vmatpush1.bf16.xpose.msra.mxu1 %v3424_v24 }
 0x22e   :  { %3427 = vmatprep.subr.bf16.mxu1 %v3426_v26 }
 0x233   :  { %3173 = vmatpush1.bf16.xpose.msra.mxu0 %v3172_v31 }
 0x235   :  { %3429 = vmatpush1.bf16.xpose.msra.mxu1 %v3428_v32 }
 0x23a   :  { %1264 = vmatmul.mubr.f32.vlgmr.msra.gmra.mrb[0].mxu0 %v60_v33 }
 0x23b   :  { %1269 = vmatprep.mubr.f32.mxu0 %v69_v34 }
 0x23c   :  { %1908 = vmatmul.mubr.f32.vlgmr.msra.gmra.mrb[0].mxu1 %v60_v33 }
 0x23d   :  { %1913 = vmatprep.mubr.f32.mxu1 %v69_v34 }
 0x23e   :  { %1270 = vmatmul.mubr.f32.gmra.mrb[2].mxu0 %v68_v35 }
 0x23f   :  { %1275 = vmatprep.mubr.f32.mxu0 %v77_v36 }
 0x240   :  { %1914 = vmatmul.mubr.f32.gmra.mrb[2].mxu1 %v68_v35 }
 0x241   :  { %1919 = vmatprep.mubr.f32.mxu1 %v77_v36 }
 0x242   :  { %1276 = vmatmul.mubr.f32.gmra.mrb[4].mxu0 %v76_v37 }
 0x243   :  { %1281 = vmatprep.mubr.f32.mxu0 %v85_v38 }
 0x244   :  { %1920 = vmatmul.mubr.f32.gmra.mrb[4].mxu1 %v76_v37 }
 0x245   :  { %1925 = vmatprep.mubr.f32.mxu1 %v85_v38 }
 0x246   :  { %1282 = vmatmul.mubr.f32.gmra.mrb[6].mxu0 %v84_v39 }
 0x247   :  { %1287 = vmatprep.mubr.f32.mxu0 %v93_v40 }
 0x248   :  { %1926 = vmatmul.mubr.f32.gmra.mrb[6].mxu1 %v84_v39 }
 0x249   :  { %1931 = vmatprep.mubr.f32.mxu1 %v93_v40 }
 0x24a   :  { %1288 = vmatmul.mubr.f32.gmra.mrb[8].mxu0 %v92_v41 }
 0x24b   :  { %1293 = vmatprep.mubr.f32.mxu0 %v101_v42 }
 0x24c   :  { %1932 = vmatmul.mubr.f32.gmra.mrb[8].mxu1 %v92_v41 }
 0x24d   :  { %1937 = vmatprep.mubr.f32.mxu1 %v101_v42 }
 0x24e   :  { %1294 = vmatmul.mubr.f32.gmra.mrb[10].mxu0 %v100_v43 }
 0x24f   :  { %1299 = vmatprep.mubr.f32.mxu0 %v109_v44 }
 0x250   :  { %1938 = vmatmul.mubr.f32.gmra.mrb[10].mxu1 %v100_v43 }
 0x251   :  { %1943 = vmatprep.mubr.f32.mxu1 %v109_v44 }
 0x252   :  { %1300 = vmatmul.mubr.f32.gmra.mrb[12].mxu0 %v108_v45 }
 0x253   :  { %1305 = vmatprep.mubr.f32.mxu0 %v117_v46 }
 0x254   :  { %1944 = vmatmul.mubr.f32.gmra.mrb[12].mxu1 %v108_v45 }
 0x255   :  { %1949 = vmatprep.mubr.f32.mxu1 %v117_v46 }
 0x256   :  { %1306 = vmatmul.mubr.f32.gmra.mrb[14].mxu0 %v116_v47 }
 0x257   :  { %1311 = vmatprep.mubr.f32.mxu0 %v125_v48 }
 0x258   :  { %1950 = vmatmul.mubr.f32.gmra.mrb[14].mxu1 %v116_v47 }
 0x259   :  { %1955 = vmatprep.mubr.f32.mxu1 %v125_v48 }
 0x25a   :  { %1312 = vmatmul.mubr.f32.gmra.mrb[16].mxu0 %v124_v49 }
 0x25b   :  { %1317 = vmatprep.mubr.f32.mxu0 %v133_v50 }
 0x25c   :  { %1956 = vmatmul.mubr.f32.gmra.mrb[16].mxu1 %v124_v49 }
 0x25d   :  { %1961 = vmatprep.mubr.f32.mxu1 %v133_v50 }
 0x25e   :  { %1318 = vmatmul.mubr.f32.gmra.mrb[18].mxu0 %v132_v51 }
 0x25f   :  { %1323 = vmatprep.mubr.f32.mxu0 %v141_v52 }
 0x260   :  { %1962 = vmatmul.mubr.f32.gmra.mrb[18].mxu1 %v132_v51 }
 0x261   :  { %1967 = vmatprep.mubr.f32.mxu1 %v141_v52 }
 0x262   :  { %1324 = vmatmul.mubr.f32.gmra.mrb[20].mxu0 %v140_v53 }
 0x263   :  { %1329 = vmatprep.mubr.f32.mxu0 %v149_v54 }
 0x264   :  { %1968 = vmatmul.mubr.f32.gmra.mrb[20].mxu1 %v140_v53 }
 0x265   :  { %1973 = vmatprep.mubr.f32.mxu1 %v149_v54 }
 0x266   :  { %1330 = vmatmul.mubr.f32.gmra.mrb[22].mxu0 %v148_v55 }
 0x267   :  { %1335 = vmatprep.mubr.f32.mxu0 %v157_v56 }
 0x268   :  { %1974 = vmatmul.mubr.f32.gmra.mrb[22].mxu1 %v148_v55 }
 0x269   :  { %1979 = vmatprep.mubr.f32.mxu1 %v157_v56 }
 0x26a   :  { %1336 = vmatmul.mubr.f32.gmra.mrb[24].mxu0 %v156_v57 }
 0x26b   :  { %1341 = vmatprep.mubr.f32.mxu0 %v165_v58 }
 0x26c   :  { %1980 = vmatmul.mubr.f32.gmra.mrb[24].mxu1 %v156_v57 }
 0x26d   :  { %1985 = vmatprep.mubr.f32.mxu1 %v165_v58 }
 0x26e   :  { %1342 = vmatmul.mubr.f32.gmra.mrb[26].mxu0 %v164_v59 }
 0x26f   :  { %1347 = vmatprep.mubr.f32.mxu0 %v173_v60 }
 0x270   :  { %1986 = vmatmul.mubr.f32.gmra.mrb[26].mxu1 %v164_v59 }
 0x271   :  { %1991 = vmatprep.mubr.f32.mxu1 %v173_v60 }
 0x272   :  { %1348 = vmatmul.mubr.f32.gmra.mrb[28].mxu0 %v172_v61 }
 0x273   :  { %1353 = vmatprep.mubr.f32.mxu0 %v181_v62 }
 0x274   :  { %1992 = vmatmul.mubr.f32.gmra.mrb[28].mxu1 %v172_v61 }
 0x275   :  { %1997 = vmatprep.mubr.f32.mxu1 %v181_v62 }
 0x276   :  { %1354 = vmatmul.mubr.f32.gmra.mrb[30].mxu0 %v180_v63 }
 0x278   :  { %1998 = vmatmul.mubr.f32.gmra.mrb[30].mxu1 %v180_v63 }
 0x30d   :  { %v1265_v11 = vpop.f32.mrb[0].mxu0 }
 0x30e   :  { %v3430_v12 = vadd.f32 %v1265_v11, %v4243_v7  ;;  %v1267_v14 = vpop.f32.mrb[1].mxu0 }
 0x30f   :  { %v1909_v13 = vpop.f32.mrb[0].mxu1  ;;  %v3431_v16 = vadd.f32 %v1267_v14, %v4247_v9 }
 0x310   :  { %v3462_v15 = vadd.f32 %v1909_v13, %v4245_v8  ;;  %v1911_v17 = vpop.f32.mrb[1].mxu1  ;;  %v2004_v18 = vmul.f32 0.5, %v3430_v12 }
 0x311   :  { %v3463_v19 = vadd.f32 %v1911_v17, %v4249_v10  ;;  %v4257_v21 = vmul.f32 0.5, %v3431_v16  ;;  %v1271_v22 = vpop.f32.mrb[2].mxu0 }
 0x312   :  { %v4255_v20 = vmul.f32 0.5, %v3462_v15  ;;  %3694 = vtanh.f32 %v2004_v18  ;;  %v3432_v24 = vadd.f32 %v1271_v22, %v4243_v7  ;;  %v1273_v26 = vpop.f32.mrb[3].mxu0 }
 0x313   :  { %v4259_v23 = vmul.f32 0.5, %v3463_v19  ;;  %v1915_v25 = vpop.f32.mrb[2].mxu1  ;;  %v3433_v28 = vadd.f32 %v1273_v26, %v4247_v9 }
 0x314   :  { %3696 = vtanh.f32 %v4255_v20  ;;  %v3464_v27 = vadd.f32 %v1915_v25, %v4245_v8  ;;  %v1917_v29 = vpop.f32.mrb[3].mxu1  ;;  %v4266_v30 = vmul.f32 0.5, %v3432_v24 }
 0x315   :  { %3698 = vtanh.f32 %v4257_v21  ;;  %v3465_v31 = vadd.f32 %v1917_v29, %v4249_v10  ;;  %v4272_v33 = vmul.f32 0.5, %v3433_v28  ;;  %v1277_v34 = vpop.f32.mrb[4].mxu0 }
 0x316   :  { %3700 = vtanh.f32 %v4259_v23  ;;  %v4270_v32 = vmul.f32 0.5, %v3464_v27  ;;  %v3434_v36 = vadd.f32 %v1277_v34, %v4243_v7  ;;  %v1279_v38 = vpop.f32.mrb[5].mxu0 }
 0x317   :  { %3702 = vtanh.f32 %v4266_v30  ;;  %v4275_v35 = vmul.f32 0.5, %v3465_v31  ;;  %v1921_v37 = vpop.f32.mrb[4].mxu1  ;;  %v3435_v40 = vadd.f32 %v1279_v38, %v4247_v9 }
 0x318   :  { %3704 = vtanh.f32 %v4270_v32  ;;  %v3466_v39 = vadd.f32 %v1921_v37, %v4245_v8  ;;  %v1923_v41 = vpop.f32.mrb[5].mxu1  ;;  %v4282_v42 = vmul.f32 0.5, %v3434_v36 }
 0x319   :  { %3706 = vtanh.f32 %v4272_v33  ;;  %v3467_v43 = vadd.f32 %v1923_v41, %v4249_v10  ;;  %v4288_v45 = vmul.f32 0.5, %v3435_v40  ;;  %v1283_v46 = vpop.f32.mrb[6].mxu0 }
 0x31a   :  { %3708 = vtanh.f32 %v4275_v35  ;;  %v4286_v44 = vmul.f32 0.5, %v3466_v39  ;;  %v3436_v48 = vadd.f32 %v1283_v46, %v4243_v7  ;;  %v1285_v50 = vpop.f32.mrb[7].mxu0 }
 0x31b   :  { %3710 = vtanh.f32 %v4282_v42  ;;  %v4291_v47 = vmul.f32 0.5, %v3467_v43  ;;  %v1927_v49 = vpop.f32.mrb[6].mxu1  ;;  %v3437_v52 = vadd.f32 %v1285_v50, %v4247_v9 }
 0x31c   :  { %3712 = vtanh.f32 %v4286_v44  ;;  %v3468_v51 = vadd.f32 %v1927_v49, %v4245_v8  ;;  %v4297_v53 = vpop.f32.mrb[7].mxu1  ;;  %v3695_v54 = vpop.eup %3694  ;;  %v4300_v55 = vmul.f32 0.5, %v3436_v48 }
 0x31d   :  { %3714 = vtanh.f32 %v4288_v45  ;;  %v2132_v57 = vadd.f32 1.0, %v3695_v54  ;;  %v4305_v59 = vmul.f32 0.5, %v3437_v52  ;;  %v1289_v60 = vpop.f32.mrb[8].mxu0 }
 0x31e   :  { %v3697_v56 = vpop.eup %3696  ;;  %3716 = vtanh.f32 %v4291_v47  ;;  %v4303_v58 = vmul.f32 0.5, %v3468_v51  ;;  %v1291_v0 = vpop.f32.mrb[9].mxu0  ;;  %v3438_v52 = vadd.f32 %v1289_v60, %v4243_v7 }
 0x31f   :  { %v3699_v61 = vpop.eup %3698  ;;  %v2134_v62 = vadd.f32 1.0, %v3697_v56  ;;  %3718 = vtanh.f32 %v4300_v55  ;;  %v1933_v63 = vpop.f32.mrb[8].mxu1  ;;  %v2196_v2 = vmul.f32 %v2132_v57, %v2004_v18 }
 0x320   :  { %v3701_v1 = vpop.eup %3700  ;;  %v2133_v3 = vadd.f32 1.0, %v3699_v61  ;;  %3720 = vtanh.f32 %v4303_v58  ;;  %v1935_v4 = vpop.f32.mrb[9].mxu1  ;;  %v3470_v57 = vadd.f32 %v1933_v63, %v4245_v8 }
 0x321   :  { %v3703_v5 = vpop.eup %3702  ;;  %v2198_v6 = vmul.f32 %v2134_v62, %v4255_v20  ;;  %v2135_v11 = vadd.f32 1.0, %v3701_v1  ;;  %3722 = vtanh.f32 %v4305_v59  ;;  %v1295_v15 = vpop.f32.mrb[10].mxu0  ;;  %v3471_v60 = vadd.f32 %v1935_v4, %v4249_v10 }
 0x322   :  { %v3705_v12 = vpop.eup %3704  ;;  %3724 = vtanh.f32 %v2196_v2  ;;  %v2197_v13 = vmul.f32 %v2133_v3, %v4257_v21  ;;  %v2136_v14 = vadd.f32 1.0, %v3703_v5  ;;  %v4313_v22 = vpop.f32.mrb[11].mxu0  ;;  %v3440_v63 = vadd.f32 %v1295_v15, %v4243_v7 }
 0x323   :  { %v3707_v16 = vpop.eup %3706  ;;  %3726 = vtanh.f32 %v2198_v6  ;;  %v2199_v17 = vmul.f32 %v2135_v11, %v4259_v23  ;;  %v2138_v18 = vadd.f32 1.0, %v3705_v12  ;;  %v1939_v19 = vpop.f32.mrb[10].mxu1  ;;  %v4351_v6 = vmul.f32 0.5, %v3438_v52 }
 0x324   :  { %v3709_v24 = vpop.eup %3708  ;;  %3728 = vtanh.f32 %v2197_v13  ;;  %v2200_v20 = vmul.f32 %v2136_v14, %v4266_v30  ;;  %v2137_v25 = vadd.f32 1.0, %v3707_v16  ;;  %v4316_v26 = vpop.f32.mrb[11].mxu1  ;;  %v3472_v11 = vadd.f32 %v1939_v19, %v4245_v8 }
 0x325   :  { %v3711_v27 = vpop.eup %3710  ;;  %3730 = vtanh.f32 %v2199_v17  ;;  %v2202_v21 = vmul.f32 %v2138_v18, %v4270_v32  ;;  %v2139_v28 = vadd.f32 1.0, %v3709_v24  ;;  %v4320_v34 = vpop.f32.mrb[12].mxu0  ;;  %v4356_v13 = vmul.f32 0.5, %v3470_v57 }
 0x326   :  { %v3713_v29 = vpop.eup %3712  ;;  %3732 = vtanh.f32 %v2200_v20  ;;  %v2201_v23 = vmul.f32 %v2137_v25, %v4272_v33  ;;  %v2140_v31 = vadd.f32 1.0, %v3711_v27  ;;  %v4325_v39 = vpop.f32.mrb[13].mxu0  ;;  %v4364_v20 = vmul.f32 0.5, %v3471_v60 }
 0x327   :  { %v3715_v36 = vpop.eup %3714  ;;  %3734 = vtanh.f32 %v2202_v21  ;;  %v2203_v37 = vmul.f32 %v2139_v28, %v4275_v35  ;;  %v2142_v30 = vadd.f32 1.0, %v3713_v29  ;;  %v4323_v38 = vpop.f32.mrb[12].mxu1  ;;  %v3469_v35 = vadd.f32 %v4297_v53, %v4249_v10 }
 0x328   :  { %v3717_v40 = vpop.eup %3716  ;;  %3736 = vtanh.f32 %v2201_v23  ;;  %v2204_v32 = vmul.f32 %v2140_v31, %v4282_v42  ;;  %v2141_v41 = vadd.f32 1.0, %v3715_v36  ;;  %v4328_v43 = vpop.f32.mrb[13].mxu1  ;;  %v4368_v28 = vmul.f32 0.5, %v3440_v63 }
 0x329   :  { %v3719_v33 = vpop.eup %3718  ;;  %3738 = vtanh.f32 %v2203_v37  ;;  %v2206_v46 = vmul.f32 %v2142_v30, %v4286_v44  ;;  %v2143_v48 = vadd.f32 1.0, %v3717_v40  ;;  %v4335_v54 = vpop.f32.mrb[14].mxu0  ;;  %v3439_v44 = vadd.f32 %v1291_v0, %v4247_v9 }
 0x32a   :  { %v3721_v49 = vpop.eup %3720  ;;  %3740 = vtanh.f32 %v2204_v32  ;;  %v2205_v50 = vmul.f32 %v2141_v41, %v4288_v45  ;;  %v2144_v51 = vadd.f32 1.0, %v3719_v33  ;;  %v4342_v53 = vpop.f32.mrb[15].mxu0  ;;  %v4370_v31 = vmul.f32 0.5, %v3472_v11 }
 0x32b   :  { %v3723_v42 = vpop.eup %3722  ;;  %3742 = vtanh.f32 %v2206_v46  ;;  %v2207_v56 = vmul.f32 %v2143_v48, %v4291_v47  ;;  %v4340_v61 = vpop.f32.mrb[14].mxu1  ;;  %v4348_v47 = vmul.f32 0.5, %v3469_v35  ;;  %v4358_v14 = vmul.f32 0.5, %v3439_v44 }
 0x32c   :  { %v3725_v62 = vpop.eup %3724  ;;  %3744 = vtanh.f32 %v2205_v50  ;;  %v2208_v45 = vmul.f32 %v2144_v51, %v4300_v55  ;;  %v4346_v1 = vpop.f32.mrb[15].mxu1  ;;  %v2146_v24 = vadd.f32 1.0, %v3721_v49  ;;  %v2145_v21 = vadd.f32 1.0, %v3723_v42 }
 0x32d   :  { %v3727_v2 = vpop.eup %3726  ;;  %v2388_v3 = vmul.f32 0.70710677, %v3725_v62  ;;  %3746 = vtanh.f32 %v2207_v56  ;;  %v4354_v12 = vpop.f32.mrb[16].mxu0  ;;  %v3441_v36 = vadd.f32 %v4313_v22, %v4247_v9  ;;  %v2324_v40 = vmul.f32 0.5, %v3725_v62 }
 0x32e   :  { %v3729_v0 = vpop.eup %3728  ;;  %v2390_v5 = vmul.f32 0.70710677, %v3727_v2  ;;  %3748 = vtanh.f32 %v2208_v45  ;;  %v4362_v17 = vpop.f32.mrb[17].mxu0  ;;  %v3473_v41 = vadd.f32 %v4316_v26, %v4249_v10  ;;  %v2326_v35 = vmul.f32 0.5, %v3727_v2 }
 0x32f   :  { %v3731_v55 = vpop.eup %3730  ;;  %3750 = verf.f32 %v2388_v3  ;;  %v2389_v4 = vmul.f32 0.70710677, %v3729_v0  ;;  %v4360_v16 = vpop.f32.mrb[16].mxu1  ;;  %v2210_v50 = vmul.f32 %v2146_v24, %v4303_v58  ;;  %v2325_v52 = vmul.f32 0.5, %v3729_v0 }
 0x330   :  { %v3733_v15 = vpop.eup %3732  ;;  %3752 = verf.f32 %v2390_v5  ;;  %v2391_v18 = vmul.f32 0.70710677, %v3731_v55  ;;  %v4366_v19 = vpop.f32.mrb[17].mxu1  ;;  %v2209_v56 = vmul.f32 %v2145_v21, %v4305_v59  ;;  %v2327_v26 = vmul.f32 0.5, %v3731_v55 }
 0x331   :  { %v3735_v25 = vpop.eup %3734  ;;  %3754 = verf.f32 %v2389_v4  ;;  %v2392_v27 = vmul.f32 0.70710677, %v3733_v15  ;;  %v4374_v37 = vpop.f32.mrb[18].mxu0  ;;  %v4386_v62 = vmul.f32 0.5, %v3441_v36  ;;  %v2328_v2 = vmul.f32 0.5, %v3733_v15 }
 0x332   :  { %v3737_v29 = vpop.eup %3736  ;;  %3756 = verf.f32 %v2391_v18  ;;  %v2394_v23 = vmul.f32 0.70710677, %v3735_v25  ;;  %v4380_v46 = vpop.f32.mrb[19].mxu0  ;;  %v4390_v3 = vmul.f32 0.5, %v3473_v41  ;;  %v2330_v59 = vmul.f32 0.5, %v3735_v25 }
 0x333   :  { %v3739_v30 = vpop.eup %3738  ;;  %3758 = verf.f32 %v2392_v27  ;;  %v2393_v32 = vmul.f32 0.70710677, %v3737_v29  ;;  %v4378_v33 = vpop.f32.mrb[18].mxu1  ;;  %v4398_v55 = vadd.f32 %v4320_v34, %v4243_v7  ;;  %v2329_v15 = vmul.f32 0.5, %v3737_v29 }
 0x334   :  { %v3741_v48 = vpop.eup %3740  ;;  %3760 = verf.f32 %v2394_v23  ;;  %v2395_v49 = vmul.f32 0.70710677, %v3739_v30  ;;  %v4383_v22 = vpop.f32.mrb[19].mxu1  ;;  %v4404_v27 = vadd.f32 %v4323_v38, %v4245_v8  ;;  %v2331_v36 = vmul.f32 0.5, %v3739_v30 }
 0x335   :  { %v3743_v51 = vpop.eup %3742  ;;  %3762 = verf.f32 %v2393_v32  ;;  %v2396_v42 = vmul.f32 0.70710677, %v3741_v48  ;;  %v4388_v45 = vpop.f32.mrb[20].mxu0  ;;  %v4406_v25 = vmul.f32 0.5, %v3741_v48 }
 0x336   :  { %v3745_v57 = vpop.eup %3744  ;;  %3764 = verf.f32 %v2395_v49  ;;  %v2398_v44 = vmul.f32 0.70710677, %v3743_v51  ;;  %v4394_v0 = vpop.f32.mrb[21].mxu0  ;;  %v4410_v49 = vmul.f32 0.5, %v3743_v51 }
 0x337   :  { %v3747_v60 = vpop.eup %3746  ;;  %3766 = verf.f32 %v2396_v42  ;;  %v2397_v58 = vmul.f32 0.70710677, %v3745_v57  ;;  %v4392_v63 = vpop.f32.mrb[20].mxu1  ;;  %v4412_v42 = vmul.f32 0.5, %v3745_v57 }
 0x338   :  { %v3749_v5 = vpop.eup %3748  ;;  %3768 = verf.f32 %v2398_v44  ;;  %v2399_v11 = vmul.f32 0.70710677, %v3747_v60  ;;  %v4400_v4 = vpop.f32.mrb[21].mxu1  ;;  %v4418_v30 = vmul.f32 0.5, %v3747_v60 }
 0x339   :  { %4783 = vst [vmem:[#allocation12_spill] sm:$0xff] %v4400_v4  ;;  %v3751_v18 = vpop.eup %3750  ;;  %3770 = verf.f32 %v2397_v58  ;;  %v2400_v24 = vmul.f32 0.70710677, %v3749_v5  ;;  %v4408_v32 = vpop.f32.mrb[22].mxu0  ;;  %v4422_v51 = vmul.f32 0.5, %v3749_v5 }
 0x33a   :  { %v3753_v21 = vpop.eup %3752  ;;  %v2516_v23 = vadd.f32 1.0, %v3751_v18  ;;  %3772 = verf.f32 %v2399_v11  ;;  %4784 = vst [vmem:[#allocation13_spill] sm:$0xff] %v4408_v32  ;;  %v4416_v44 = vpop.f32.mrb[23].mxu0 }
 0x33b   :  { %v3755_v34 = vpop.eup %3754  ;;  %v2518_v41 = vadd.f32 1.0, %v3753_v21  ;;  %3774 = verf.f32 %v2400_v24  ;;  %v4414_v29 = vpop.f32.mrb[22].mxu1  ;;  %4786 = vst [vmem:[#allocation15_spill] sm:$0xff] %v4416_v44 }
 0x33c   :  { %4785 = vst [vmem:[#allocation14_spill] sm:$0xff] %v4414_v29  ;;  %v3757_v38 = vpop.eup %3756  ;;  %v2580_v58 = vmul.f32 %v2516_v23, %v2324_v40  ;;  %v2517_v18 = vadd.f32 1.0, %v3755_v34  ;;  %3776 = vtanh.f32 %v2210_v50  ;;  %v4420_v48 = vpop.f32.mrb[23].mxu1 }
 0x33d   :  { %v3759_v11 = vpop.eup %3758  ;;  %v2582_v32 = vmul.f32 %v2518_v41, %v2326_v35  ;;  %v2519_v21 = vadd.f32 1.0, %v3757_v38  ;;  %3778 = vtanh.f32 %v2209_v56  ;;  %v4425_v44 = vpop.f32.mrb[24].mxu0 }
 0x33e   :  { %v3761_v57 = vpop.eup %3760  ;;  %v2854_v24 = vclamps-f32 %v2580_v58, 1.0  ;;  %v2581_v4 = vmul.f32 %v2517_v18, %v2325_v52  ;;  %v2520_v29 = vadd.f32 1.0, %v3759_v11  ;;  %3780 = vtanh.f32 %v4348_v47  ;;  %v4430_v35 = vpop.f32.mrb[25].mxu0 }
 0x33f   :  { %v3763_v40 = vpop.eup %3762  ;;  %v2856_v60 = vclamps-f32 %v2582_v32, 1.0  ;;  %v2583_v23 = vmul.f32 %v2519_v21, %v2327_v26  ;;  %v2522_v50 = vadd.f32 1.0, %v3761_v57  ;;  %3782 = vtanh.f32 %v4351_v6  ;;  %v4428_v34 = vpop.f32.mrb[24].mxu1  ;;  %4787 = vst [vmem:[#allocation16_spill] sm:$0xff] %v4430_v35 }
 0x340   :  { %v3765_v5 = vpop.eup %3764  ;;  %2772 = vst [vmem:[#allocation8] sm:$0xff] %v2854_v24  ;;  %v2855_v56 = vclamps-f32 %v2581_v4, 1.0  ;;  %v2584_v41 = vmul.f32 %v2520_v29, %v2328_v2  ;;  %v2521_v52 = vadd.f32 1.0, %v3763_v40  ;;  %3784 = vtanh.f32 %v4356_v13  ;;  %v4433_v38 = vpop.f32.mrb[25].mxu1 }
 0x341   :  { %v3767_v58 = vpop.eup %3766  ;;  %2774 = vst [vmem:[#allocation8 + $0x10] sm:$0xff] %v2856_v60  ;;  %v2857_v32 = vclamps-f32 %v2583_v23, 1.0  ;;  %v2586_v26 = vmul.f32 %v2522_v50, %v2330_v59  ;;  %v2523_v18 = vadd.f32 1.0, %v3765_v5  ;;  %3786 = vtanh.f32 %v4358_v14  ;;  %v4437_v2 = vpop.f32.mrb[26].mxu0 }
 0x342   :  { %v3769_v11 = vpop.eup %3768  ;;  %2773 = vst [vmem:[#allocation8 + $0x8] sm:$0xff] %v2855_v56  ;;  %v2858_v21 = vclamps-f32 %v2584_v41, 1.0  ;;  %v2585_v57 = vmul.f32 %v2521_v52, %v2329_v15  ;;  %v2524_v35 = vadd.f32 1.0, %v3767_v58  ;;  %3788 = vtanh.f32 %v4364_v20  ;;  %v4442_v60 = vpop.f32.mrb[27].mxu0 }
 0x343   :  { %v3771_v4 = vpop.eup %3770  ;;  %2775 = vst [vmem:[#allocation8 + $0x18] sm:$0xff] %v2857_v32  ;;  %v2860_v29 = vclamps-f32 %v2586_v26, 1.0  ;;  %v2587_v24 = vmul.f32 %v2523_v18, %v2331_v36  ;;  %v2526_v40 = vadd.f32 1.0, %v3769_v11  ;;  %3790 = vtanh.f32 %v4368_v28  ;;  %v4440_v59 = vpop.f32.mrb[26].mxu1 }
 0x344   :  { %v3773_v23 = vpop.eup %3772  ;;  %2776 = vst [vmem:[#allocation8 + $0x20] sm:$0xff] %v2858_v21  ;;  %v2859_v50 = vclamps-f32 %v2585_v57, 1.0  ;;  %v2588_v15 = vmul.f32 %v2524_v35, %v4406_v25  ;;  %v2525_v5 = vadd.f32 1.0, %v3771_v4  ;;  %3792 = vtanh.f32 %v4370_v31  ;;  %v4446_v56 = vpop.f32.mrb[27].mxu1 }
 0x345   :  { %v3775_v41 = vpop.eup %3774  ;;  %2778 = vst [vmem:[#allocation8 + $0x30] sm:$0xff] %v2860_v29  ;;  %v2861_v36 = vclamps-f32 %v2587_v24, 1.0  ;;  %v2590_v52 = vmul.f32 %v2526_v40, %v4410_v49  ;;  %v2527_v58 = vadd.f32 1.0, %v3773_v23  ;;  %3794 = vtanh.f32 %v4386_v62  ;;  %v4454_v35 = vpop.f32.mrb[28].mxu0 }
 0x346   :  { %v4450_v32 = vpop.eup %3776  ;;  %2777 = vst [vmem:[#allocation8 + $0x28] sm:$0xff] %v2859_v50  ;;  %v2862_v26 = vclamps-f32 %v2588_v15, 1.0  ;;  %v2589_v18 = vmul.f32 %v2525_v5, %v4412_v42  ;;  %v2528_v25 = vadd.f32 1.0, %v3775_v41  ;;  %3796 = vtanh.f32 %v4390_v3  ;;  %v4465_v24 = vpop.f32.mrb[29].mxu0 }
 0x347   :  { %v4456_v11 = vpop.eup %3778  ;;  %2779 = vst [vmem:[#allocation8 + $0x38] sm:$0xff] %v2861_v36  ;;  %v2864_v21 = vclamps-f32 %v2590_v52, 1.0  ;;  %v2591_v49 = vmul.f32 %v2527_v58, %v4418_v30  ;;  %v2402_v57 = vmul.f32 0.70710677, %v4450_v32  ;;  %v4461_v4 = vmul.f32 0.5, %v4398_v55  ;;  %v4463_v29 = vpop.f32.mrb[28].mxu1 }
 0x348   :  { %v3781_v42 = vpop.eup %3780  ;;  %2780 = vst [vmem:[#allocation8 + $0x40] sm:$0xff] %v2862_v26  ;;  %v2863_v40 = vclamps-f32 %v2589_v18, 1.0  ;;  %v2592_v23 = vmul.f32 %v2528_v25, %v4422_v51  ;;  %v2401_v50 = vmul.f32 0.70710677, %v4456_v11  ;;  %v4470_v15 = vmul.f32 0.5, %v4404_v27  ;;  %v4472_v30 = vpop.f32.mrb[29].mxu1 }
 0x349   :  { %v3783_v5 = vpop.eup %3782  ;;  %2782 = vst [vmem:[#allocation8 + $0x50] sm:$0xff] %v2864_v21  ;;  %v2865_v55 = vclamps-f32 %v2591_v49, 1.0  ;;  %3798 = verf.f32 %v2402_v57  ;;  %v2147_v41 = vadd.f32 1.0, %v3781_v42  ;;  %v4474_v26 = vpop.f32.mrb[30].mxu0 }
 0x34a   :  { %v3785_v36 = vpop.eup %3784  ;;  %2781 = vst [vmem:[#allocation8 + $0x48] sm:$0xff] %v2863_v40  ;;  %v2866_v52 = vclamps-f32 %v2592_v23, 1.0  ;;  %3800 = verf.f32 %v2401_v50  ;;  %v2148_v58 = vadd.f32 1.0, %v3783_v5  ;;  %v4480_v21 = vpop.f32.mrb[31].mxu0 }
 0x34b   :  { %v3787_v51 = vpop.eup %3786  ;;  %2783 = vst [vmem:[#allocation8 + $0x58] sm:$0xff] %v2865_v55  ;;  %v2211_v18 = vmul.f32 %v2147_v41, %v4348_v47  ;;  %v2150_v27 = vadd.f32 1.0, %v3785_v36  ;;  %3802 = vtanh.f32 %v4461_v4  ;;  %v4478_v25 = vpop.f32.mrb[30].mxu1  ;;  %v3443_v36 = vadd.f32 %v4325_v39, %v4247_v9 }
 0x34c   :  { %v3789_v49 = vpop.eup %3788  ;;  %2784 = vst [vmem:[#allocation8 + $0x60] sm:$0xff] %v2866_v52  ;;  %v2212_v57 = vmul.f32 %v2148_v58, %v4351_v6  ;;  %v2149_v42 = vadd.f32 1.0, %v3787_v51  ;;  %3804 = vtanh.f32 %v4470_v15  ;;  %v4484_v40 = vpop.f32.mrb[31].mxu1  ;;  %v3475_v51 = vadd.f32 %v4328_v43, %v4249_v10 }
 0x34d   :  { %v3791_v23 = vpop.eup %3790  ;;  %3806 = vtanh.f32 %v2211_v18  ;;  %v2214_v47 = vmul.f32 %v2150_v27, %v4356_v13  ;;  %v2151_v50 = vadd.f32 1.0, %v3789_v49 }
 0x34e   :  { %v3793_v5 = vpop.eup %3792  ;;  %3808 = vtanh.f32 %v2212_v57  ;;  %v2213_v55 = vmul.f32 %v2149_v42, %v4358_v14  ;;  %v2152_v41 = vadd.f32 1.0, %v3791_v23  ;;  %v4496_v57 = vmul.f32 0.5, %v3443_v36 }
 0x34f   :  { %v3795_v52 = vpop.eup %3794  ;;  %3810 = vtanh.f32 %v2214_v47  ;;  %v2215_v6 = vmul.f32 %v2151_v50, %v4364_v20  ;;  %v2154_v58 = vadd.f32 1.0, %v3793_v5  ;;  %v4499_v23 = vmul.f32 0.5, %v3475_v51 }
 0x350   :  { %v3797_v18 = vpop.eup %3796  ;;  %3812 = vtanh.f32 %v2213_v55  ;;  %v2216_v13 = vmul.f32 %v2152_v41, %v4368_v28  ;;  %v2153_v27 = vadd.f32 1.0, %v3795_v52  ;;  %v2338_v47 = vmul.f32 0.5, %v4450_v32 }
 0x351   :  { %3814 = vtanh.f32 %v2215_v6  ;;  %v2218_v14 = vmul.f32 %v2154_v58, %v4370_v31  ;;  %v2155_v49 = vadd.f32 1.0, %v3797_v18  ;;  %v2337_v31 = vmul.f32 0.5, %v4456_v11 }
 0x352   :  { %3816 = vtanh.f32 %v2216_v13  ;;  %v2217_v39 = vmul.f32 %v2153_v27, %v4386_v62  ;;  %v3476_v27 = vadd.f32 %v4340_v61, %v4245_v8 }
 0x353   :  { %v3799_v42 = vpop.eup %3798  ;;  %3818 = vtanh.f32 %v2218_v14  ;;  %v2219_v20 = vmul.f32 %v2155_v49, %v4390_v3  ;;  %v3444_v3 = vadd.f32 %v4335_v54, %v4243_v7  ;;  %v3445_v14 = vadd.f32 %v4342_v53, %v4247_v9 }
 0x354   :  { %v3801_v43 = vpop.eup %3800  ;;  %v2530_v28 = vadd.f32 1.0, %v3799_v42  ;;  %3820 = vtanh.f32 %v2217_v39  ;;  %v3446_v53 = vadd.f32 %v4354_v12, %v4243_v7 }
 0x355   :  { %v3803_v50 = vpop.eup %3802  ;;  %v2529_v5 = vadd.f32 1.0, %v3801_v43  ;;  %3822 = vtanh.f32 %v2219_v20  ;;  %v4511_v42 = vmul.f32 0.5, %v3444_v3 }
 0x356   :  { %v3805_v55 = vpop.eup %3804  ;;  %v2594_v62 = vmul.f32 %v2530_v28, %v2338_v47  ;;  %3824 = vtanh.f32 %v4496_v57  ;;  %v2156_v39 = vadd.f32 1.0, %v3803_v50  ;;  %v3477_v28 = vadd.f32 %v4346_v1, %v4249_v10 }
 0x357   :  { %v3807_v41 = vpop.eup %3806  ;;  %v2593_v36 = vmul.f32 %v2529_v5, %v2337_v31  ;;  %3826 = vtanh.f32 %v4499_v23  ;;  %v2158_v47 = vadd.f32 1.0, %v3805_v55  ;;  %v3478_v5 = vadd.f32 %v4360_v16, %v4245_v8 }
 0x358   :  { %v3809_v52 = vpop.eup %3808  ;;  %v2868_v32 = vclamps-f32 %v2594_v62, 1.0  ;;  %v2403_v6 = vmul.f32 0.70710677, %v3807_v41  ;;  %v3447_v55 = vadd.f32 %v4362_v17, %v4247_v9 }
 0x359   :  { %v3811_v58 = vpop.eup %3810  ;;  %v2867_v51 = vclamps-f32 %v2593_v36, 1.0  ;;  %v2404_v18 = vmul.f32 0.70710677, %v3809_v52  ;;  %v4519_v36 = vmul.f32 0.5, %v3476_v27  ;;  %v2222_v16 = vmul.f32 %v2158_v47, %v4470_v15 }
 0x35a   :  { %v3813_v11 = vpop.eup %3812  ;;  %2786 = vst [vmem:[#allocation8 + $0x70] sm:$0xff] %v2868_v32  ;;  %3828 = verf.f32 %v2403_v6  ;;  %v2406_v13 = vmul.f32 0.70710677, %v3811_v58  ;;  %v2220_v32 = vmul.f32 %v2156_v39, %v4461_v4  ;;  %v4524_v6 = vmul.f32 0.5, %v3445_v14 }
 0x35b   :  { %v3815_v49 = vpop.eup %3814  ;;  %2785 = vst [vmem:[#allocation8 + $0x68] sm:$0xff] %v2867_v51  ;;  %3830 = verf.f32 %v2404_v18  ;;  %v2405_v54 = vmul.f32 0.70710677, %v3813_v11  ;;  %v4527_v18 = vmul.f32 0.5, %v3477_v28  ;;  %v4531_v17 = vmul.f32 0.5, %v3478_v5 }
 0x35c   :  { %v3817_v20 = vpop.eup %3816  ;;  %3832 = verf.f32 %v2406_v13  ;;  %v2407_v43 = vmul.f32 0.70710677, %v3815_v49  ;;  %v4537_v4 = vadd.f32 %v4366_v19, %v4249_v10  ;;  %v2339_v14 = vmul.f32 0.5, %v3807_v41 }
 0x35d   :  { %v3819_v31 = vpop.eup %3818  ;;  %3834 = verf.f32 %v2405_v54  ;;  %v2408_v61 = vmul.f32 0.70710677, %v3817_v20  ;;  %v4529_v54 = vmul.f32 0.5, %v3446_v53  ;;  %v4542_v39 = vadd.f32 %v4374_v37, %v4243_v7 }
 0x35e   :  { %v3821_v62 = vpop.eup %3820  ;;  %3836 = verf.f32 %v2407_v43  ;;  %v2410_v50 = vmul.f32 0.70710677, %v3819_v31  ;;  %v2340_v28 = vmul.f32 0.5, %v3809_v52  ;;  %v2342_v53 = vmul.f32 0.5, %v3811_v58 }
 0x35f   :  { %v3823_v3 = vpop.eup %3822  ;;  %3838 = verf.f32 %v2408_v61  ;;  %v2409_v1 = vmul.f32 0.70710677, %v3821_v62  ;;  %v4533_v61 = vmul.f32 0.5, %v3447_v55 }
 0x360   :  { %v3825_v51 = vpop.eup %3824  ;;  %3840 = verf.f32 %v2410_v50  ;;  %v2411_v12 = vmul.f32 0.70710677, %v3823_v3 }
 0x361   :  { %v3827_v13 = vpop.eup %3826  ;;  %3842 = verf.f32 %v2409_v1  ;;  %v2157_v27 = vadd.f32 1.0, %v3825_v51  ;;  %v2341_v1 = vmul.f32 0.5, %v3813_v11  ;;  %v2343_v51 = vmul.f32 0.5, %v3815_v49 }
 0x362   :  { %3844 = verf.f32 %v2411_v12  ;;  %v2159_v43 = vadd.f32 1.0, %v3827_v13  ;;  %v2346_v12 = vmul.f32 0.5, %v3819_v31 }
 0x363   :  { %3846 = vtanh.f32 %v2220_v32  ;;  %v2221_v15 = vmul.f32 %v2157_v27, %v4496_v57  ;;  %v2344_v32 = vmul.f32 0.5, %v3817_v20  ;;  %v2345_v27 = vmul.f32 0.5, %v3821_v62 }
 0x364   :  { %v3829_v47 = vpop.eup %3828  ;;  %3848 = vtanh.f32 %v2222_v16  ;;  %v2223_v5 = vmul.f32 %v2159_v43, %v4499_v23  ;;  %v2347_v23 = vmul.f32 0.5, %v3823_v3 }
 0x365   :  { %v3831_v50 = vpop.eup %3830  ;;  %v2531_v55 = vadd.f32 1.0, %v3829_v47  ;;  %3850 = vtanh.f32 %v2221_v15 }
 0x366   :  { %v3833_v19 = vpop.eup %3832  ;;  %v2532_v41 = vadd.f32 1.0, %v3831_v50  ;;  %3852 = vtanh.f32 %v2223_v5 }
 0x367   :  { %v3835_v57 = vpop.eup %3834  ;;  %v2595_v13 = vmul.f32 %v2531_v55, %v2339_v14  ;;  %v2534_v37 = vadd.f32 1.0, %v3833_v19  ;;  %3854 = vtanh.f32 %v4511_v42 }
 0x368   :  { %v3837_v52 = vpop.eup %3836  ;;  %v2596_v58 = vmul.f32 %v2532_v41, %v2340_v28  ;;  %v2533_v16 = vadd.f32 1.0, %v3835_v57  ;;  %3856 = vtanh.f32 %v4519_v36 }
 0x369   :  { %v3839_v11 = vpop.eup %3838  ;;  %v2869_v49 = vclamps-f32 %v2595_v13, 1.0  ;;  %v2598_v43 = vmul.f32 %v2534_v37, %v2342_v53  ;;  %v2535_v15 = vadd.f32 1.0, %v3837_v52  ;;  %3858 = vtanh.f32 %v4524_v6 }
 0x36a   :  { %v3841_v20 = vpop.eup %3840  ;;  %v2870_v31 = vclamps-f32 %v2596_v58, 1.0  ;;  %v2597_v47 = vmul.f32 %v2533_v16, %v2341_v1  ;;  %v2536_v14 = vadd.f32 1.0, %v3839_v11  ;;  %3860 = vtanh.f32 %v4527_v18 }
 0x36b   :  { %v3843_v62 = vpop.eup %3842  ;;  %2787 = vst [vmem:[#allocation8 + $0x78] sm:$0xff] %v2869_v49  ;;  %v2872_v5 = vclamps-f32 %v2598_v43, 1.0  ;;  %v2599_v28 = vmul.f32 %v2535_v15, %v2343_v51  ;;  %v2538_v50 = vadd.f32 1.0, %v3841_v20  ;;  %3862 = vtanh.f32 %v4529_v54 }
 0x36c   :  { %v3845_v3 = vpop.eup %3844  ;;  %2788 = vst [vmem:[#allocation8 + $0x80] sm:$0xff] %v2870_v31  ;;  %v2871_v55 = vclamps-f32 %v2597_v47, 1.0  ;;  %v2600_v53 = vmul.f32 %v2536_v14, %v2344_v32  ;;  %v2537_v19 = vadd.f32 1.0, %v3843_v62  ;;  %3864 = vtanh.f32 %v4531_v17 }
 0x36d   :  { %v4551_v41 = vpop.eup %3846  ;;  %2790 = vst [vmem:[#allocation8 + $0x90] sm:$0xff] %v2872_v5  ;;  %v2873_v1 = vclamps-f32 %v2599_v28, 1.0  ;;  %v2602_v57 = vmul.f32 %v2538_v50, %v2346_v12  ;;  %v2539_v13 = vadd.f32 1.0, %v3845_v3  ;;  %3866 = vtanh.f32 %v4533_v61 }
 0x36e   :  { %v4554_v37 = vpop.eup %3848  ;;  %2789 = vst [vmem:[#allocation8 + $0x88] sm:$0xff] %v2871_v55  ;;  %v2874_v51 = vclamps-f32 %v2600_v53, 1.0  ;;  %v2601_v52 = vmul.f32 %v2537_v19, %v2345_v27  ;;  %v2412_v58 = vmul.f32 0.70710677, %v4551_v41  ;;  %v4564_v20 = vmul.f32 0.5, %v4537_v4 }
 0x36f   :  { %v4557_v16 = vpop.eup %3850  ;;  %2791 = vst [vmem:[#allocation8 + $0x98] sm:$0xff] %v2873_v1  ;;  %v2876_v32 = vclamps-f32 %v2602_v57, 1.0  ;;  %v2603_v11 = vmul.f32 %v2539_v13, %v2347_v23  ;;  %v2414_v49 = vmul.f32 0.70710677, %v4554_v37  ;;  %v4568_v23 = vmul.f32 0.5, %v4542_v39 }
 0x370   :  { %v4560_v43 = vpop.eup %3852  ;;  %2792 = vst [vmem:[#allocation8 + $0xa0] sm:$0xff] %v2874_v51  ;;  %v2875_v12 = vclamps-f32 %v2601_v52, 1.0  ;;  %3868 = verf.f32 %v2412_v58  ;;  %v2413_v15 = vmul.f32 0.70710677, %v4557_v16  ;;  %v3480_v39 = vadd.f32 %v4378_v33, %v4245_v8 }
 0x371   :  { %v3855_v27 = vpop.eup %3854  ;;  %2794 = vst [vmem:[#allocation8 + $0xb0] sm:$0xff] %v2876_v32  ;;  %v2877_v31 = vclamps-f32 %v2603_v11, 1.0  ;;  %3870 = verf.f32 %v2414_v49  ;;  %v2415_v47 = vmul.f32 0.70710677, %v4560_v43  ;;  %v3450_v11 = vadd.f32 %v4388_v45, %v4243_v7 }
 0x372   :  { %v3857_v14 = vpop.eup %3856  ;;  %2793 = vst [vmem:[#allocation8 + $0xa8] sm:$0xff] %v2875_v12  ;;  %3872 = verf.f32 %v2413_v15  ;;  %v2160_v62 = vadd.f32 1.0, %v3855_v27  ;;  %v4586_v49 = vmul.f32 0.5, %v3480_v39  ;;  %v2350_v45 = vmul.f32 0.5, %v4554_v37 }
 0x373   :  { %v3859_v5 = vpop.eup %3858  ;;  %2795 = vst [vmem:[#allocation8 + $0xb8] sm:$0xff] %v2877_v31  ;;  %3874 = verf.f32 %v2415_v47  ;;  %v2162_v28 = vadd.f32 1.0, %v3857_v14 }
 0x374   :  { %v3861_v50 = vpop.eup %3860  ;;  %v2224_v4 = vmul.f32 %v2160_v62, %v4511_v42  ;;  %v2161_v3 = vadd.f32 1.0, %v3859_v5  ;;  %3876 = vtanh.f32 %v4564_v20  ;;  %v3449_v42 = vadd.f32 %v4380_v46, %v4247_v9 }
 0x375   :  { %v3863_v55 = vpop.eup %3862  ;;  %v2226_v53 = vmul.f32 %v2162_v28, %v4519_v36  ;;  %v2163_v19 = vadd.f32 1.0, %v3861_v50  ;;  %3878 = vtanh.f32 %v4568_v23  ;;  %v3481_v36 = vadd.f32 %v4383_v22, %v4249_v10 }
 0x376   :  { %v3865_v1 = vpop.eup %3864  ;;  %3880 = vtanh.f32 %v2224_v4  ;;  %v2225_v57 = vmul.f32 %v2161_v3, %v4524_v6  ;;  %v2164_v13 = vadd.f32 1.0, %v3863_v55  ;;  %v4589_v12 = vmul.f32 0.5, %v3449_v42 }
 0x377   :  { %v3867_v51 = vpop.eup %3866  ;;  %3882 = vtanh.f32 %v2226_v53  ;;  %v2227_v52 = vmul.f32 %v2163_v19, %v4527_v18  ;;  %v2166_v58 = vadd.f32 1.0, %v3865_v1  ;;  %v2348_v22 = vmul.f32 0.5, %v4551_v41 }
 0x378   :  { %3884 = vtanh.f32 %v2225_v57  ;;  %v2228_v32 = vmul.f32 %v2164_v13, %v4529_v54  ;;  %v2165_v33 = vadd.f32 1.0, %v3867_v51  ;;  %v4592_v54 = vmul.f32 0.5, %v3481_v36 }
 0x379   :  { %3886 = vtanh.f32 %v2227_v52  ;;  %v2230_v6 = vmul.f32 %v2166_v58, %v4531_v17  ;;  %v4595_v17 = vmul.f32 0.5, %v3450_v11  ;;  %v2351_v50 = vmul.f32 0.5, %v4560_v43 }
 0x37a   :  { %v3869_v46 = vpop.eup %3868  ;;  %3888 = vtanh.f32 %v2228_v32  ;;  %v2229_v18 = vmul.f32 %v2165_v33, %v4533_v61  ;;  %v2349_v61 = vmul.f32 0.5, %v4557_v16 }
 0x37b   :  { %v3871_v15 = vpop.eup %3870  ;;  %v2540_v27 = vadd.f32 1.0, %v3869_v46  ;;  %3890 = vtanh.f32 %v2230_v6 }
 0x37c   :  { %v3873_v31 = vpop.eup %3872  ;;  %v2542_v47 = vadd.f32 1.0, %v3871_v15  ;;  %3892 = vtanh.f32 %v2229_v18 }
 0x37d   :  { %v3875_v14 = vpop.eup %3874  ;;  %v2604_v62 = vmul.f32 %v2540_v27, %v2348_v22  ;;  %v2541_v5 = vadd.f32 1.0, %v3873_v31  ;;  %3894 = vtanh.f32 %v4586_v49  ;;  %v3482_v22 = vadd.f32 %v4392_v63, %v4245_v8 }
 0x37e   :  { %v3877_v28 = vpop.eup %3876  ;;  %v2606_v41 = vmul.f32 %v2542_v47, %v2350_v45  ;;  %v2543_v4 = vadd.f32 1.0, %v3875_v14  ;;  %3896 = vtanh.f32 %v4589_v12  ;;  %v3451_v47 = vadd.f32 %v4394_v0, %v4247_v9 }
 0x37f   :  { %v3879_v3 = vpop.eup %3878  ;;  %v2878_v37 = vclamps-f32 %v2604_v62, 1.0  ;;  %v2605_v55 = vmul.f32 %v2541_v5, %v2349_v61  ;;  %3898 = vtanh.f32 %v4592_v54  ;;  %v2167_v51 = vadd.f32 1.0, %v3877_v28  ;;  %v4788_v61 = vld [vmem:[#allocation12_spill] sm:$0xff]  ;;  %v4789_v28 = vld [vmem:[#allocation13_spill] sm:$0xff] }
 0x380   :  { %v3881_v53 = vpop.eup %3880  ;;  %v2880_v19 = vclamps-f32 %v2606_v41, 1.0  ;;  %v2607_v39 = vmul.f32 %v2543_v4, %v2351_v50  ;;  %3900 = vtanh.f32 %v4595_v17  ;;  %v2168_v36 = vadd.f32 1.0, %v3879_v3  ;;  %v4790_v50 = vld [vmem:[#allocation14_spill] sm:$0xff] }
 0x381   :  { %v3883_v16 = vpop.eup %3882  ;;  %2796 = vst [vmem:[#allocation8 + $0xc0] sm:$0xff] %v2878_v37  ;;  %v2879_v1 = vclamps-f32 %v2605_v55, 1.0  ;;  %v2416_v57 = vmul.f32 0.70710677, %v3881_v53  ;;  %v2231_v15 = vmul.f32 %v2167_v51, %v4564_v20  ;;  %v3483_v5 = vadd.f32 %v4788_v61, %v4249_v10 }
 0x382   :  { %v3885_v13 = vpop.eup %3884  ;;  %2798 = vst [vmem:[#allocation8 + $0xd0] sm:$0xff] %v2880_v19  ;;  %v2881_v43 = vclamps-f32 %v2607_v39, 1.0  ;;  %v2418_v42 = vmul.f32 0.70710677, %v3883_v16  ;;  %v2232_v45 = vmul.f32 %v2168_v36, %v4568_v23  ;;  %v3452_v20 = vadd.f32 %v4789_v28, %v4243_v7 }
 0x383   :  { %v3887_v52 = vpop.eup %3886  ;;  %2797 = vst [vmem:[#allocation8 + $0xc8] sm:$0xff] %v2879_v1  ;;  %3902 = verf.f32 %v2416_v57  ;;  %v2417_v58 = vmul.f32 0.70710677, %v3885_v13  ;;  %v3484_v4 = vadd.f32 %v4790_v50, %v4245_v8  ;;  %v4616_v37 = vmul.f32 0.5, %v3482_v22 }
 0x384   :  { %v3889_v32 = vpop.eup %3888  ;;  %2799 = vst [vmem:[#allocation8 + $0xd8] sm:$0xff] %v2881_v43  ;;  %3904 = verf.f32 %v2418_v42  ;;  %v2419_v33 = vmul.f32 0.70710677, %v3887_v52  ;;  %v4619_v39 = vmul.f32 0.5, %v3451_v47  ;;  %v4622_v57 = vmul.f32 0.5, %v3483_v5 }
 0x385   :  { %v3891_v11 = vpop.eup %3890  ;;  %3906 = verf.f32 %v2417_v58  ;;  %v2420_v6 = vmul.f32 0.70710677, %v3889_v32  ;;  %v4624_v43 = vmul.f32 0.5, %v3452_v20  ;;  %v2352_v51 = vmul.f32 0.5, %v3881_v53 }
 0x386   :  { %v3893_v46 = vpop.eup %3892  ;;  %3908 = verf.f32 %v2419_v33  ;;  %v2422_v18 = vmul.f32 0.70710677, %v3891_v11  ;;  %v4627_v58 = vmul.f32 0.5, %v3484_v4  ;;  %v2355_v22 = vmul.f32 0.5, %v3887_v52 }
 0x387   :  { %v3895_v27 = vpop.eup %3894  ;;  %3910 = verf.f32 %v2420_v6  ;;  %v2421_v31 = vmul.f32 0.70710677, %v3893_v46  ;;  %v2353_v6 = vmul.f32 0.5, %v3885_v13  ;;  %v2358_v47 = vmul.f32 0.5, %v3891_v11 }
 0x388   :  { %v3897_v14 = vpop.eup %3896  ;;  %3912 = verf.f32 %v2422_v18  ;;  %v2170_v62 = vadd.f32 1.0, %v3895_v27 }
 0x389   :  { %v3899_v41 = vpop.eup %3898  ;;  %3914 = verf.f32 %v2421_v31  ;;  %v2169_v63 = vadd.f32 1.0, %v3897_v14 }
 0x38a   :  { %v3901_v3 = vpop.eup %3900  ;;  %3916 = vtanh.f32 %v2231_v15  ;;  %v2234_v23 = vmul.f32 %v2170_v62, %v4586_v49  ;;  %v2171_v0 = vadd.f32 1.0, %v3899_v41  ;;  %v2357_v62 = vmul.f32 0.5, %v3893_v46 }
 0x38b   :  { %3918 = vtanh.f32 %v2232_v45  ;;  %v2233_v55 = vmul.f32 %v2169_v63, %v4589_v12  ;;  %v2172_v19 = vadd.f32 1.0, %v3901_v3  ;;  %v2354_v12 = vmul.f32 0.5, %v3883_v16 }
 0x38c   :  { %3920 = vtanh.f32 %v2234_v23  ;;  %v2235_v1 = vmul.f32 %v2171_v0, %v4592_v54  ;;  %v2356_v54 = vmul.f32 0.5, %v3889_v32  ;;  %v4791_v0 = vld [vmem:[#allocation15_spill] sm:$0xff] }
 0x38d   :  { %v3903_v42 = vpop.eup %3902  ;;  %3922 = vtanh.f32 %v2233_v55  ;;  %v2236_v49 = vmul.f32 %v2172_v19, %v4595_v17  ;;  %v3453_v55 = vadd.f32 %v4791_v0, %v4247_v9 }
 0x38e   :  { %v3905_v36 = vpop.eup %3904  ;;  %v2544_v33 = vadd.f32 1.0, %v3903_v42  ;;  %3924 = vtanh.f32 %v2235_v1 }
 0x38f   :  { %v3907_v18 = vpop.eup %3906  ;;  %v2546_v15 = vadd.f32 1.0, %v3905_v36  ;;  %3926 = vtanh.f32 %v2236_v49  ;;  %v3485_v49 = vadd.f32 %v4420_v48, %v4249_v10 }
 0x390   :  { %v3909_v27 = vpop.eup %3908  ;;  %v2608_v31 = vmul.f32 %v2544_v33, %v2352_v51  ;;  %v2545_v45 = vadd.f32 1.0, %v3907_v18  ;;  %3928 = vtanh.f32 %v4616_v37 }
 0x391   :  { %v3911_v53 = vpop.eup %3910  ;;  %v2610_v17 = vmul.f32 %v2546_v15, %v2354_v12  ;;  %v2547_v14 = vadd.f32 1.0, %v3909_v27  ;;  %3930 = vtanh.f32 %v4619_v39  ;;  %v4647_v27 = vmul.f32 0.5, %v3453_v55 }
 0x392   :  { %v3913_v16 = vpop.eup %3912  ;;  %v2882_v13 = vclamps-f32 %v2608_v31, 1.0  ;;  %v2609_v61 = vmul.f32 %v2545_v45, %v2353_v6  ;;  %v2548_v5 = vadd.f32 1.0, %v3911_v53  ;;  %3932 = vtanh.f32 %v4622_v57 }
 0x393   :  { %v3915_v52 = vpop.eup %3914  ;;  %v2884_v32 = vclamps-f32 %v2610_v17, 1.0  ;;  %v2611_v28 = vmul.f32 %v2547_v14, %v2355_v22  ;;  %v2550_v20 = vadd.f32 1.0, %v3913_v16  ;;  %3934 = vtanh.f32 %v4624_v43 }
 0x394   :  { %v4633_v11 = vpop.eup %3916  ;;  %2800 = vst [vmem:[#allocation8 + $0xe0] sm:$0xff] %v2882_v13  ;;  %v2883_v41 = vclamps-f32 %v2609_v61, 1.0  ;;  %v2612_v63 = vmul.f32 %v2548_v5, %v2356_v54  ;;  %v2549_v46 = vadd.f32 1.0, %v3915_v52  ;;  %3936 = vtanh.f32 %v4627_v58 }
 0x395   :  { %v4636_v50 = vpop.eup %3918  ;;  %2802 = vst [vmem:[#allocation8 + $0xf0] sm:$0xff] %v2884_v32  ;;  %v2885_v4 = vclamps-f32 %v2611_v28, 1.0  ;;  %v2614_v3 = vmul.f32 %v2550_v20, %v2358_v47  ;;  %v2423_v23 = vmul.f32 0.70710677, %v4633_v11  ;;  %v4649_v45 = vmul.f32 0.5, %v3485_v49 }
 0x396   :  { %v4641_v19 = vpop.eup %3920  ;;  %2801 = vst [vmem:[#allocation8 + $0xe8] sm:$0xff] %v2883_v41  ;;  %v2886_v1 = vclamps-f32 %v2612_v63, 1.0  ;;  %v2613_v42 = vmul.f32 %v2549_v46, %v2357_v62  ;;  %v2424_v51 = vmul.f32 0.70710677, %v4636_v50  ;;  %v3454_v47 = vadd.f32 %v4425_v44, %v4243_v7  ;;  %v4792_v62 = vld [vmem:[#allocation16_spill] sm:$0xff] }
 0x397   :  { %v3923_v36 = vpop.eup %3922  ;;  %2803 = vst [vmem:[#allocation8 + $0xf8] sm:$0xff] %v2885_v4  ;;  %v2888_v33 = vclamps-f32 %v2614_v3, 1.0  ;;  %3938 = verf.f32 %v2423_v23  ;;  %v2426_v12 = vmul.f32 0.70710677, %v4641_v19  ;;  %v3486_v14 = vadd.f32 %v4428_v34, %v4245_v8 }
 0x398   :  { %v3925_v6 = vpop.eup %3924  ;;  %2804 = vst [vmem:[#allocation8 + $0x100] sm:$0xff] %v2886_v1  ;;  %v2887_v18 = vclamps-f32 %v2613_v42, 1.0  ;;  %3940 = verf.f32 %v2424_v51  ;;  %v2425_v15 = vmul.f32 0.70710677, %v3923_v36  ;;  %v3455_v16 = vadd.f32 %v4792_v62, %v4247_v9 }
 0x399   :  { %v3927_v22 = vpop.eup %3926  ;;  %2806 = vst [vmem:[#allocation8 + $0x110] sm:$0xff] %v2888_v33  ;;  %3942 = verf.f32 %v2426_v12  ;;  %v2427_v54 = vmul.f32 0.70710677, %v3925_v6  ;;  %v3487_v5 = vadd.f32 %v4433_v38, %v4249_v10  ;;  %v3456_v52 = vadd.f32 %v4437_v2, %v4243_v7 }
 0x39a   :  { %v3929_v31 = vpop.eup %3928  ;;  %2805 = vst [vmem:[#allocation8 + $0x108] sm:$0xff] %v2887_v18  ;;  %3944 = verf.f32 %v2425_v15  ;;  %v2428_v48 = vmul.f32 0.70710677, %v3927_v22  ;;  %v3488_v34 = vadd.f32 %v4440_v59, %v4245_v8  ;;  %v4667_v46 = vmul.f32 0.5, %v3454_v47 }
 0x39b   :  { %v3931_v53 = vpop.eup %3930  ;;  %3946 = verf.f32 %v2427_v54  ;;  %v2174_v17 = vadd.f32 1.0, %v3929_v31  ;;  %v4670_v4 = vmul.f32 0.5, %v3486_v14  ;;  %v4673_v3 = vmul.f32 0.5, %v3455_v16 }
 0x39c   :  { %v3933_v13 = vpop.eup %3932  ;;  %3948 = verf.f32 %v2428_v48  ;;  %v2173_v61 = vadd.f32 1.0, %v3931_v53  ;;  %v4675_v59 = vmul.f32 0.5, %v3487_v5  ;;  %v4678_v0 = vmul.f32 0.5, %v3456_v52 }
 0x39d   :  { %v3935_v32 = vpop.eup %3934  ;;  %v2238_v44 = vmul.f32 %v2174_v17, %v4616_v37  ;;  %v2175_v28 = vadd.f32 1.0, %v3933_v13  ;;  %3950 = vtanh.f32 %v4647_v27  ;;  %v4680_v55 = vmul.f32 0.5, %v3488_v34 }
 0x39e   :  { %v3937_v20 = vpop.eup %3936  ;;  %v2237_v41 = vmul.f32 %v2173_v61, %v4619_v39  ;;  %v2176_v63 = vadd.f32 1.0, %v3935_v32  ;;  %3952 = vtanh.f32 %v4649_v45  ;;  %v2360_v51 = vmul.f32 0.5, %v4636_v50 }
 0x39f   :  { %3954 = vtanh.f32 %v2238_v44  ;;  %v2239_v38 = vmul.f32 %v2175_v28, %v4622_v57  ;;  %v2178_v2 = vadd.f32 1.0, %v3937_v20  ;;  %v2359_v57 = vmul.f32 0.5, %v4633_v11 }
 0x3a0   :  { %3956 = vtanh.f32 %v2237_v41  ;;  %v2240_v37 = vmul.f32 %v2176_v63, %v4624_v43  ;;  %v2362_v33 = vmul.f32 0.5, %v4641_v19  ;;  %v2361_v12 = vmul.f32 0.5, %v3923_v36 }
 0x3a1   :  { %v3939_v23 = vpop.eup %3938  ;;  %3958 = vtanh.f32 %v2239_v38  ;;  %v2242_v39 = vmul.f32 %v2178_v2, %v4627_v58  ;;  %v2363_v54 = vmul.f32 0.5, %v3925_v6  ;;  %v2364_v11 = vmul.f32 0.5, %v3927_v22 }
 0x3a2   :  { %v3941_v1 = vpop.eup %3940  ;;  %v2551_v42 = vadd.f32 1.0, %v3939_v23  ;;  %3960 = vtanh.f32 %v2240_v37 }
 0x3a3   :  { %v3943_v43 = vpop.eup %3942  ;;  %v2552_v49 = vadd.f32 1.0, %v3941_v1  ;;  %3962 = vtanh.f32 %v2242_v39 }
 0x3a4   :  { %v3945_v18 = vpop.eup %3944  ;;  %v2615_v15 = vmul.f32 %v2551_v42, %v2359_v57  ;;  %v2554_v58 = vadd.f32 1.0, %v3943_v43  ;;  %3964 = vtanh.f32 %v4667_v46 }
 0x3a5   :  { %v3947_v31 = vpop.eup %3946  ;;  %v2616_v48 = vmul.f32 %v2552_v49, %v2360_v51  ;;  %v2553_v47 = vadd.f32 1.0, %v3945_v18  ;;  %3966 = vtanh.f32 %v4670_v4 }
 0x3a6   :  { %v3949_v50 = vpop.eup %3948  ;;  %v2889_v53 = vclamps-f32 %v2615_v15, 1.0  ;;  %v2618_v17 = vmul.f32 %v2554_v58, %v2362_v33  ;;  %v2555_v14 = vadd.f32 1.0, %v3947_v31  ;;  %3968 = vtanh.f32 %v4673_v3 }
 0x3a7   :  { %v3951_v19 = vpop.eup %3950  ;;  %v2890_v36 = vclamps-f32 %v2616_v48, 1.0  ;;  %v2617_v62 = vmul.f32 %v2553_v47, %v2361_v12  ;;  %v2556_v16 = vadd.f32 1.0, %v3949_v50  ;;  %3970 = vtanh.f32 %v4675_v59 }
 0x3a8   :  { %v3953_v6 = vpop.eup %3952  ;;  %2807 = vst [vmem:[#allocation8 + $0x118] sm:$0xff] %v2889_v53  ;;  %v2892_v13 = vclamps-f32 %v2618_v17, 1.0  ;;  %v2619_v61 = vmul.f32 %v2555_v14, %v2363_v54  ;;  %3972 = vtanh.f32 %v4678_v0  ;;  %v2177_v32 = vadd.f32 1.0, %v3951_v19 }
 0x3a9   :  { %v3955_v22 = vpop.eup %3954  ;;  %2808 = vst [vmem:[#allocation8 + $0x120] sm:$0xff] %v2890_v36  ;;  %v2891_v5 = vclamps-f32 %v2617_v62, 1.0  ;;  %v2620_v52 = vmul.f32 %v2556_v16, %v2364_v11  ;;  %3974 = vtanh.f32 %v4680_v55  ;;  %v2179_v20 = vadd.f32 1.0, %v3953_v6 }
 0x3aa   :  { %v3957_v44 = vpop.eup %3956  ;;  %2810 = vst [vmem:[#allocation8 + $0x130] sm:$0xff] %v2892_v13  ;;  %v2893_v28 = vclamps-f32 %v2619_v61, 1.0  ;;  %v2430_v34 = vmul.f32 0.70710677, %v3955_v22  ;;  %v2241_v1 = vmul.f32 %v2177_v32, %v4647_v27  ;;  %v3457_v54 = vadd.f32 %v4442_v60, %v4247_v9 }
 0x3ab   :  { %v3959_v41 = vpop.eup %3958  ;;  %2809 = vst [vmem:[#allocation8 + $0x128] sm:$0xff] %v2891_v5  ;;  %v2894_v63 = vclamps-f32 %v2620_v52, 1.0  ;;  %v2429_v38 = vmul.f32 0.70710677, %v3957_v44  ;;  %v2243_v51 = vmul.f32 %v2179_v20, %v4649_v45  ;;  %v3489_v45 = vadd.f32 %v4446_v56, %v4249_v10 }
 0x3ac   :  { %v3961_v2 = vpop.eup %3960  ;;  %2811 = vst [vmem:[#allocation8 + $0x138] sm:$0xff] %v2893_v28  ;;  %3976 = verf.f32 %v2430_v34  ;;  %v2431_v37 = vmul.f32 0.70710677, %v3959_v41  ;;  %v2366_v36 = vmul.f32 0.5, %v3955_v22  ;;  %v2367_v13 = vmul.f32 0.5, %v3959_v41 }
 0x3ad   :  { %v3963_v23 = vpop.eup %3962  ;;  %2812 = vst [vmem:[#allocation8 + $0x140] sm:$0xff] %v2894_v63  ;;  %3978 = verf.f32 %v2429_v38  ;;  %v2432_v39 = vmul.f32 0.70710677, %v3961_v2  ;;  %v4707_v19 = vmul.f32 0.5, %v3489_v45  ;;  %v2368_v52 = vmul.f32 0.5, %v3961_v2 }
 0x3ae   :  { %v3965_v57 = vpop.eup %3964  ;;  %3980 = verf.f32 %v2431_v37  ;;  %v2434_v42 = vmul.f32 0.70710677, %v3963_v23  ;;  %v2370_v34 = vmul.f32 0.5, %v3963_v23  ;;  %v3490_v23 = vadd.f32 %v4463_v29, %v4245_v8 }
 0x3af   :  { %v3967_v43 = vpop.eup %3966  ;;  %3982 = verf.f32 %v2432_v39  ;;  %v2180_v49 = vadd.f32 1.0, %v3965_v57 }
 0x3b0   :  { %v3969_v33 = vpop.eup %3968  ;;  %3984 = verf.f32 %v2434_v42  ;;  %v2182_v12 = vadd.f32 1.0, %v3967_v43 }
 0x3b1   :  { %v3971_v18 = vpop.eup %3970  ;;  %3986 = vtanh.f32 %v2241_v1  ;;  %v2244_v15 = vmul.f32 %v2180_v49, %v4667_v46  ;;  %v2181_v58 = vadd.f32 1.0, %v3969_v33  ;;  %v3458_v46 = vadd.f32 %v4454_v35, %v4243_v7 }
 0x3b2   :  { %v3973_v27 = vpop.eup %3972  ;;  %3988 = vtanh.f32 %v2243_v51  ;;  %v2246_v31 = vmul.f32 %v2182_v12, %v4670_v4  ;;  %v2183_v48 = vadd.f32 1.0, %v3971_v18  ;;  %v4704_v4 = vmul.f32 0.5, %v3457_v54 }
 0x3b3   :  { %v3975_v47 = vpop.eup %3974  ;;  %3990 = vtanh.f32 %v2244_v15  ;;  %v2245_v11 = vmul.f32 %v2181_v58, %v4673_v3  ;;  %v2184_v50 = vadd.f32 1.0, %v3973_v27  ;;  %v4709_v35 = vmul.f32 0.5, %v3458_v46 }
 0x3b4   :  { %3992 = vtanh.f32 %v2246_v31  ;;  %v2247_v53 = vmul.f32 %v2183_v48, %v4675_v59  ;;  %v2186_v60 = vadd.f32 1.0, %v3975_v47  ;;  %v2365_v59 = vmul.f32 0.5, %v3957_v44 }
 0x3b5   :  { %3994 = vtanh.f32 %v2245_v11  ;;  %v2248_v17 = vmul.f32 %v2184_v50, %v4678_v0  ;;  %v3459_v33 = vadd.f32 %v4465_v24, %v4247_v9  ;;  %v4721_v31 = vmul.f32 0.5, %v3490_v23 }
 0x3b6   :  { %v3977_v14 = vpop.eup %3976  ;;  %3996 = vtanh.f32 %v2247_v53  ;;  %v2250_v56 = vmul.f32 %v2186_v60, %v4680_v55  ;;  %v3491_v48 = vadd.f32 %v4472_v30, %v4249_v10  ;;  %v3460_v11 = vadd.f32 %v4474_v26, %v4243_v7 }
 0x3b7   :  { %v3979_v3 = vpop.eup %3978  ;;  %v2558_v62 = vadd.f32 1.0, %v3977_v14  ;;  %3998 = vtanh.f32 %v2248_v17  ;;  %v4727_v47 = vmul.f32 0.5, %v3459_v33  ;;  %v3492_v53 = vadd.f32 %v4478_v25, %v4245_v8 }
 0x3b8   :  { %v3981_v16 = vpop.eup %3980  ;;  %v2557_v6 = vadd.f32 1.0, %v3979_v3  ;;  %4000 = vtanh.f32 %v2250_v56  ;;  %v3461_v60 = vadd.f32 %v4480_v21, %v4247_v9  ;;  %v3493_v14 = vadd.f32 %v4484_v40, %v4249_v10 }
 0x3b9   :  { %v3983_v0 = vpop.eup %3982  ;;  %v2622_v61 = vmul.f32 %v2558_v62, %v2366_v36  ;;  %v2559_v5 = vadd.f32 1.0, %v3981_v16  ;;  %4002 = vtanh.f32 %v4704_v4  ;;  %v4738_v7 = vmul.f32 0.5, %v3491_v48 }
 0x3ba   :  { %v3985_v55 = vpop.eup %3984  ;;  %v2621_v32 = vmul.f32 %v2557_v6, %v2365_v59  ;;  %v2560_v28 = vadd.f32 1.0, %v3983_v0  ;;  %4004 = vtanh.f32 %v4707_v19  ;;  %v4742_v8 = vmul.f32 0.5, %v3460_v11 }
 0x3bb   :  { %v3987_v22 = vpop.eup %3986  ;;  %v2896_v20 = vclamps-f32 %v2622_v61, 1.0  ;;  %v2623_v63 = vmul.f32 %v2559_v5, %v2367_v13  ;;  %v2562_v38 = vadd.f32 1.0, %v3985_v55  ;;  %4006 = vtanh.f32 %v4709_v35 }
 0x3bc   :  { %v4714_v44 = vpop.eup %3988  ;;  %v2895_v41 = vclamps-f32 %v2621_v32, 1.0  ;;  %v2624_v37 = vmul.f32 %v2560_v28, %v2368_v52  ;;  %v2433_v39 = vmul.f32 0.70710677, %v3987_v22  ;;  %v4746_v25 = vmul.f32 0.5, %v3492_v53 }
 0x3bd   :  { %v3991_v2 = vpop.eup %3990  ;;  %2814 = vst [vmem:[#allocation8 + $0x150] sm:$0xff] %v2896_v20  ;;  %v2897_v1 = vclamps-f32 %v2623_v63, 1.0  ;;  %v2626_v57 = vmul.f32 %v2562_v38, %v2370_v34  ;;  %v2435_v42 = vmul.f32 0.70710677, %v4714_v44  ;;  %v4748_v21 = vmul.f32 0.5, %v3461_v60 }
 0x3be   :  { %v3993_v51 = vpop.eup %3992  ;;  %2813 = vst [vmem:[#allocation8 + $0x148] sm:$0xff] %v2895_v41  ;;  %v2898_v43 = vclamps-f32 %v2624_v37, 1.0  ;;  %4008 = verf.f32 %v2433_v39  ;;  %v2436_v49 = vmul.f32 0.70710677, %v3991_v2  ;;  %v2369_v40 = vmul.f32 0.5, %v3987_v22 }
 0x3bf   :  { %v3995_v12 = vpop.eup %3994  ;;  %2815 = vst [vmem:[#allocation8 + $0x158] sm:$0xff] %v2897_v1  ;;  %v2900_v18 = vclamps-f32 %v2626_v57, 1.0  ;;  %4010 = verf.f32 %v2435_v42  ;;  %v2438_v15 = vmul.f32 0.70710677, %v3993_v51  ;;  %v4751_v16 = vmul.f32 0.5, %v3493_v14 }
 0x3c0   :  { %v3997_v58 = vpop.eup %3996  ;;  %2816 = vst [vmem:[#allocation8 + $0x160] sm:$0xff] %v2898_v43  ;;  %4012 = verf.f32 %v2436_v49  ;;  %v2437_v54 = vmul.f32 0.70710677, %v3995_v12  ;;  %v2371_v6 = vmul.f32 0.5, %v4714_v44  ;;  %v2372_v13 = vmul.f32 0.5, %v3991_v2 }
 0x3c1   :  { %v3999_v27 = vpop.eup %3998  ;;  %2818 = vst [vmem:[#allocation8 + $0x170] sm:$0xff] %v2900_v18  ;;  %4014 = verf.f32 %v2438_v15  ;;  %v2439_v29 = vmul.f32 0.70710677, %v3997_v58  ;;  %v2374_v61 = vmul.f32 0.5, %v3993_v51  ;;  %v2373_v5 = vmul.f32 0.5, %v3995_v12 }
 0x3c2   :  { %v4725_v45 = vpop.eup %4000  ;;  %4016 = verf.f32 %v2437_v54  ;;  %v2440_v24 = vmul.f32 0.70710677, %v3999_v27  ;;  %v2375_v28 = vmul.f32 0.5, %v3997_v58  ;;  %v2376_v20 = vmul.f32 0.5, %v3999_v27 }
 0x3c3   :  { %v4003_v50 = vpop.eup %4002  ;;  %4018 = verf.f32 %v2439_v29  ;;  %v2442_v46 = vmul.f32 0.70710677, %v4725_v45  ;;  %v2378_v12 = vmul.f32 0.5, %v4725_v45 }
 0x3c4   :  { %v4005_v30 = vpop.eup %4004  ;;  %4020 = verf.f32 %v2440_v24  ;;  %v2185_v17 = vadd.f32 1.0, %v4003_v50 }
 0x3c5   :  { %v4007_v56 = vpop.eup %4006  ;;  %4022 = verf.f32 %v2442_v46  ;;  %v2187_v3 = vadd.f32 1.0, %v4005_v30 }
 0x3c6   :  { %v2249_v26 = vmul.f32 %v2185_v17, %v4704_v4  ;;  %v2188_v36 = vadd.f32 1.0, %v4007_v56  ;;  %4024 = vtanh.f32 %v4721_v31 }
 0x3c7   :  { %v2251_v9 = vmul.f32 %v2187_v3, %v4707_v19  ;;  %4026 = vtanh.f32 %v4727_v47 }
 0x3c8   :  { %v4009_v10 = vpop.eup %4008  ;;  %4028 = vtanh.f32 %v2249_v26  ;;  %v2252_v62 = vmul.f32 %v2188_v36, %v4709_v35 }
 0x3c9   :  { %v4011_v4 = vpop.eup %4010  ;;  %v2561_v59 = vadd.f32 1.0, %v4009_v10  ;;  %4030 = vtanh.f32 %v2251_v9 }
 0x3ca   :  { %v4013_v19 = vpop.eup %4012  ;;  %v2563_v0 = vadd.f32 1.0, %v4011_v4  ;;  %4032 = vtanh.f32 %v2252_v62 }
 0x3cb   :  { %v4015_v52 = vpop.eup %4014  ;;  %v2625_v55 = vmul.f32 %v2561_v59, %v2369_v40  ;;  %v2564_v32 = vadd.f32 1.0, %v4013_v19  ;;  %4034 = vtanh.f32 %v4738_v7 }
 0x3cc   :  { %v4017_v35 = vpop.eup %4016  ;;  %v2627_v34 = vmul.f32 %v2563_v0, %v2371_v6  ;;  %v2566_v22 = vadd.f32 1.0, %v4015_v52  ;;  %4036 = vtanh.f32 %v4742_v8 }
 0x3cd   :  { %v4019_v63 = vpop.eup %4018  ;;  %v2899_v38 = vclamps-f32 %v2625_v55, 1.0  ;;  %v2628_v44 = vmul.f32 %v2564_v32, %v2372_v13  ;;  %v2565_v41 = vadd.f32 1.0, %v4017_v35  ;;  %4038 = vtanh.f32 %v4746_v25 }
 0x3ce   :  { %v4021_v37 = vpop.eup %4020  ;;  %v2901_v39 = vclamps-f32 %v2627_v34, 1.0  ;;  %v2630_v2 = vmul.f32 %v2566_v22, %v2374_v61  ;;  %v2567_v1 = vadd.f32 1.0, %v4019_v63  ;;  %4040 = vtanh.f32 %v4748_v21 }
 0x3cf   :  { %v4023_v57 = vpop.eup %4022  ;;  %2817 = vst [vmem:[#allocation8 + $0x168] sm:$0xff] %v2899_v38  ;;  %v2902_v42 = vclamps-f32 %v2628_v44, 1.0  ;;  %v2629_v23 = vmul.f32 %v2565_v41, %v2373_v5  ;;  %v2568_v51 = vadd.f32 1.0, %v4021_v37  ;;  %4042 = vtanh.f32 %v4751_v16 }
 0x3d0   :  { %v4025_v43 = vpop.eup %4024  ;;  %2819 = vst [vmem:[#allocation8 + $0x178] sm:$0xff] %v2901_v39  ;;  %v2904_v49 = vclamps-f32 %v2630_v2, 1.0  ;;  %v2631_v33 = vmul.f32 %v2567_v1, %v2375_v28  ;;  %v2570_v18 = vadd.f32 1.0, %v4023_v57 }
 0x3d1   :  { %v4027_v15 = vpop.eup %4026  ;;  %2820 = vst [vmem:[#allocation8 + $0x180] sm:$0xff] %v2902_v42  ;;  %v2903_v58 = vclamps-f32 %v2629_v23, 1.0  ;;  %v2632_v54 = vmul.f32 %v2568_v51, %v2376_v20  ;;  %v2190_v27 = vadd.f32 1.0, %v4025_v43 }
 0x3d2   :  { %v4029_v29 = vpop.eup %4028  ;;  %2822 = vst [vmem:[#allocation8 + $0x190] sm:$0xff] %v2904_v49  ;;  %v2905_v48 = vclamps-f32 %v2631_v33, 1.0  ;;  %v2634_v24 = vmul.f32 %v2570_v18, %v2378_v12  ;;  %v2189_v11 = vadd.f32 1.0, %v4027_v15 }
 0x3d3   :  { %v4031_v50 = vpop.eup %4030  ;;  %2821 = vst [vmem:[#allocation8 + $0x188] sm:$0xff] %v2903_v58  ;;  %v2906_v46 = vclamps-f32 %v2632_v54, 1.0  ;;  %v2441_v53 = vmul.f32 0.70710677, %v4029_v29  ;;  %v2254_v45 = vmul.f32 %v2190_v27, %v4721_v31  ;;  %v2377_v5 = vmul.f32 0.5, %v4029_v29 }
 0x3d4   :  { %v4033_v60 = vpop.eup %4032  ;;  %2823 = vst [vmem:[#allocation8 + $0x198] sm:$0xff] %v2905_v48  ;;  %v2908_v30 = vclamps-f32 %v2634_v24, 1.0  ;;  %v2443_v17 = vmul.f32 0.70710677, %v4031_v50  ;;  %v2253_v3 = vmul.f32 %v2189_v11, %v4727_v47  ;;  %v2379_v32 = vmul.f32 0.5, %v4031_v50 }
 0x3d5   :  { %v4035_v14 = vpop.eup %4034  ;;  %2824 = vst [vmem:[#allocation8 + $0x1a0] sm:$0xff] %v2906_v46  ;;  %4044 = verf.f32 %v2441_v53  ;;  %v2444_v56 = vmul.f32 0.70710677, %v4033_v60  ;;  %v2380_v34 = vmul.f32 0.5, %v4033_v60 }
 0x3d6   :  { %v4037_v26 = vpop.eup %4036  ;;  %2826 = vst [vmem:[#allocation8 + $0x1b0] sm:$0xff] %v2908_v30  ;;  %4046 = verf.f32 %v2443_v17  ;;  %v2191_v36 = vadd.f32 1.0, %v4035_v14 }
 0x3d7   :  { %v4039_v9 = vpop.eup %4038  ;;  %4048 = verf.f32 %v2444_v56  ;;  %v2192_v10 = vadd.f32 1.0, %v4037_v26 }
 0x3d8   :  { %v4041_v40 = vpop.eup %4040  ;;  %4050 = vtanh.f32 %v2254_v45  ;;  %v2255_v62 = vmul.f32 %v2191_v36, %v4738_v7  ;;  %v2194_v4 = vadd.f32 1.0, %v4039_v9 }
 0x3d9   :  { %v4043_v59 = vpop.eup %4042  ;;  %4052 = vtanh.f32 %v2253_v3  ;;  %v2256_v31 = vmul.f32 %v2192_v10, %v4742_v8  ;;  %v2193_v6 = vadd.f32 1.0, %v4041_v40 }
 0x3da   :  { %4054 = vtanh.f32 %v2255_v62  ;;  %v2258_v47 = vmul.f32 %v2194_v4, %v4746_v25  ;;  %v2195_v13 = vadd.f32 1.0, %v4043_v59 }
 0x3db   :  { %4056 = vtanh.f32 %v2256_v31  ;;  %v2257_v19 = vmul.f32 %v2193_v6, %v4748_v21 }
 0x3dc   :  { %4058 = vtanh.f32 %v2258_v47  ;;  %v2259_v0 = vmul.f32 %v2195_v13, %v4751_v16 }
 0x3dd   :  { %4060 = vtanh.f32 %v2257_v19 }
 0x3de   :  { %4062 = vtanh.f32 %v2259_v0 }
 0x3df   :  { %v4045_v61 = vpop.eup %4044 }
 0x3e0   :  { %v4047_v7 = vpop.eup %4046  ;;  %v2569_v52 = vadd.f32 1.0, %v4045_v61 }
 0x3e1   :  { %v4049_v55 = vpop.eup %4048  ;;  %v2571_v8 = vadd.f32 1.0, %v4047_v7 }
 0x3e2   :  { %v4051_v28 = vpop.eup %4050  ;;  %v2633_v35 = vmul.f32 %v2569_v52, %v2377_v5  ;;  %v2572_v25 = vadd.f32 1.0, %v4049_v55 }
 0x3e3   :  { %v4053_v22 = vpop.eup %4052  ;;  %v2635_v20 = vmul.f32 %v2571_v8, %v2379_v32  ;;  %v2446_v63 = vmul.f32 0.70710677, %v4051_v28  ;;  %v2382_v18 = vmul.f32 0.5, %v4051_v28 }
 0x3e4   :  { %v4055_v21 = vpop.eup %4054  ;;  %v2907_v38 = vclamps-f32 %v2633_v35, 1.0  ;;  %v2636_v44 = vmul.f32 %v2572_v25, %v2380_v34  ;;  %v2445_v16 = vmul.f32 0.70710677, %v4053_v22  ;;  %v2381_v54 = vmul.f32 0.5, %v4053_v22 }
 0x3e5   :  { %v4057_v41 = vpop.eup %4056  ;;  %v2909_v37 = vclamps-f32 %v2635_v20, 1.0  ;;  %4064 = verf.f32 %v2446_v63  ;;  %v2447_v39 = vmul.f32 0.70710677, %v4055_v21  ;;  %v2383_v24 = vmul.f32 0.5, %v4055_v21 }
 0x3e6   :  { %v4059_v2 = vpop.eup %4058  ;;  %2825 = vst [vmem:[#allocation8 + $0x1a8] sm:$0xff] %v2907_v38  ;;  %v2910_v1 = vclamps-f32 %v2636_v44, 1.0  ;;  %4066 = verf.f32 %v2445_v16  ;;  %v2448_v57 = vmul.f32 0.70710677, %v4057_v41  ;;  %v2384_v53 = vmul.f32 0.5, %v4057_v41 }
 0x3e7   :  { %v4061_v42 = vpop.eup %4060  ;;  %2827 = vst [vmem:[#allocation8 + $0x1b8] sm:$0xff] %v2909_v37  ;;  %4068 = verf.f32 %v2447_v39  ;;  %v2450_v23 = vmul.f32 0.70710677, %v4059_v2  ;;  %v2386_v14 = vmul.f32 0.5, %v4059_v2 }
 0x3e8   :  { %v4063_v51 = vpop.eup %4062  ;;  %2828 = vst [vmem:[#allocation8 + $0x1c0] sm:$0xff] %v2910_v1  ;;  %4070 = verf.f32 %v2448_v57  ;;  %v2449_v43 = vmul.f32 0.70710677, %v4061_v42  ;;  %v2385_v9 = vmul.f32 0.5, %v4061_v42 }
 0x3e9   :  { %4072 = verf.f32 %v2450_v23  ;;  %v2451_v49 = vmul.f32 0.70710677, %v4063_v51  ;;  %v2387_v4 = vmul.f32 0.5, %v4063_v51 }
 0x3ea   :  { %4074 = verf.f32 %v2449_v43 }
 0x3eb   :  { %4076 = verf.f32 %v2451_v49 }
 0x3ef   :  { %v4065_v33 = vpop.eup %4064 }
 0x3f0   :  { %v4067_v12 = vpop.eup %4066  ;;  %v2574_v15 = vadd.f32 1.0, %v4065_v33 }
 0x3f1   :  { %v4069_v58 = vpop.eup %4068  ;;  %v2573_v27 = vadd.f32 1.0, %v4067_v12 }
 0x3f2   :  { %v4071_v29 = vpop.eup %4070  ;;  %v2638_v48 = vmul.f32 %v2574_v15, %v2382_v18  ;;  %v2575_v11 = vadd.f32 1.0, %v4069_v58 }
 0x3f3   :  { %v4073_v50 = vpop.eup %4072  ;;  %v2637_v46 = vmul.f32 %v2573_v27, %v2381_v54  ;;  %v2576_v60 = vadd.f32 1.0, %v4071_v29 }
 0x3f4   :  { %v4075_v30 = vpop.eup %4074  ;;  %v2912_v17 = vclamps-f32 %v2638_v48, 1.0  ;;  %v2639_v45 = vmul.f32 %v2575_v11, %v2383_v24  ;;  %v2578_v56 = vadd.f32 1.0, %v4073_v50 }
 0x3f5   :  { %v4077_v3 = vpop.eup %4076  ;;  %v2911_v26 = vclamps-f32 %v2637_v46, 1.0  ;;  %v2640_v36 = vmul.f32 %v2576_v60, %v2384_v53  ;;  %v2577_v10 = vadd.f32 1.0, %v4075_v30 }
 0x3f6   :  { %2830 = vst [vmem:[#allocation8 + $0x1d0] sm:$0xff] %v2912_v17  ;;  %v2913_v40 = vclamps-f32 %v2639_v45, 1.0  ;;  %v2642_v62 = vmul.f32 %v2578_v56, %v2386_v14  ;;  %v2579_v59 = vadd.f32 1.0, %v4077_v3 }
 0x3f7   :  { %2829 = vst [vmem:[#allocation8 + $0x1c8] sm:$0xff] %v2911_v26  ;;  %v2914_v31 = vclamps-f32 %v2640_v36, 1.0  ;;  %v2641_v6 = vmul.f32 %v2577_v10, %v2385_v9 }
 0x3f8   :  { %2831 = vst [vmem:[#allocation8 + $0x1d8] sm:$0xff] %v2913_v40  ;;  %v2916_v47 = vclamps-f32 %v2642_v62, 1.0  ;;  %v2643_v13 = vmul.f32 %v2579_v59, %v2387_v4 }
 0x3f9   :  { %2832 = vst [vmem:[#allocation8 + $0x1e0] sm:$0xff] %v2914_v31  ;;  %v2915_v19 = vclamps-f32 %v2641_v6, 1.0 }
 0x3fa   :  { %2834 = vst [vmem:[#allocation8 + $0x1f0] sm:$0xff] %v2916_v47  ;;  %v2917_v0 = vclamps-f32 %v2643_v13, 1.0 }
 0x3fb   :  { %2833 = vst [vmem:[#allocation8 + $0x1e8] sm:$0xff] %v2915_v19 }
 0x3fc   :  { %2835 = vst [vmem:[#allocation8 + $0x1f8] sm:$0xff] %v2917_v0 }
 0x3fd   :  { %4155 = shalt.err (!%p4152_p0)
}
 0x3fe   :  { %s4156_s25 = scalar_lea.hbm %s4782_s3, 8192 }
 0x3ff   :  { %p4157_p1 = scmp.ne.s32.totalorder %s4782_s3, %s4156_s25  ;;  %p4160_p2 = scmp.lt.u32.totalorder %s4156_s25, %s4782_s3 }
 0x401   :  { %p4162_p3 = pnand %p4160_p2, %p4157_p1 }
 0x403   :  { %4165 = shalt.err (!%p4162_p3)
}
 0x404   :  { %s4178_s30 = smov 512   ;;  %s4179_s4 = smov 32  }
 0x405   :  { %2847 = dma.vmem_to_hbm [thread:$0]  %s2842_s21, 8192, %s4782_s3, [#allocation4], %s4178_s30, %s4178_s30, %s4179_s4  }
 0x406   :  { %4170 = dma.done.wait [#allocation4], 8192  }
 0x407   :  { %4171 = vsyncadd [#allocation4], 4294959104 }
 0x408   :  { %2851 = vsyncpa [#allocation3], 1 }
 0x409   :  { %2852 = vsyncpa [#allocation6], 1 }
 0x40a   :  { %2853 = vsyncpa [#allocation4], 1 }

</bundles_post_ra>
